<compile_context>
chip_gen: v6e
topology: v6e:2x2x1
jax: 0.10.0
libtpu: 0.0.40
codegen_flags: <defaults>
</compile_context>

<pallas_src>
import functools

import jax
import jax.numpy as jnp
from jax.experimental import pallas as pl
from jax.experimental.pallas import tpu as pltpu

EPS = 1e-5

# Tile targets.  512 is a multiple of 256 (v6e/v7x MXU tile) and 128 (v5e MXU
# tile / lane width) and keeps the double-buffered VMEM footprint well inside
# v5e's 16 MiB scoped default and v7x's 64 MiB physical VMEM.
_TM, _TK, _TN = 512, 512, 512


def _round_up(x, m):
    return ((x + m - 1) // m) * m


def _pad_and_tile(dim, target, align):
    """Return (padded_dim, tile) with tile dividing padded_dim, tile % align == 0."""
    padded = _round_up(dim, align)
    if padded > target:
        return _round_up(dim, target), target
    return padded, padded


# ---------------------------------------------------------------------------
# Pallas kernels: tiled fused matmul  y = relu?(x @ w + bias)
# ---------------------------------------------------------------------------
def _matmul_kernel_1k(x_ref, w_ref, b_ref, o_ref, *, apply_relu):
    """Single K tile: dot + epilogue directly into the output (no scratch)."""
    y = jnp.dot(x_ref[...], w_ref[...], preferred_element_type=jnp.float32)
    y = y + b_ref[...]                                   # f32 epilogue
    if apply_relu:
        y = jnp.maximum(y, 0.0)
    o_ref[...] = y.astype(o_ref.dtype)


def _matmul_kernel_nk(x_ref, w_ref, b_ref, o_ref, acc_ref, *, apply_relu):
    """Multiple K tiles: f32 VMEM accumulator, init at k==0, epilogue at last k."""
    k = pl.program_id(2)

    @pl.when(k == 0)
    def _():
        acc_ref[...] = jnp.zeros_like(acc_ref)

    acc_ref[...] += jnp.dot(x_ref[...], w_ref[...],
                            preferred_element_type=jnp.float32)

    @pl.when(k == pl.num_programs(2) - 1)
    def _():
        y = acc_ref[...] + b_ref[...]                    # f32 epilogue
        if apply_relu:
            y = jnp.maximum(y, 0.0)
        o_ref[...] = y.astype(o_ref.dtype)


def fused_matmul(x, w, bias, apply_relu):
    """x: (M, K), w: (K, F), bias: (F,) -> (M, F) f32 = relu?(x @ w + bias).

    bf16 operands on the MXU, f32 accumulation and epilogue.  M/K/F are
    zero-padded so tiles are (8,128)-aligned and output stores are lane-dense;
    the zero padding contributes nothing and is sliced off afterwards."""
    M, K = x.shape
    F = w.shape[1]

    Mp, tm = _pad_and_tile(M, _TM, 8)
    Kp, tk = _pad_and_tile(K, _TK, 128)
    Fp, tn = _pad_and_tile(F, _TN, 128)

    xp = jnp.pad(x, ((0, Mp - M), (0, Kp - K))).astype(jnp.bfloat16)
    wp = jnp.pad(w, ((0, Kp - K), (0, Fp - F))).astype(jnp.bfloat16)
    bp = jnp.pad(bias.astype(jnp.float32), (0, Fp - F)).reshape(1, Fp)

    n_k = Kp // tk
    if n_k == 1:
        out = pl.pallas_call(
            functools.partial(_matmul_kernel_1k, apply_relu=apply_relu),
            out_shape=jax.ShapeDtypeStruct((Mp, Fp), jnp.float32),
            grid=(Mp // tm, Fp // tn),
            in_specs=[
                pl.BlockSpec((tm, tk), lambda i, j: (i, 0)),   # x tile
                pl.BlockSpec((tk, tn), lambda i, j: (0, j)),   # w tile
                pl.BlockSpec((1, tn), lambda i, j: (0, j)),    # bias
            ],
            out_specs=pl.BlockSpec((tm, tn), lambda i, j: (i, j)),
            compiler_params=pltpu.CompilerParams(
                dimension_semantics=("parallel", "parallel")),
        )(xp, wp, bp)
    else:
        out = pl.pallas_call(
            functools.partial(_matmul_kernel_nk, apply_relu=apply_relu),
            out_shape=jax.ShapeDtypeStruct((Mp, Fp), jnp.float32),
            grid=(Mp // tm, Fp // tn, n_k),
            in_specs=[
                pl.BlockSpec((tm, tk), lambda i, j, k: (i, k)),  # x tile
                pl.BlockSpec((tk, tn), lambda i, j, k: (k, j)),  # w tile
                pl.BlockSpec((1, tn), lambda i, j, k: (0, j)),   # bias
            ],
            out_specs=pl.BlockSpec((tm, tn), lambda i, j, k: (i, j)),
            scratch_shapes=[pltpu.VMEM((tm, tn), jnp.float32)],
            compiler_params=pltpu.CompilerParams(
                dimension_semantics=("parallel", "parallel", "arbitrary")),
        )(xp, wp, bp)

    return out[:M, :F]


# ---------------------------------------------------------------------------
# Layers built on top of the fused matmul kernel (glue = reshapes only)
# ---------------------------------------------------------------------------
def im2col_3x3(x):
    """(N, H, W, C) -> (N*H*W, 9*C) with zero padding of 1 (stride 1)."""
    N, H, W, C = x.shape
    xp = jnp.pad(x, ((0, 0), (1, 1), (1, 1), (0, 0)))
    cols = [xp[:, dy:dy + H, dx:dx + W, :] for dy in range(3) for dx in range(3)]
    return jnp.concatenate(cols, axis=-1).reshape(N * H * W, 9 * C)


def conv3x3_bn_relu(x, w, scale, bias):
    """3x3 conv (pad=1, no bias) + folded BatchNorm + ReLU.
    x: (N, H, W, Cin), w: (3, 3, Cin, Cout)."""
    N, H, W, Cin = x.shape
    Cout = w.shape[-1]
    # Cast before im2col so the 9x patch expansion is materialized in bf16.
    patches = im2col_3x3(x.astype(jnp.bfloat16))          # (N*H*W, 9*Cin)
    w2 = w.reshape(9 * Cin, Cout) * scale[None, :]        # fold BN scale into weights
    y = fused_matmul(patches, w2, bias, apply_relu=True)
    return y.reshape(N, H, W, Cout)


def conv_transpose2x2(x, w, b):
    """ConvTranspose2d(kernel=2, stride=2).  x: (N, H, W, Cin),
    w: (Cin, Cout, 2, 2) (PyTorch layout), b: (Cout,)."""
    N, H, W, Cin = x.shape
    Cout = w.shape[1]
    w_flat = w.reshape(Cin, Cout * 4)                     # columns ordered (co, dy, dx)
    b_rep = jnp.repeat(b, 4)                              # bias per (co, dy, dx) column
    y = fused_matmul(x.reshape(N * H * W, Cin).astype(jnp.bfloat16),
                     w_flat, b_rep, apply_relu=False)
    y = y.reshape(N, H, W, Cout, 2, 2)
    y = jnp.transpose(y, (0, 1, 4, 2, 5, 3))              # (N, H, dy, W, dx, Cout)
    return y.reshape(N, 2 * H, 2 * W, Cout)


def conv1x1(x, w, b):
    """Final 1x1 conv with bias.  w: (Cin, Cout)."""
    N, H, W, Cin = x.shape
    Cout = w.shape[1]
    y = fused_matmul(x.reshape(N * H * W, Cin).astype(jnp.bfloat16),
                     w, b, apply_relu=False)
    return y.reshape(N, H, W, Cout)


def maxpool2x2(x):
    N, H, W, C = x.shape
    return x.reshape(N, H // 2, 2, W // 2, 2, C).max(axis=(2, 4))


def double_conv_apply(x, p):
    x = conv3x3_bn_relu(x, p["w1"], p["s1"], p["b1"])
    x = conv3x3_bn_relu(x, p["w2"], p["s2"], p["b2"])
    return x


# ---------------------------------------------------------------------------
# UNet forward
# ---------------------------------------------------------------------------
def unet_forward(params, x_nchw):
    x = jnp.transpose(x_nchw, (0, 2, 3, 1))               # NCHW -> NHWC
    skips = []
    for p in params["downs"]:
        x = double_conv_apply(x, p)
        skips.append(x)
        x = maxpool2x2(x)
    x = double_conv_apply(x, params["bottleneck"])
    skips = skips[::-1]
    for i in range(len(params["up_trans"])):
        up_p = params["up_trans"][i]
        dc_p = params["up_convs"][i]
        x = conv_transpose2x2(x, up_p["w"], up_p["b"])
        skip = skips[i]
        x = jnp.concatenate([skip, x], axis=-1)           # cat((skip, x), dim=channel)
        x = double_conv_apply(x, dc_p)
    x = conv1x1(x, params["final"]["w"], params["final"]["b"])
    return jnp.transpose(x, (0, 3, 1, 2))                 # NHWC -> NCHW


# ---------------------------------------------------------------------------
# Deterministic parameter construction (synthetic, mirrors module __init__)
# ---------------------------------------------------------------------------
def init_params(key, in_channels, out_channels, features):
    keys = jax.random.split(key, 200)
    idx = [0]

    def nk():
        k = keys[idx[0]]
        idx[0] += 1
        return k

    def conv_bn(cin, cout):
        w = jax.random.normal(nk(), (3, 3, cin, cout), jnp.float32) / (3.0 * float(cin) ** 0.5)
        gamma = 1.0 + 0.1 * jax.random.normal(nk(), (cout,), jnp.float32)
        beta = 0.1 * jax.random.normal(nk(), (cout,), jnp.float32)
        run_mean = jnp.zeros((cout,), jnp.float32)
        run_var = jnp.ones((cout,), jnp.float32)
        scale = gamma / jnp.sqrt(run_var + EPS)           # folded BN (inference mode)
        bias = beta - run_mean * scale
        return w, scale, bias

    def double_conv(cin, cout):
        w1, s1, b1 = conv_bn(cin, cout)
        w2, s2, b2 = conv_bn(cout, cout)
        return {"w1": w1, "s1": s1, "b1": b1, "w2": w2, "s2": s2, "b2": b2}

    params = {"downs": [], "up_trans": [], "up_convs": []}
    c = in_channels
    for f in features:
        params["downs"].append(double_conv(c, f))
        c = f
    params["bottleneck"] = double_conv(features[-1], features[-1] * 2)
    for f in reversed(features):
        wt = jax.random.normal(nk(), (f * 2, f, 2, 2), jnp.float32) / float(f * 2 * 4) ** 0.5
        bt = 0.1 * jax.random.normal(nk(), (f,), jnp.float32)
        params["up_trans"].append({"w": wt, "b": bt})
        params["up_convs"].append(double_conv(f * 2, f))
    wf = jax.random.normal(nk(), (features[0], out_channels), jnp.float32) / float(features[0]) ** 0.5
    bf = 0.1 * jax.random.normal(nk(), (out_channels,), jnp.float32)
    params["final"] = {"w": wf, "b": bf}
    return params


if __name__ == "__main__":
    key = jax.random.PRNGKey(0)
    pkey, xkey = jax.random.split(key)

    in_channels, out_channels, features = 4, 3, [8, 16]
    batch, spatial = 2, 16

    params = init_params(pkey, in_channels, out_channels, features)
    x = jax.random.normal(xkey, (batch, in_channels, spatial, spatial), jnp.float32)

    y = jax.jit(unet_forward)(params, x)
    jax.block_until_ready(y)

    assert y.shape == (batch, out_channels, spatial, spatial), y.shape
    assert y.dtype == jnp.float32
    print("KERNEL_OK")
</pallas_src>

<mosaic_0001>
module attributes {stable_mosaic.version = 11 : i64} {
  func.func @_matmul_kernel_1k(%arg0: i32, %arg1: i32, %arg2: memref<512x128xbf16, #tpu.memory_space<vmem>>, %arg3: memref<128x128xbf16, #tpu.memory_space<vmem>>, %arg4: memref<1x128xf32, #tpu.memory_space<vmem>>, %arg5: memref<512x128xf32, #tpu.memory_space<vmem>>) attributes {dimension_semantics = [#tpu.dimension_semantics<parallel>, #tpu.dimension_semantics<parallel>], iteration_bounds = array<i64: 1, 1>, scalar_prefetch = 0 : i64, scratch_operands = 0 : i64, tpu.core_type = #tpu.core_type<tc>, window_params = [{transform_indices = @transform_0, window_bounds = array<i64: 512, 128>}, {transform_indices = @transform_1, window_bounds = array<i64: 128, 128>}, {transform_indices = @transform_2, window_bounds = array<i64: 1, 128>}, {transform_indices = @transform_3, window_bounds = array<i64: 512, 128>}]} {
    %c0 = arith.constant 0 : index
    %c0_0 = arith.constant 0 : index
    %0 = vector.load %arg2[%c0, %c0_0] : memref<512x128xbf16, #tpu.memory_space<vmem>>, vector<512x128xbf16>
    %c0_1 = arith.constant 0 : index
    %c0_2 = arith.constant 0 : index
    %1 = vector.load %arg3[%c0_1, %c0_2] : memref<128x128xbf16, #tpu.memory_space<vmem>>, vector<128x128xbf16>
    %cst = arith.constant dense<0.000000e+00> : vector<512x128xf32>
    %2 = tpu.matmul %0, %1, %cst {dimension_numbers = #tpu.dot_dimension_numbers<[1], [0], [0], [1], [0, 0, 1, 1], [], []>} : vector<512x128xbf16>, vector<128x128xbf16>, vector<512x128xf32> -> vector<512x128xf32>
    %c0_3 = arith.constant 0 : index
    %c0_4 = arith.constant 0 : index
    %3 = vector.load %arg4[%c0_3, %c0_4] : memref<1x128xf32, #tpu.memory_space<vmem>>, vector<1x128xf32>
    %4 = vector.broadcast %3 : vector<1x128xf32> to vector<512x128xf32>
    %5 = arith.addf %2, %4 : vector<512x128xf32>
    %cst_5 = arith.constant 0.000000e+00 : f32
    %6 = vector.broadcast %cst_5 : f32 to vector<512x128xf32>
    %7 = arith.maximumf %5, %6 : vector<512x128xf32>
    %c0_6 = arith.constant 0 : index
    %c0_7 = arith.constant 0 : index
    %8 = vector.load %arg5[%c0_6, %c0_7] : memref<512x128xf32, #tpu.memory_space<vmem>>, vector<512x128xf32>
    tpu.vector_store %arg5[%c0_6, %c0_7], %7 {strides = array<i32>} : memref<512x128xf32, #tpu.memory_space<vmem>>, vector<512x128xf32>,
    return
  }
  func.func @transform_0(%arg0: i32, %arg1: i32) -> (i32, i32) {
    %c0_i32 = arith.constant 0 : i32
    %c0_i32_0 = arith.constant 0 : i32
    return %arg0, %c0_i32 : i32, i32
  }
  func.func @transform_1(%arg0: i32, %arg1: i32) -> (i32, i32) {
    %c0_i32 = arith.constant 0 : i32
    %c0_i32_0 = arith.constant 0 : i32
    return %c0_i32, %arg1 : i32, i32
  }
  func.func @transform_2(%arg0: i32, %arg1: i32) -> (i32, i32) {
    %c0_i32 = arith.constant 0 : i32
    %c0_i32_0 = arith.constant 0 : i32
    return %c0_i32, %arg1 : i32, i32
  }
  func.func @transform_3(%arg0: i32, %arg1: i32) -> (i32, i32) {
    %c0_i32 = arith.constant 0 : i32
    return %arg0, %arg1 : i32, i32
  }
}

module attributes {stable_mosaic.version = 11 : i64} {
  func.func @_matmul_kernel_1k(%arg0: i32, %arg1: i32, %arg2: memref<128x128xbf16, #tpu.memory_space<vmem>>, %arg3: memref<128x128xbf16, #tpu.memory_space<vmem>>, %arg4: memref<1x128xf32, #tpu.memory_space<vmem>>, %arg5: memref<128x128xf32, #tpu.memory_space<vmem>>) attributes {dimension_semantics = [#tpu.dimension_semantics<parallel>, #tpu.dimension_semantics<parallel>], iteration_bounds = array<i64: 1, 1>, scalar_prefetch = 0 : i64, scratch_operands = 0 : i64, tpu.core_type = #tpu.core_type<tc>, window_params = [{transform_indices = @transform_0, window_bounds = array<i64: 128, 128>}, {transform_indices = @transform_1, window_bounds = array<i64: 128, 128>}, {transform_indices = @transform_2, window_bounds = array<i64: 1, 128>}, {transform_indices = @transform_3, window_bounds = array<i64: 128, 128>}]} {
    %c0 = arith.constant 0 : index
    %c0_0 = arith.constant 0 : index
    %0 = vector.load %arg2[%c0, %c0_0] : memref<128x128xbf16, #tpu.memory_space<vmem>>, vector<128x128xbf16>
    %c0_1 = arith.constant 0 : index
    %c0_2 = arith.constant 0 : index
    %1 = vector.load %arg3[%c0_1, %c0_2] : memref<128x128xbf16, #tpu.memory_space<vmem>>, vector<128x128xbf16>
    %cst = arith.constant dense<0.000000e+00> : vector<128x128xf32>
    %2 = tpu.matmul %0, %1, %cst {dimension_numbers = #tpu.dot_dimension_numbers<[1], [0], [0], [1], [0, 0, 1, 1], [], []>} : vector<128x128xbf16>, vector<128x128xbf16>, vector<128x128xf32> -> vector<128x128xf32>
    %c0_3 = arith.constant 0 : index
    %c0_4 = arith.constant 0 : index
    %3 = vector.load %arg4[%c0_3, %c0_4] : memref<1x128xf32, #tpu.memory_space<vmem>>, vector<1x128xf32>
    %4 = vector.broadcast %3 : vector<1x128xf32> to vector<128x128xf32>
    %5 = arith.addf %2, %4 : vector<128x128xf32>
    %cst_5 = arith.constant 0.000000e+00 : f32
    %6 = vector.broadcast %cst_5 : f32 to vector<128x128xf32>
    %7 = arith.maximumf %5, %6 : vector<128x128xf32>
    %c0_6 = arith.constant 0 : index
    %c0_7 = arith.constant 0 : index
    %8 = vector.load %arg5[%c0_6, %c0_7] : memref<128x128xf32, #tpu.memory_space<vmem>>, vector<128x128xf32>
    tpu.vector_store %arg5[%c0_6, %c0_7], %7 {strides = array<i32>} : memref<128x128xf32, #tpu.memory_space<vmem>>, vector<128x128xf32>,
    return
  }
  func.func @transform_0(%arg0: i32, %arg1: i32) -> (i32, i32) {
    %c0_i32 = arith.constant 0 : i32
    %c0_i32_0 = arith.constant 0 : i32
    return %arg0, %c0_i32 : i32, i32
  }
  func.func @transform_1(%arg0: i32, %arg1: i32) -> (i32, i32) {
    %c0_i32 = arith.constant 0 : i32
    %c0_i32_0 = arith.constant 0 : i32
    return %c0_i32, %arg1 : i32, i32
  }
  func.func @transform_2(%arg0: i32, %arg1: i32) -> (i32, i32) {
    %c0_i32 = arith.constant 0 : i32
    %c0_i32_0 = arith.constant 0 : i32
    return %c0_i32, %arg1 : i32, i32
  }
  func.func @transform_3(%arg0: i32, %arg1: i32) -> (i32, i32) {
    %c0_i32 = arith.constant 0 : i32
    return %arg0, %arg1 : i32, i32
  }
}

module attributes {stable_mosaic.version = 11 : i64} {
  func.func @_matmul_kernel_1k(%arg0: i32, %arg1: i32, %arg2: memref<128x256xbf16, #tpu.memory_space<vmem>>, %arg3: memref<256x128xbf16, #tpu.memory_space<vmem>>, %arg4: memref<1x128xf32, #tpu.memory_space<vmem>>, %arg5: memref<128x128xf32, #tpu.memory_space<vmem>>) attributes {dimension_semantics = [#tpu.dimension_semantics<parallel>, #tpu.dimension_semantics<parallel>], iteration_bounds = array<i64: 1, 1>, scalar_prefetch = 0 : i64, scratch_operands = 0 : i64, tpu.core_type = #tpu.core_type<tc>, window_params = [{transform_indices = @transform_0, window_bounds = array<i64: 128, 256>}, {transform_indices = @transform_1, window_bounds = array<i64: 256, 128>}, {transform_indices = @transform_2, window_bounds = array<i64: 1, 128>}, {transform_indices = @transform_3, window_bounds = array<i64: 128, 128>}]} {
    %c0 = arith.constant 0 : index
    %c0_0 = arith.constant 0 : index
    %0 = vector.load %arg2[%c0, %c0_0] : memref<128x256xbf16, #tpu.memory_space<vmem>>, vector<128x256xbf16>
    %c0_1 = arith.constant 0 : index
    %c0_2 = arith.constant 0 : index
    %1 = vector.load %arg3[%c0_1, %c0_2] : memref<256x128xbf16, #tpu.memory_space<vmem>>, vector<256x128xbf16>
    %cst = arith.constant dense<0.000000e+00> : vector<128x128xf32>
    %2 = tpu.matmul %0, %1, %cst {dimension_numbers = #tpu.dot_dimension_numbers<[1], [0], [0], [1], [0, 0, 1, 1], [], []>} : vector<128x256xbf16>, vector<256x128xbf16>, vector<128x128xf32> -> vector<128x128xf32>
    %c0_3 = arith.constant 0 : index
    %c0_4 = arith.constant 0 : index
    %3 = vector.load %arg4[%c0_3, %c0_4] : memref<1x128xf32, #tpu.memory_space<vmem>>, vector<1x128xf32>
    %4 = vector.broadcast %3 : vector<1x128xf32> to vector<128x128xf32>
    %5 = arith.addf %2, %4 : vector<128x128xf32>
    %cst_5 = arith.constant 0.000000e+00 : f32
    %6 = vector.broadcast %cst_5 : f32 to vector<128x128xf32>
    %7 = arith.maximumf %5, %6 : vector<128x128xf32>
    %c0_6 = arith.constant 0 : index
    %c0_7 = arith.constant 0 : index
    %8 = vector.load %arg5[%c0_6, %c0_7] : memref<128x128xf32, #tpu.memory_space<vmem>>, vector<128x128xf32>
    tpu.vector_store %arg5[%c0_6, %c0_7], %7 {strides = array<i32>} : memref<128x128xf32, #tpu.memory_space<vmem>>, vector<128x128xf32>,
    return
  }
  func.func @transform_0(%arg0: i32, %arg1: i32) -> (i32, i32) {
    %c0_i32 = arith.constant 0 : i32
    %c0_i32_0 = arith.constant 0 : i32
    return %arg0, %c0_i32 : i32, i32
  }
  func.func @transform_1(%arg0: i32, %arg1: i32) -> (i32, i32) {
    %c0_i32 = arith.constant 0 : i32
    %c0_i32_0 = arith.constant 0 : i32
    return %c0_i32, %arg1 : i32, i32
  }
  func.func @transform_2(%arg0: i32, %arg1: i32) -> (i32, i32) {
    %c0_i32 = arith.constant 0 : i32
    %c0_i32_0 = arith.constant 0 : i32
    return %c0_i32, %arg1 : i32, i32
  }
  func.func @transform_3(%arg0: i32, %arg1: i32) -> (i32, i32) {
    %c0_i32 = arith.constant 0 : i32
    return %arg0, %arg1 : i32, i32
  }
}

module attributes {stable_mosaic.version = 11 : i64} {
  func.func @_matmul_kernel_1k(%arg0: i32, %arg1: i32, %arg2: memref<32x256xbf16, #tpu.memory_space<vmem>>, %arg3: memref<256x128xbf16, #tpu.memory_space<vmem>>, %arg4: memref<1x128xf32, #tpu.memory_space<vmem>>, %arg5: memref<32x128xf32, #tpu.memory_space<vmem>>) attributes {dimension_semantics = [#tpu.dimension_semantics<parallel>, #tpu.dimension_semantics<parallel>], iteration_bounds = array<i64: 1, 1>, scalar_prefetch = 0 : i64, scratch_operands = 0 : i64, tpu.core_type = #tpu.core_type<tc>, window_params = [{transform_indices = @transform_0, window_bounds = array<i64: 32, 256>}, {transform_indices = @transform_1, window_bounds = array<i64: 256, 128>}, {transform_indices = @transform_2, window_bounds = array<i64: 1, 128>}, {transform_indices = @transform_3, window_bounds = array<i64: 32, 128>}]} {
    %c0 = arith.constant 0 : index
    %c0_0 = arith.constant 0 : index
    %0 = vector.load %arg2[%c0, %c0_0] : memref<32x256xbf16, #tpu.memory_space<vmem>>, vector<32x256xbf16>
    %c0_1 = arith.constant 0 : index
    %c0_2 = arith.constant 0 : index
    %1 = vector.load %arg3[%c0_1, %c0_2] : memref<256x128xbf16, #tpu.memory_space<vmem>>, vector<256x128xbf16>
    %cst = arith.constant dense<0.000000e+00> : vector<32x128xf32>
    %2 = tpu.matmul %0, %1, %cst {dimension_numbers = #tpu.dot_dimension_numbers<[1], [0], [0], [1], [0, 0, 1, 1], [], []>} : vector<32x256xbf16>, vector<256x128xbf16>, vector<32x128xf32> -> vector<32x128xf32>
    %c0_3 = arith.constant 0 : index
    %c0_4 = arith.constant 0 : index
    %3 = vector.load %arg4[%c0_3, %c0_4] : memref<1x128xf32, #tpu.memory_space<vmem>>, vector<1x128xf32>
    %4 = vector.broadcast %3 : vector<1x128xf32> to vector<32x128xf32>
    %5 = arith.addf %2, %4 : vector<32x128xf32>
    %cst_5 = arith.constant 0.000000e+00 : f32
    %6 = vector.broadcast %cst_5 : f32 to vector<32x128xf32>
    %7 = arith.maximumf %5, %6 : vector<32x128xf32>
    %c0_6 = arith.constant 0 : index
    %c0_7 = arith.constant 0 : index
    %8 = vector.load %arg5[%c0_6, %c0_7] : memref<32x128xf32, #tpu.memory_space<vmem>>, vector<32x128xf32>
    tpu.vector_store %arg5[%c0_6, %c0_7], %7 {strides = array<i32>} : memref<32x128xf32, #tpu.memory_space<vmem>>, vector<32x128xf32>,
    return
  }
  func.func @transform_0(%arg0: i32, %arg1: i32) -> (i32, i32) {
    %c0_i32 = arith.constant 0 : i32
    %c0_i32_0 = arith.constant 0 : i32
    return %arg0, %c0_i32 : i32, i32
  }
  func.func @transform_1(%arg0: i32, %arg1: i32) -> (i32, i32) {
    %c0_i32 = arith.constant 0 : i32
    %c0_i32_0 = arith.constant 0 : i32
    return %c0_i32, %arg1 : i32, i32
  }
  func.func @transform_2(%arg0: i32, %arg1: i32) -> (i32, i32) {
    %c0_i32 = arith.constant 0 : i32
    %c0_i32_0 = arith.constant 0 : i32
    return %c0_i32, %arg1 : i32, i32
  }
  func.func @transform_3(%arg0: i32, %arg1: i32) -> (i32, i32) {
    %c0_i32 = arith.constant 0 : i32
    return %arg0, %arg1 : i32, i32
  }
}

module attributes {stable_mosaic.version = 11 : i64} {
  func.func @_matmul_kernel_1k(%arg0: i32, %arg1: i32, %arg2: memref<32x384xbf16, #tpu.memory_space<vmem>>, %arg3: memref<384x128xbf16, #tpu.memory_space<vmem>>, %arg4: memref<1x128xf32, #tpu.memory_space<vmem>>, %arg5: memref<32x128xf32, #tpu.memory_space<vmem>>) attributes {dimension_semantics = [#tpu.dimension_semantics<parallel>, #tpu.dimension_semantics<parallel>], iteration_bounds = array<i64: 1, 1>, scalar_prefetch = 0 : i64, scratch_operands = 0 : i64, tpu.core_type = #tpu.core_type<tc>, window_params = [{transform_indices = @transform_0, window_bounds = array<i64: 32, 384>}, {transform_indices = @transform_1, window_bounds = array<i64: 384, 128>}, {transform_indices = @transform_2, window_bounds = array<i64: 1, 128>}, {transform_indices = @transform_3, window_bounds = array<i64: 32, 128>}]} {
    %c0 = arith.constant 0 : index
    %c0_0 = arith.constant 0 : index
    %0 = vector.load %arg2[%c0, %c0_0] : memref<32x384xbf16, #tpu.memory_space<vmem>>, vector<32x384xbf16>
    %c0_1 = arith.constant 0 : index
    %c0_2 = arith.constant 0 : index
    %1 = vector.load %arg3[%c0_1, %c0_2] : memref<384x128xbf16, #tpu.memory_space<vmem>>, vector<384x128xbf16>
    %cst = arith.constant dense<0.000000e+00> : vector<32x128xf32>
    %2 = tpu.matmul %0, %1, %cst {dimension_numbers = #tpu.dot_dimension_numbers<[1], [0], [0], [1], [0, 0, 1, 1], [], []>} : vector<32x384xbf16>, vector<384x128xbf16>, vector<32x128xf32> -> vector<32x128xf32>
    %c0_3 = arith.constant 0 : index
    %c0_4 = arith.constant 0 : index
    %3 = vector.load %arg4[%c0_3, %c0_4] : memref<1x128xf32, #tpu.memory_space<vmem>>, vector<1x128xf32>
    %4 = vector.broadcast %3 : vector<1x128xf32> to vector<32x128xf32>
    %5 = arith.addf %2, %4 : vector<32x128xf32>
    %cst_5 = arith.constant 0.000000e+00 : f32
    %6 = vector.broadcast %cst_5 : f32 to vector<32x128xf32>
    %7 = arith.maximumf %5, %6 : vector<32x128xf32>
    %c0_6 = arith.constant 0 : index
    %c0_7 = arith.constant 0 : index
    %8 = vector.load %arg5[%c0_6, %c0_7] : memref<32x128xf32, #tpu.memory_space<vmem>>, vector<32x128xf32>
    tpu.vector_store %arg5[%c0_6, %c0_7], %7 {strides = array<i32>} : memref<32x128xf32, #tpu.memory_space<vmem>>, vector<32x128xf32>,
    return
  }
  func.func @transform_0(%arg0: i32, %arg1: i32) -> (i32, i32) {
    %c0_i32 = arith.constant 0 : i32
    %c0_i32_0 = arith.constant 0 : i32
    return %arg0, %c0_i32 : i32, i32
  }
  func.func @transform_1(%arg0: i32, %arg1: i32) -> (i32, i32) {
    %c0_i32 = arith.constant 0 : i32
    %c0_i32_0 = arith.constant 0 : i32
    return %c0_i32, %arg1 : i32, i32
  }
  func.func @transform_2(%arg0: i32, %arg1: i32) -> (i32, i32) {
    %c0_i32 = arith.constant 0 : i32
    %c0_i32_0 = arith.constant 0 : i32
    return %c0_i32, %arg1 : i32, i32
  }
  func.func @transform_3(%arg0: i32, %arg1: i32) -> (i32, i32) {
    %c0_i32 = arith.constant 0 : i32
    return %arg0, %arg1 : i32, i32
  }
}

module attributes {stable_mosaic.version = 11 : i64} {
  func.func @_matmul_kernel_1k(%arg0: i32, %arg1: i32, %arg2: memref<32x128xbf16, #tpu.memory_space<vmem>>, %arg3: memref<128x128xbf16, #tpu.memory_space<vmem>>, %arg4: memref<1x128xf32, #tpu.memory_space<vmem>>, %arg5: memref<32x128xf32, #tpu.memory_space<vmem>>) attributes {dimension_semantics = [#tpu.dimension_semantics<parallel>, #tpu.dimension_semantics<parallel>], iteration_bounds = array<i64: 1, 1>, scalar_prefetch = 0 : i64, scratch_operands = 0 : i64, tpu.core_type = #tpu.core_type<tc>, window_params = [{transform_indices = @transform_0, window_bounds = array<i64: 32, 128>}, {transform_indices = @transform_1, window_bounds = array<i64: 128, 128>}, {transform_indices = @transform_2, window_bounds = array<i64: 1, 128>}, {transform_indices = @transform_3, window_bounds = array<i64: 32, 128>}]} {
    %c0 = arith.constant 0 : index
    %c0_0 = arith.constant 0 : index
    %0 = vector.load %arg2[%c0, %c0_0] : memref<32x128xbf16, #tpu.memory_space<vmem>>, vector<32x128xbf16>
    %c0_1 = arith.constant 0 : index
    %c0_2 = arith.constant 0 : index
    %1 = vector.load %arg3[%c0_1, %c0_2] : memref<128x128xbf16, #tpu.memory_space<vmem>>, vector<128x128xbf16>
    %cst = arith.constant dense<0.000000e+00> : vector<32x128xf32>
    %2 = tpu.matmul %0, %1, %cst {dimension_numbers = #tpu.dot_dimension_numbers<[1], [0], [0], [1], [0, 0, 1, 1], [], []>} : vector<32x128xbf16>, vector<128x128xbf16>, vector<32x128xf32> -> vector<32x128xf32>
    %c0_3 = arith.constant 0 : index
    %c0_4 = arith.constant 0 : index
    %3 = vector.load %arg4[%c0_3, %c0_4] : memref<1x128xf32, #tpu.memory_space<vmem>>, vector<1x128xf32>
    %4 = vector.broadcast %3 : vector<1x128xf32> to vector<32x128xf32>
    %5 = arith.addf %2, %4 : vector<32x128xf32>
    %c0_5 = arith.constant 0 : index
    %c0_6 = arith.constant 0 : index
    %6 = vector.load %arg5[%c0_5, %c0_6] : memref<32x128xf32, #tpu.memory_space<vmem>>, vector<32x128xf32>
    tpu.vector_store %arg5[%c0_5, %c0_6], %5 {strides = array<i32>} : memref<32x128xf32, #tpu.memory_space<vmem>>, vector<32x128xf32>,
    return
  }
  func.func @transform_0(%arg0: i32, %arg1: i32) -> (i32, i32) {
    %c0_i32 = arith.constant 0 : i32
    %c0_i32_0 = arith.constant 0 : i32
    return %arg0, %c0_i32 : i32, i32
  }
  func.func @transform_1(%arg0: i32, %arg1: i32) -> (i32, i32) {
    %c0_i32 = arith.constant 0 : i32
    %c0_i32_0 = arith.constant 0 : i32
    return %c0_i32, %arg1 : i32, i32
  }
  func.func @transform_2(%arg0: i32, %arg1: i32) -> (i32, i32) {
    %c0_i32 = arith.constant 0 : i32
    %c0_i32_0 = arith.constant 0 : i32
    return %c0_i32, %arg1 : i32, i32
  }
  func.func @transform_3(%arg0: i32, %arg1: i32) -> (i32, i32) {
    %c0_i32 = arith.constant 0 : i32
    return %arg0, %arg1 : i32, i32
  }
}

module attributes {stable_mosaic.version = 11 : i64} {
  func.func @_matmul_kernel_1k(%arg0: i32, %arg1: i32, %arg2: memref<128x384xbf16, #tpu.memory_space<vmem>>, %arg3: memref<384x128xbf16, #tpu.memory_space<vmem>>, %arg4: memref<1x128xf32, #tpu.memory_space<vmem>>, %arg5: memref<128x128xf32, #tpu.memory_space<vmem>>) attributes {dimension_semantics = [#tpu.dimension_semantics<parallel>, #tpu.dimension_semantics<parallel>], iteration_bounds = array<i64: 1, 1>, scalar_prefetch = 0 : i64, scratch_operands = 0 : i64, tpu.core_type = #tpu.core_type<tc>, window_params = [{transform_indices = @transform_0, window_bounds = array<i64: 128, 384>}, {transform_indices = @transform_1, window_bounds = array<i64: 384, 128>}, {transform_indices = @transform_2, window_bounds = array<i64: 1, 128>}, {transform_indices = @transform_3, window_bounds = array<i64: 128, 128>}]} {
    %c0 = arith.constant 0 : index
    %c0_0 = arith.constant 0 : index
    %0 = vector.load %arg2[%c0, %c0_0] : memref<128x384xbf16, #tpu.memory_space<vmem>>, vector<128x384xbf16>
    %c0_1 = arith.constant 0 : index
    %c0_2 = arith.constant 0 : index
    %1 = vector.load %arg3[%c0_1, %c0_2] : memref<384x128xbf16, #tpu.memory_space<vmem>>, vector<384x128xbf16>
    %cst = arith.constant dense<0.000000e+00> : vector<128x128xf32>
    %2 = tpu.matmul %0, %1, %cst {dimension_numbers = #tpu.dot_dimension_numbers<[1], [0], [0], [1], [0, 0, 1, 1], [], []>} : vector<128x384xbf16>, vector<384x128xbf16>, vector<128x128xf32> -> vector<128x128xf32>
    %c0_3 = arith.constant 0 : index
    %c0_4 = arith.constant 0 : index
    %3 = vector.load %arg4[%c0_3, %c0_4] : memref<1x128xf32, #tpu.memory_space<vmem>>, vector<1x128xf32>
    %4 = vector.broadcast %3 : vector<1x128xf32> to vector<128x128xf32>
    %5 = arith.addf %2, %4 : vector<128x128xf32>
    %cst_5 = arith.constant 0.000000e+00 : f32
    %6 = vector.broadcast %cst_5 : f32 to vector<128x128xf32>
    %7 = arith.maximumf %5, %6 : vector<128x128xf32>
    %c0_6 = arith.constant 0 : index
    %c0_7 = arith.constant 0 : index
    %8 = vector.load %arg5[%c0_6, %c0_7] : memref<128x128xf32, #tpu.memory_space<vmem>>, vector<128x128xf32>
    tpu.vector_store %arg5[%c0_6, %c0_7], %7 {strides = array<i32>} : memref<128x128xf32, #tpu.memory_space<vmem>>, vector<128x128xf32>,
    return
  }
  func.func @transform_0(%arg0: i32, %arg1: i32) -> (i32, i32) {
    %c0_i32 = arith.constant 0 : i32
    %c0_i32_0 = arith.constant 0 : i32
    return %arg0, %c0_i32 : i32, i32
  }
  func.func @transform_1(%arg0: i32, %arg1: i32) -> (i32, i32) {
    %c0_i32 = arith.constant 0 : i32
    %c0_i32_0 = arith.constant 0 : i32
    return %c0_i32, %arg1 : i32, i32
  }
  func.func @transform_2(%arg0: i32, %arg1: i32) -> (i32, i32) {
    %c0_i32 = arith.constant 0 : i32
    %c0_i32_0 = arith.constant 0 : i32
    return %c0_i32, %arg1 : i32, i32
  }
  func.func @transform_3(%arg0: i32, %arg1: i32) -> (i32, i32) {
    %c0_i32 = arith.constant 0 : i32
    return %arg0, %arg1 : i32, i32
  }
}

module attributes {stable_mosaic.version = 11 : i64} {
  func.func @_matmul_kernel_1k(%arg0: i32, %arg1: i32, %arg2: memref<128x128xbf16, #tpu.memory_space<vmem>>, %arg3: memref<128x128xbf16, #tpu.memory_space<vmem>>, %arg4: memref<1x128xf32, #tpu.memory_space<vmem>>, %arg5: memref<128x128xf32, #tpu.memory_space<vmem>>) attributes {dimension_semantics = [#tpu.dimension_semantics<parallel>, #tpu.dimension_semantics<parallel>], iteration_bounds = array<i64: 1, 1>, scalar_prefetch = 0 : i64, scratch_operands = 0 : i64, tpu.core_type = #tpu.core_type<tc>, window_params = [{transform_indices = @transform_0, window_bounds = array<i64: 128, 128>}, {transform_indices = @transform_1, window_bounds = array<i64: 128, 128>}, {transform_indices = @transform_2, window_bounds = array<i64: 1, 128>}, {transform_indices = @transform_3, window_bounds = array<i64: 128, 128>}]} {
    %c0 = arith.constant 0 : index
    %c0_0 = arith.constant 0 : index
    %0 = vector.load %arg2[%c0, %c0_0] : memref<128x128xbf16, #tpu.memory_space<vmem>>, vector<128x128xbf16>
    %c0_1 = arith.constant 0 : index
    %c0_2 = arith.constant 0 : index
    %1 = vector.load %arg3[%c0_1, %c0_2] : memref<128x128xbf16, #tpu.memory_space<vmem>>, vector<128x128xbf16>
    %cst = arith.constant dense<0.000000e+00> : vector<128x128xf32>
    %2 = tpu.matmul %0, %1, %cst {dimension_numbers = #tpu.dot_dimension_numbers<[1], [0], [0], [1], [0, 0, 1, 1], [], []>} : vector<128x128xbf16>, vector<128x128xbf16>, vector<128x128xf32> -> vector<128x128xf32>
    %c0_3 = arith.constant 0 : index
    %c0_4 = arith.constant 0 : index
    %3 = vector.load %arg4[%c0_3, %c0_4] : memref<1x128xf32, #tpu.memory_space<vmem>>, vector<1x128xf32>
    %4 = vector.broadcast %3 : vector<1x128xf32> to vector<128x128xf32>
    %5 = arith.addf %2, %4 : vector<128x128xf32>
    %c0_5 = arith.constant 0 : index
    %c0_6 = arith.constant 0 : index
    %6 = vector.load %arg5[%c0_5, %c0_6] : memref<128x128xf32, #tpu.memory_space<vmem>>, vector<128x128xf32>
    tpu.vector_store %arg5[%c0_5, %c0_6], %5 {strides = array<i32>} : memref<128x128xf32, #tpu.memory_space<vmem>>, vector<128x128xf32>,
    return
  }
  func.func @transform_0(%arg0: i32, %arg1: i32) -> (i32, i32) {
    %c0_i32 = arith.constant 0 : i32
    %c0_i32_0 = arith.constant 0 : i32
    return %arg0, %c0_i32 : i32, i32
  }
  func.func @transform_1(%arg0: i32, %arg1: i32) -> (i32, i32) {
    %c0_i32 = arith.constant 0 : i32
    %c0_i32_0 = arith.constant 0 : i32
    return %c0_i32, %arg1 : i32, i32
  }
  func.func @transform_2(%arg0: i32, %arg1: i32) -> (i32, i32) {
    %c0_i32 = arith.constant 0 : i32
    %c0_i32_0 = arith.constant 0 : i32
    return %c0_i32, %arg1 : i32, i32
  }
  func.func @transform_3(%arg0: i32, %arg1: i32) -> (i32, i32) {
    %c0_i32 = arith.constant 0 : i32
    return %arg0, %arg1 : i32, i32
  }
}

module attributes {stable_mosaic.version = 11 : i64} {
  func.func @_matmul_kernel_1k(%arg0: i32, %arg1: i32, %arg2: memref<512x256xbf16, #tpu.memory_space<vmem>>, %arg3: memref<256x128xbf16, #tpu.memory_space<vmem>>, %arg4: memref<1x128xf32, #tpu.memory_space<vmem>>, %arg5: memref<512x128xf32, #tpu.memory_space<vmem>>) attributes {dimension_semantics = [#tpu.dimension_semantics<parallel>, #tpu.dimension_semantics<parallel>], iteration_bounds = array<i64: 1, 1>, scalar_prefetch = 0 : i64, scratch_operands = 0 : i64, tpu.core_type = #tpu.core_type<tc>, window_params = [{transform_indices = @transform_0, window_bounds = array<i64: 512, 256>}, {transform_indices = @transform_1, window_bounds = array<i64: 256, 128>}, {transform_indices = @transform_2, window_bounds = array<i64: 1, 128>}, {transform_indices = @transform_3, window_bounds = array<i64: 512, 128>}]} {
    %c0 = arith.constant 0 : index
    %c0_0 = arith.constant 0 : index
    %0 = vector.load %arg2[%c0, %c0_0] : memref<512x256xbf16, #tpu.memory_space<vmem>>, vector<512x256xbf16>
    %c0_1 = arith.constant 0 : index
    %c0_2 = arith.constant 0 : index
    %1 = vector.load %arg3[%c0_1, %c0_2] : memref<256x128xbf16, #tpu.memory_space<vmem>>, vector<256x128xbf16>
    %cst = arith.constant dense<0.000000e+00> : vector<512x128xf32>
    %2 = tpu.matmul %0, %1, %cst {dimension_numbers = #tpu.dot_dimension_numbers<[1], [0], [0], [1], [0, 0, 1, 1], [], []>} : vector<512x256xbf16>, vector<256x128xbf16>, vector<512x128xf32> -> vector<512x128xf32>
    %c0_3 = arith.constant 0 : index
    %c0_4 = arith.constant 0 : index
    %3 = vector.load %arg4[%c0_3, %c0_4] : memref<1x128xf32, #tpu.memory_space<vmem>>, vector<1x128xf32>
    %4 = vector.broadcast %3 : vector<1x128xf32> to vector<512x128xf32>
    %5 = arith.addf %2, %4 : vector<512x128xf32>
    %cst_5 = arith.constant 0.000000e+00 : f32
    %6 = vector.broadcast %cst_5 : f32 to vector<512x128xf32>
    %7 = arith.maximumf %5, %6 : vector<512x128xf32>
    %c0_6 = arith.constant 0 : index
    %c0_7 = arith.constant 0 : index
    %8 = vector.load %arg5[%c0_6, %c0_7] : memref<512x128xf32, #tpu.memory_space<vmem>>, vector<512x128xf32>
    tpu.vector_store %arg5[%c0_6, %c0_7], %7 {strides = array<i32>} : memref<512x128xf32, #tpu.memory_space<vmem>>, vector<512x128xf32>,
    return
  }
  func.func @transform_0(%arg0: i32, %arg1: i32) -> (i32, i32) {
    %c0_i32 = arith.constant 0 : i32
    %c0_i32_0 = arith.constant 0 : i32
    return %arg0, %c0_i32 : i32, i32
  }
  func.func @transform_1(%arg0: i32, %arg1: i32) -> (i32, i32) {
    %c0_i32 = arith.constant 0 : i32
    %c0_i32_0 = arith.constant 0 : i32
    return %c0_i32, %arg1 : i32, i32
  }
  func.func @transform_2(%arg0: i32, %arg1: i32) -> (i32, i32) {
    %c0_i32 = arith.constant 0 : i32
    %c0_i32_0 = arith.constant 0 : i32
    return %c0_i32, %arg1 : i32, i32
  }
  func.func @transform_3(%arg0: i32, %arg1: i32) -> (i32, i32) {
    %c0_i32 = arith.constant 0 : i32
    return %arg0, %arg1 : i32, i32
  }
}

module attributes {stable_mosaic.version = 11 : i64} {
  func.func @_matmul_kernel_1k(%arg0: i32, %arg1: i32, %arg2: memref<512x128xbf16, #tpu.memory_space<vmem>>, %arg3: memref<128x128xbf16, #tpu.memory_space<vmem>>, %arg4: memref<1x128xf32, #tpu.memory_space<vmem>>, %arg5: memref<512x128xf32, #tpu.memory_space<vmem>>) attributes {dimension_semantics = [#tpu.dimension_semantics<parallel>, #tpu.dimension_semantics<parallel>], iteration_bounds = array<i64: 1, 1>, scalar_prefetch = 0 : i64, scratch_operands = 0 : i64, tpu.core_type = #tpu.core_type<tc>, window_params = [{transform_indices = @transform_0, window_bounds = array<i64: 512, 128>}, {transform_indices = @transform_1, window_bounds = array<i64: 128, 128>}, {transform_indices = @transform_2, window_bounds = array<i64: 1, 128>}, {transform_indices = @transform_3, window_bounds = array<i64: 512, 128>}]} {
    %c0 = arith.constant 0 : index
    %c0_0 = arith.constant 0 : index
    %0 = vector.load %arg2[%c0, %c0_0] : memref<512x128xbf16, #tpu.memory_space<vmem>>, vector<512x128xbf16>
    %c0_1 = arith.constant 0 : index
    %c0_2 = arith.constant 0 : index
    %1 = vector.load %arg3[%c0_1, %c0_2] : memref<128x128xbf16, #tpu.memory_space<vmem>>, vector<128x128xbf16>
    %cst = arith.constant dense<0.000000e+00> : vector<512x128xf32>
    %2 = tpu.matmul %0, %1, %cst {dimension_numbers = #tpu.dot_dimension_numbers<[1], [0], [0], [1], [0, 0, 1, 1], [], []>} : vector<512x128xbf16>, vector<128x128xbf16>, vector<512x128xf32> -> vector<512x128xf32>
    %c0_3 = arith.constant 0 : index
    %c0_4 = arith.constant 0 : index
    %3 = vector.load %arg4[%c0_3, %c0_4] : memref<1x128xf32, #tpu.memory_space<vmem>>, vector<1x128xf32>
    %4 = vector.broadcast %3 : vector<1x128xf32> to vector<512x128xf32>
    %5 = arith.addf %2, %4 : vector<512x128xf32>
    %c0_5 = arith.constant 0 : index
    %c0_6 = arith.constant 0 : index
    %6 = vector.load %arg5[%c0_5, %c0_6] : memref<512x128xf32, #tpu.memory_space<vmem>>, vector<512x128xf32>
    tpu.vector_store %arg5[%c0_5, %c0_6], %5 {strides = array<i32>} : memref<512x128xf32, #tpu.memory_space<vmem>>, vector<512x128xf32>,
    return
  }
  func.func @transform_0(%arg0: i32, %arg1: i32) -> (i32, i32) {
    %c0_i32 = arith.constant 0 : i32
    %c0_i32_0 = arith.constant 0 : i32
    return %arg0, %c0_i32 : i32, i32
  }
  func.func @transform_1(%arg0: i32, %arg1: i32) -> (i32, i32) {
    %c0_i32 = arith.constant 0 : i32
    %c0_i32_0 = arith.constant 0 : i32
    return %c0_i32, %arg1 : i32, i32
  }
  func.func @transform_2(%arg0: i32, %arg1: i32) -> (i32, i32) {
    %c0_i32 = arith.constant 0 : i32
    %c0_i32_0 = arith.constant 0 : i32
    return %c0_i32, %arg1 : i32, i32
  }
  func.func @transform_3(%arg0: i32, %arg1: i32) -> (i32, i32) {
    %c0_i32 = arith.constant 0 : i32
    return %arg0, %arg1 : i32, i32
  }
}

</mosaic_0001>

<bundles_post_ra>
// kernel: unet_forward.13
= control target key start
LH: loop header
LB: loop body
LE: loop exit
PB: predicated region body
PF: predicated region fallthrough
CT: control target
= control target key end

     0   :  { %s1381_s1 = inlined_call_operand.vmem [shape: bf16[128,128], index: 1, kind: input, shape index: {}]   ;;  %s1382_s0 = inlined_call_operand.vmem [shape: bf16[512,128], index: 0, kind: input, shape index: {}]   ;;  %s1383_s2 = inlined_call_operand.vmem [shape: f32[1,128], index: 2, kind: input, shape index: {}]   ;;  %s1384_s3 = inlined_call_operand.vmem [shape: f32[512,128], index: 3, kind: output, shape index: {}]  }
   0x1   :  { %v940_v0 = vld [vmem:[%s1381_s1 + $0x38] sm:$0xff]   ;;  %v941_v1 = vld [vmem:[%s1381_s1 + $0x30] sm:$0xff]   ;;  %v942_v2 = vld [vmem:[%s1381_s1 + $0x28] sm:$0xff]  }
   0x2   :  { %844 = vmatprep.subr.bf16.mxu0 %v940_v0  ;;  %924 = vmatprep.subr.bf16.mxu1 %v940_v0  ;;  %v943_v3 = vld [vmem:[%s1381_s1 + $0x20] sm:$0xff]   ;;  %v944_v6 = vld [vmem:[%s1381_s1 + $0x18] sm:$0xff]   ;;  %v945_v7 = vld [vmem:[%s1381_s1 + $0x10] sm:$0xff]  }
   0x3   :  { %845 = vmatpush3.bf16.msra.mxu0 %v940_v0  ;;  %932 = vmatpush3.bf16.msra.mxu1 %v940_v0  ;;  %v948_v4 = vld [vmem:[%s1382_s0] sm:$0xff]   ;;  %v946_v8 = vld [vmem:[%s1381_s1 + $0x8] sm:$0xff]   ;;  %v952_v12 = vld [vmem:[%s1382_s0 + $0x10] sm:$0xff]  }
   0x4   :  { %846 = vmatprep.subr.bf16.mxu0 %v941_v1  ;;  %925 = vmatprep.subr.bf16.mxu1 %v941_v1  ;;  %v949_v5 = vld [vmem:[%s1382_s0 + $0x80] sm:$0xff]   ;;  %v950_v10 = vld [vmem:[%s1382_s0 + $0x8] sm:$0xff]   ;;  %v953_v13 = vld [vmem:[%s1382_s0 + $0x90] sm:$0xff]  }
   0x5   :  { %860 = vmatprep.mubr.bf16.mxu0 %v948_v4  ;;  %892 = vmatprep.mubr.bf16.mxu1 %v949_v5  ;;  %v947_v9 = vld [vmem:[%s1381_s1] sm:$0xff]   ;;  %v951_v11 = vld [vmem:[%s1382_s0 + $0x88] sm:$0xff]   ;;  %v954_v14 = vld [vmem:[%s1382_s0 + $0x18] sm:$0xff]  }
   0x6   :  { %v955_v15 = vld [vmem:[%s1382_s0 + $0x98] sm:$0xff]   ;;  %v956_v16 = vld [vmem:[%s1382_s0 + $0x20] sm:$0xff]   ;;  %v958_v18 = vld [vmem:[%s1382_s0 + $0x28] sm:$0xff]  }
   0x7   :  { %847 = vmatpush3.bf16.msra.mxu0 %v941_v1  ;;  %933 = vmatpush3.bf16.msra.mxu1 %v941_v1  ;;  %v957_v17 = vld [vmem:[%s1382_s0 + $0xa0] sm:$0xff]   ;;  %v959_v19 = vld [vmem:[%s1382_s0 + $0xa8] sm:$0xff]   ;;  %v960_v20 = vld [vmem:[%s1382_s0 + $0x30] sm:$0xff]  }
   0x8   :  { %848 = vmatprep.subr.bf16.mxu0 %v942_v2  ;;  %926 = vmatprep.subr.bf16.mxu1 %v942_v2  ;;  %v961_v21 = vld [vmem:[%s1382_s0 + $0xb0] sm:$0xff]   ;;  %v962_v22 = vld [vmem:[%s1382_s0 + $0x38] sm:$0xff]   ;;  %v964_v24 = vld [vmem:[%s1382_s0 + $0x40] sm:$0xff]  }
   0x9   :  { %v963_v23 = vld [vmem:[%s1382_s0 + $0xb8] sm:$0xff]   ;;  %v965_v25 = vld [vmem:[%s1382_s0 + $0xc0] sm:$0xff]   ;;  %v966_v26 = vld [vmem:[%s1382_s0 + $0x48] sm:$0xff]  }
   0xa   :  { %v967_v27 = vld [vmem:[%s1382_s0 + $0xc8] sm:$0xff]   ;;  %v968_v28 = vld [vmem:[%s1382_s0 + $0x50] sm:$0xff]   ;;  %v970_v30 = vld [vmem:[%s1382_s0 + $0x58] sm:$0xff]  }
   0xb   :  { %849 = vmatpush3.bf16.msra.mxu0 %v942_v2  ;;  %934 = vmatpush3.bf16.msra.mxu1 %v942_v2  ;;  %v969_v29 = vld [vmem:[%s1382_s0 + $0xd0] sm:$0xff]   ;;  %v971_v31 = vld [vmem:[%s1382_s0 + $0xd8] sm:$0xff]   ;;  %v972_v32 = vld [vmem:[%s1382_s0 + $0x60] sm:$0xff]  }
   0xc   :  { %850 = vmatprep.subr.bf16.mxu0 %v943_v3  ;;  %927 = vmatprep.subr.bf16.mxu1 %v943_v3  ;;  %v973_v33 = vld [vmem:[%s1382_s0 + $0xe0] sm:$0xff]   ;;  %v974_v34 = vld [vmem:[%s1382_s0 + $0x68] sm:$0xff]   ;;  %v976_v36 = vld [vmem:[%s1382_s0 + $0x70] sm:$0xff]  }
   0xd   :  { %v975_v35 = vld [vmem:[%s1382_s0 + $0xe8] sm:$0xff]   ;;  %v977_v37 = vld [vmem:[%s1382_s0 + $0xf0] sm:$0xff]   ;;  %v978_v38 = vld [vmem:[%s1382_s0 + $0x78] sm:$0xff]  }
   0xe   :  { %v979_v39 = vld [vmem:[%s1382_s0 + $0xf8] sm:$0xff]   ;;  %v1123_v40 = vld [vmem:[%s1383_s2] ss:$0 sm:$0xff] }
   0xf   :  { %851 = vmatpush3.bf16.msra.mxu0 %v943_v3  ;;  %935 = vmatpush3.bf16.msra.mxu1 %v943_v3 }
  0x10   :  { %852 = vmatprep.subr.bf16.mxu0 %v944_v6  ;;  %928 = vmatprep.subr.bf16.mxu1 %v944_v6 }
  0x13   :  { %853 = vmatpush3.bf16.msra.mxu0 %v944_v6  ;;  %936 = vmatpush3.bf16.msra.mxu1 %v944_v6 }
  0x14   :  { %854 = vmatprep.subr.bf16.mxu0 %v945_v7  ;;  %929 = vmatprep.subr.bf16.mxu1 %v945_v7 }
  0x17   :  { %855 = vmatpush3.bf16.msra.mxu0 %v945_v7  ;;  %937 = vmatpush3.bf16.msra.mxu1 %v945_v7 }
  0x18   :  { %856 = vmatprep.subr.bf16.mxu0 %v946_v8  ;;  %930 = vmatprep.subr.bf16.mxu1 %v946_v8 }
  0x1b   :  { %857 = vmatpush3.bf16.msra.mxu0 %v946_v8  ;;  %938 = vmatpush3.bf16.msra.mxu1 %v946_v8 }
  0x1c   :  { %858 = vmatprep.subr.bf16.mxu0 %v947_v9  ;;  %931 = vmatprep.subr.bf16.mxu1 %v947_v9 }
  0x1f   :  { %859 = vmatpush3.bf16.msra.mxu0 %v947_v9  ;;  %939 = vmatpush3.bf16.msra.mxu1 %v947_v9 }
  0x22   :  { %861 = vmatmul.mubr.bf16.vlgmr.msra.gmra.mxu0 %v950_v10  ;;  %893 = vmatmul.mubr.bf16.vlgmr.msra.gmra.mxu1 %v951_v11 }
  0x23   :  { %864 = vmatprep.mubr.bf16.mxu0 %v952_v12  ;;  %896 = vmatprep.mubr.bf16.mxu1 %v953_v13 }
  0x2a   :  { %865 = vmatmul.mubr.bf16.gmra.mxu0 %v954_v14  ;;  %897 = vmatmul.mubr.bf16.gmra.mxu1 %v955_v15 }
  0x2b   :  { %868 = vmatprep.mubr.bf16.mxu0 %v956_v16  ;;  %900 = vmatprep.mubr.bf16.mxu1 %v957_v17 }
  0x32   :  { %869 = vmatmul.mubr.bf16.gmra.mxu0 %v958_v18  ;;  %901 = vmatmul.mubr.bf16.gmra.mxu1 %v959_v19 }
  0x33   :  { %872 = vmatprep.mubr.bf16.mxu0 %v960_v20  ;;  %904 = vmatprep.mubr.bf16.mxu1 %v961_v21 }
  0x3a   :  { %873 = vmatmul.mubr.bf16.gmra.mxu0 %v962_v22  ;;  %905 = vmatmul.mubr.bf16.gmra.mxu1 %v963_v23 }
  0x3b   :  { %876 = vmatprep.mubr.bf16.mxu0 %v964_v24  ;;  %908 = vmatprep.mubr.bf16.mxu1 %v965_v25 }
  0x42   :  { %877 = vmatmul.mubr.bf16.gmra.mxu0 %v966_v26  ;;  %909 = vmatmul.mubr.bf16.gmra.mxu1 %v967_v27 }
  0x43   :  { %880 = vmatprep.mubr.bf16.mxu0 %v968_v28  ;;  %912 = vmatprep.mubr.bf16.mxu1 %v969_v29 }
  0x4a   :  { %881 = vmatmul.mubr.bf16.gmra.mxu0 %v970_v30  ;;  %913 = vmatmul.mubr.bf16.gmra.mxu1 %v971_v31 }
  0x4b   :  { %884 = vmatprep.mubr.bf16.mxu0 %v972_v32  ;;  %916 = vmatprep.mubr.bf16.mxu1 %v973_v33 }
  0x52   :  { %885 = vmatmul.mubr.bf16.gmra.mxu0 %v974_v34  ;;  %917 = vmatmul.mubr.bf16.gmra.mxu1 %v975_v35 }
  0x53   :  { %888 = vmatprep.mubr.bf16.mxu0 %v976_v36  ;;  %920 = vmatprep.mubr.bf16.mxu1 %v977_v37 }
  0x5a   :  { %889 = vmatmul.mubr.bf16.gmra.mxu0 %v978_v38  ;;  %921 = vmatmul.mubr.bf16.gmra.mxu1 %v979_v39 }
  0xe2   :  { %v862_v41 = vpop.f32.mrf.mxu0  ;;  %v894_v42 = vpop.f32.mrf.mxu1 }
  0xe3   :  { %v385_v43 = vadd.f32 %v862_v41, %v1123_v40  ;;  %v513_v44 = vadd.f32 %v894_v42, %v1123_v40 }
  0xe4   :  { %v376_v45 = vpop.f32.mrf.mxu0  ;;  %v504_v46 = vpop.f32.mrf.mxu1 }
  0xe5   :  { %v633_v47 = vmax.f32 %v385_v43, 0.0  ;;  %v665_v48 = vmax.f32 %v513_v44, 0.0  ;;  %v377_v49 = vadd.f32 %v1123_v40, %v376_v45  ;;  %v505_v50 = vadd.f32 %v1123_v40, %v504_v46 }
  0xe6   :  { %v863_v51 = vpop.f32.mrf.mxu0  ;;  %v895_v52 = vpop.f32.mrf.mxu1 }
  0xe7   :  { %697 = vst [vmem:[%s1384_s3 + $0x10] sm:$0xff] %v633_v47  ;;  %729 = vst [vmem:[%s1384_s3 + $0x110] sm:$0xff] %v665_v48  ;;  %v631_v53 = vmax.f32 %v377_v49, 0.0  ;;  %v663_v54 = vmax.f32 %v505_v50, 0.0  ;;  %v388_v55 = vadd.f32 %v863_v51, %v1123_v40  ;;  %v516_v56 = vadd.f32 %v895_v52, %v1123_v40 }
  0xe8   :  { %v379_v57 = vpop.f32.mrf.mxu0  ;;  %v507_v58 = vpop.f32.mrf.mxu1 }
  0xe9   :  { %695 = vst [vmem:[%s1384_s3] sm:$0xff] %v631_v53  ;;  %727 = vst [vmem:[%s1384_s3 + $0x100] sm:$0xff] %v663_v54  ;;  %v634_v59 = vmax.f32 %v388_v55, 0.0  ;;  %v666_v60 = vmax.f32 %v516_v56, 0.0  ;;  %v380_v61 = vadd.f32 %v1123_v40, %v379_v57  ;;  %v508_v62 = vadd.f32 %v1123_v40, %v507_v58 }
  0xea   :  { %v866_v63 = vpop.f32.mrf.mxu0  ;;  %v898_v0 = vpop.f32.mrf.mxu1 }
  0xeb   :  { %698 = vst [vmem:[%s1384_s3 + $0x18] sm:$0xff] %v634_v59  ;;  %730 = vst [vmem:[%s1384_s3 + $0x118] sm:$0xff] %v666_v60  ;;  %v632_v1 = vmax.f32 %v380_v61, 0.0  ;;  %v664_v2 = vmax.f32 %v508_v62, 0.0  ;;  %v401_v3 = vadd.f32 %v866_v63, %v1123_v40  ;;  %v529_v4 = vadd.f32 %v898_v0, %v1123_v40 }
  0xec   :  { %v392_v5 = vpop.f32.mrf.mxu0  ;;  %v520_v6 = vpop.f32.mrf.mxu1 }
  0xed   :  { %696 = vst [vmem:[%s1384_s3 + $0x8] sm:$0xff] %v632_v1  ;;  %728 = vst [vmem:[%s1384_s3 + $0x108] sm:$0xff] %v664_v2  ;;  %v637_v7 = vmax.f32 %v401_v3, 0.0  ;;  %v669_v8 = vmax.f32 %v529_v4, 0.0  ;;  %v393_v9 = vadd.f32 %v1123_v40, %v392_v5  ;;  %v521_v10 = vadd.f32 %v1123_v40, %v520_v6 }
  0xee   :  { %v867_v11 = vpop.f32.mrf.mxu0  ;;  %v899_v12 = vpop.f32.mrf.mxu1 }
  0xef   :  { %701 = vst [vmem:[%s1384_s3 + $0x30] sm:$0xff] %v637_v7  ;;  %733 = vst [vmem:[%s1384_s3 + $0x130] sm:$0xff] %v669_v8  ;;  %v635_v13 = vmax.f32 %v393_v9, 0.0  ;;  %v667_v14 = vmax.f32 %v521_v10, 0.0  ;;  %v404_v15 = vadd.f32 %v867_v11, %v1123_v40  ;;  %v532_v16 = vadd.f32 %v899_v12, %v1123_v40 }
  0xf0   :  { %v395_v17 = vpop.f32.mrf.mxu0  ;;  %v523_v18 = vpop.f32.mrf.mxu1 }
  0xf1   :  { %699 = vst [vmem:[%s1384_s3 + $0x20] sm:$0xff] %v635_v13  ;;  %731 = vst [vmem:[%s1384_s3 + $0x120] sm:$0xff] %v667_v14  ;;  %v638_v19 = vmax.f32 %v404_v15, 0.0  ;;  %v670_v20 = vmax.f32 %v532_v16, 0.0  ;;  %v396_v21 = vadd.f32 %v1123_v40, %v395_v17  ;;  %v524_v22 = vadd.f32 %v1123_v40, %v523_v18 }
  0xf2   :  { %v870_v23 = vpop.f32.mrf.mxu0  ;;  %v902_v24 = vpop.f32.mrf.mxu1 }
  0xf3   :  { %702 = vst [vmem:[%s1384_s3 + $0x38] sm:$0xff] %v638_v19  ;;  %734 = vst [vmem:[%s1384_s3 + $0x138] sm:$0xff] %v670_v20  ;;  %v636_v25 = vmax.f32 %v396_v21, 0.0  ;;  %v668_v26 = vmax.f32 %v524_v22, 0.0  ;;  %v417_v27 = vadd.f32 %v870_v23, %v1123_v40  ;;  %v545_v28 = vadd.f32 %v902_v24, %v1123_v40 }
  0xf4   :  { %v408_v29 = vpop.f32.mrf.mxu0  ;;  %v536_v30 = vpop.f32.mrf.mxu1 }
  0xf5   :  { %700 = vst [vmem:[%s1384_s3 + $0x28] sm:$0xff] %v636_v25  ;;  %732 = vst [vmem:[%s1384_s3 + $0x128] sm:$0xff] %v668_v26  ;;  %v641_v31 = vmax.f32 %v417_v27, 0.0  ;;  %v673_v32 = vmax.f32 %v545_v28, 0.0  ;;  %v409_v33 = vadd.f32 %v1123_v40, %v408_v29  ;;  %v537_v34 = vadd.f32 %v1123_v40, %v536_v30 }
  0xf6   :  { %v871_v35 = vpop.f32.mrf.mxu0  ;;  %v903_v36 = vpop.f32.mrf.mxu1 }
  0xf7   :  { %705 = vst [vmem:[%s1384_s3 + $0x50] sm:$0xff] %v641_v31  ;;  %737 = vst [vmem:[%s1384_s3 + $0x150] sm:$0xff] %v673_v32  ;;  %v639_v37 = vmax.f32 %v409_v33, 0.0  ;;  %v671_v38 = vmax.f32 %v537_v34, 0.0  ;;  %v420_v39 = vadd.f32 %v871_v35, %v1123_v40  ;;  %v548_v41 = vadd.f32 %v903_v36, %v1123_v40 }
  0xf8   :  { %v411_v42 = vpop.f32.mrf.mxu0  ;;  %v539_v43 = vpop.f32.mrf.mxu1 }
  0xf9   :  { %703 = vst [vmem:[%s1384_s3 + $0x40] sm:$0xff] %v639_v37  ;;  %735 = vst [vmem:[%s1384_s3 + $0x140] sm:$0xff] %v671_v38  ;;  %v642_v44 = vmax.f32 %v420_v39, 0.0  ;;  %v674_v45 = vmax.f32 %v548_v41, 0.0  ;;  %v412_v46 = vadd.f32 %v1123_v40, %v411_v42  ;;  %v540_v47 = vadd.f32 %v1123_v40, %v539_v43 }
  0xfa   :  { %v874_v48 = vpop.f32.mrf.mxu0  ;;  %v906_v49 = vpop.f32.mrf.mxu1 }
  0xfb   :  { %706 = vst [vmem:[%s1384_s3 + $0x58] sm:$0xff] %v642_v44  ;;  %738 = vst [vmem:[%s1384_s3 + $0x158] sm:$0xff] %v674_v45  ;;  %v640_v50 = vmax.f32 %v412_v46, 0.0  ;;  %v672_v51 = vmax.f32 %v540_v47, 0.0  ;;  %v433_v52 = vadd.f32 %v874_v48, %v1123_v40  ;;  %v561_v53 = vadd.f32 %v906_v49, %v1123_v40 }
  0xfc   :  { %v424_v54 = vpop.f32.mrf.mxu0  ;;  %v552_v55 = vpop.f32.mrf.mxu1 }
  0xfd   :  { %704 = vst [vmem:[%s1384_s3 + $0x48] sm:$0xff] %v640_v50  ;;  %736 = vst [vmem:[%s1384_s3 + $0x148] sm:$0xff] %v672_v51  ;;  %v645_v56 = vmax.f32 %v433_v52, 0.0  ;;  %v677_v57 = vmax.f32 %v561_v53, 0.0  ;;  %v425_v58 = vadd.f32 %v1123_v40, %v424_v54  ;;  %v553_v59 = vadd.f32 %v1123_v40, %v552_v55 }
  0xfe   :  { %v875_v60 = vpop.f32.mrf.mxu0  ;;  %v907_v61 = vpop.f32.mrf.mxu1 }
  0xff   :  { %709 = vst [vmem:[%s1384_s3 + $0x70] sm:$0xff] %v645_v56  ;;  %741 = vst [vmem:[%s1384_s3 + $0x170] sm:$0xff] %v677_v57  ;;  %v643_v62 = vmax.f32 %v425_v58, 0.0  ;;  %v675_v63 = vmax.f32 %v553_v59, 0.0  ;;  %v436_v0 = vadd.f32 %v875_v60, %v1123_v40  ;;  %v564_v1 = vadd.f32 %v907_v61, %v1123_v40 }
 0x100   :  { %v427_v2 = vpop.f32.mrf.mxu0  ;;  %v555_v3 = vpop.f32.mrf.mxu1 }
 0x101   :  { %707 = vst [vmem:[%s1384_s3 + $0x60] sm:$0xff] %v643_v62  ;;  %739 = vst [vmem:[%s1384_s3 + $0x160] sm:$0xff] %v675_v63  ;;  %v646_v4 = vmax.f32 %v436_v0, 0.0  ;;  %v678_v5 = vmax.f32 %v564_v1, 0.0  ;;  %v428_v6 = vadd.f32 %v1123_v40, %v427_v2  ;;  %v556_v7 = vadd.f32 %v1123_v40, %v555_v3 }
 0x102   :  { %v878_v8 = vpop.f32.mrf.mxu0  ;;  %v910_v9 = vpop.f32.mrf.mxu1 }
 0x103   :  { %710 = vst [vmem:[%s1384_s3 + $0x78] sm:$0xff] %v646_v4  ;;  %742 = vst [vmem:[%s1384_s3 + $0x178] sm:$0xff] %v678_v5  ;;  %v644_v10 = vmax.f32 %v428_v6, 0.0  ;;  %v676_v11 = vmax.f32 %v556_v7, 0.0  ;;  %v449_v12 = vadd.f32 %v878_v8, %v1123_v40  ;;  %v577_v13 = vadd.f32 %v910_v9, %v1123_v40 }
 0x104   :  { %v440_v14 = vpop.f32.mrf.mxu0  ;;  %v568_v15 = vpop.f32.mrf.mxu1 }
 0x105   :  { %708 = vst [vmem:[%s1384_s3 + $0x68] sm:$0xff] %v644_v10  ;;  %740 = vst [vmem:[%s1384_s3 + $0x168] sm:$0xff] %v676_v11  ;;  %v649_v16 = vmax.f32 %v449_v12, 0.0  ;;  %v681_v17 = vmax.f32 %v577_v13, 0.0  ;;  %v441_v18 = vadd.f32 %v1123_v40, %v440_v14  ;;  %v569_v19 = vadd.f32 %v1123_v40, %v568_v15 }
 0x106   :  { %v879_v20 = vpop.f32.mrf.mxu0  ;;  %v911_v21 = vpop.f32.mrf.mxu1 }
 0x107   :  { %713 = vst [vmem:[%s1384_s3 + $0x90] sm:$0xff] %v649_v16  ;;  %745 = vst [vmem:[%s1384_s3 + $0x190] sm:$0xff] %v681_v17  ;;  %v647_v22 = vmax.f32 %v441_v18, 0.0  ;;  %v679_v23 = vmax.f32 %v569_v19, 0.0  ;;  %v452_v24 = vadd.f32 %v879_v20, %v1123_v40  ;;  %v580_v25 = vadd.f32 %v911_v21, %v1123_v40 }
 0x108   :  { %v443_v26 = vpop.f32.mrf.mxu0  ;;  %v571_v27 = vpop.f32.mrf.mxu1 }
 0x109   :  { %711 = vst [vmem:[%s1384_s3 + $0x80] sm:$0xff] %v647_v22  ;;  %743 = vst [vmem:[%s1384_s3 + $0x180] sm:$0xff] %v679_v23  ;;  %v650_v28 = vmax.f32 %v452_v24, 0.0  ;;  %v682_v29 = vmax.f32 %v580_v25, 0.0  ;;  %v444_v30 = vadd.f32 %v1123_v40, %v443_v26  ;;  %v572_v31 = vadd.f32 %v1123_v40, %v571_v27 }
 0x10a   :  { %v882_v32 = vpop.f32.mrf.mxu0  ;;  %v914_v33 = vpop.f32.mrf.mxu1 }
 0x10b   :  { %714 = vst [vmem:[%s1384_s3 + $0x98] sm:$0xff] %v650_v28  ;;  %746 = vst [vmem:[%s1384_s3 + $0x198] sm:$0xff] %v682_v29  ;;  %v648_v34 = vmax.f32 %v444_v30, 0.0  ;;  %v680_v35 = vmax.f32 %v572_v31, 0.0  ;;  %v465_v36 = vadd.f32 %v882_v32, %v1123_v40  ;;  %v593_v37 = vadd.f32 %v914_v33, %v1123_v40 }
 0x10c   :  { %v456_v38 = vpop.f32.mrf.mxu0  ;;  %v584_v39 = vpop.f32.mrf.mxu1 }
 0x10d   :  { %712 = vst [vmem:[%s1384_s3 + $0x88] sm:$0xff] %v648_v34  ;;  %744 = vst [vmem:[%s1384_s3 + $0x188] sm:$0xff] %v680_v35  ;;  %v653_v41 = vmax.f32 %v465_v36, 0.0  ;;  %v685_v42 = vmax.f32 %v593_v37, 0.0  ;;  %v457_v43 = vadd.f32 %v1123_v40, %v456_v38  ;;  %v585_v44 = vadd.f32 %v1123_v40, %v584_v39 }
 0x10e   :  { %v883_v45 = vpop.f32.mrf.mxu0  ;;  %v915_v46 = vpop.f32.mrf.mxu1 }
 0x10f   :  { %717 = vst [vmem:[%s1384_s3 + $0xb0] sm:$0xff] %v653_v41  ;;  %749 = vst [vmem:[%s1384_s3 + $0x1b0] sm:$0xff] %v685_v42  ;;  %v651_v47 = vmax.f32 %v457_v43, 0.0  ;;  %v683_v48 = vmax.f32 %v585_v44, 0.0  ;;  %v468_v49 = vadd.f32 %v883_v45, %v1123_v40  ;;  %v596_v50 = vadd.f32 %v915_v46, %v1123_v40 }
 0x110   :  { %v459_v51 = vpop.f32.mrf.mxu0  ;;  %v587_v52 = vpop.f32.mrf.mxu1 }
 0x111   :  { %715 = vst [vmem:[%s1384_s3 + $0xa0] sm:$0xff] %v651_v47  ;;  %747 = vst [vmem:[%s1384_s3 + $0x1a0] sm:$0xff] %v683_v48  ;;  %v654_v53 = vmax.f32 %v468_v49, 0.0  ;;  %v686_v54 = vmax.f32 %v596_v50, 0.0  ;;  %v460_v55 = vadd.f32 %v1123_v40, %v459_v51  ;;  %v588_v56 = vadd.f32 %v1123_v40, %v587_v52 }
 0x112   :  { %v886_v57 = vpop.f32.mrf.mxu0  ;;  %v918_v58 = vpop.f32.mrf.mxu1 }
 0x113   :  { %718 = vst [vmem:[%s1384_s3 + $0xb8] sm:$0xff] %v654_v53  ;;  %750 = vst [vmem:[%s1384_s3 + $0x1b8] sm:$0xff] %v686_v54  ;;  %v652_v59 = vmax.f32 %v460_v55, 0.0  ;;  %v684_v60 = vmax.f32 %v588_v56, 0.0  ;;  %v481_v61 = vadd.f32 %v886_v57, %v1123_v40  ;;  %v609_v62 = vadd.f32 %v918_v58, %v1123_v40 }
 0x114   :  { %v472_v63 = vpop.f32.mrf.mxu0  ;;  %v600_v0 = vpop.f32.mrf.mxu1 }
 0x115   :  { %716 = vst [vmem:[%s1384_s3 + $0xa8] sm:$0xff] %v652_v59  ;;  %748 = vst [vmem:[%s1384_s3 + $0x1a8] sm:$0xff] %v684_v60  ;;  %v657_v1 = vmax.f32 %v481_v61, 0.0  ;;  %v689_v2 = vmax.f32 %v609_v62, 0.0  ;;  %v473_v3 = vadd.f32 %v1123_v40, %v472_v63  ;;  %v601_v4 = vadd.f32 %v1123_v40, %v600_v0 }
 0x116   :  { %v887_v5 = vpop.f32.mrf.mxu0  ;;  %v919_v6 = vpop.f32.mrf.mxu1 }
 0x117   :  { %721 = vst [vmem:[%s1384_s3 + $0xd0] sm:$0xff] %v657_v1  ;;  %753 = vst [vmem:[%s1384_s3 + $0x1d0] sm:$0xff] %v689_v2  ;;  %v655_v7 = vmax.f32 %v473_v3, 0.0  ;;  %v687_v8 = vmax.f32 %v601_v4, 0.0  ;;  %v484_v9 = vadd.f32 %v887_v5, %v1123_v40  ;;  %v612_v10 = vadd.f32 %v919_v6, %v1123_v40 }
 0x118   :  { %v475_v11 = vpop.f32.mrf.mxu0  ;;  %v603_v12 = vpop.f32.mrf.mxu1 }
 0x119   :  { %719 = vst [vmem:[%s1384_s3 + $0xc0] sm:$0xff] %v655_v7  ;;  %751 = vst [vmem:[%s1384_s3 + $0x1c0] sm:$0xff] %v687_v8  ;;  %v658_v13 = vmax.f32 %v484_v9, 0.0  ;;  %v690_v14 = vmax.f32 %v612_v10, 0.0  ;;  %v476_v15 = vadd.f32 %v1123_v40, %v475_v11  ;;  %v604_v16 = vadd.f32 %v1123_v40, %v603_v12 }
 0x11a   :  { %v890_v17 = vpop.f32.mrf.mxu0  ;;  %v922_v18 = vpop.f32.mrf.mxu1 }
 0x11b   :  { %722 = vst [vmem:[%s1384_s3 + $0xd8] sm:$0xff] %v658_v13  ;;  %754 = vst [vmem:[%s1384_s3 + $0x1d8] sm:$0xff] %v690_v14  ;;  %v656_v19 = vmax.f32 %v476_v15, 0.0  ;;  %v688_v20 = vmax.f32 %v604_v16, 0.0  ;;  %v497_v21 = vadd.f32 %v890_v17, %v1123_v40  ;;  %v625_v22 = vadd.f32 %v922_v18, %v1123_v40 }
 0x11c   :  { %v488_v23 = vpop.f32.mrf.mxu0  ;;  %v616_v24 = vpop.f32.mrf.mxu1 }
 0x11d   :  { %720 = vst [vmem:[%s1384_s3 + $0xc8] sm:$0xff] %v656_v19  ;;  %752 = vst [vmem:[%s1384_s3 + $0x1c8] sm:$0xff] %v688_v20  ;;  %v661_v25 = vmax.f32 %v497_v21, 0.0  ;;  %v693_v26 = vmax.f32 %v625_v22, 0.0  ;;  %v489_v27 = vadd.f32 %v1123_v40, %v488_v23  ;;  %v617_v28 = vadd.f32 %v1123_v40, %v616_v24 }
 0x11e   :  { %v891_v29 = vpop.f32.mrf.mxu0  ;;  %v923_v30 = vpop.f32.mrf.mxu1 }
 0x11f   :  { %725 = vst [vmem:[%s1384_s3 + $0xf0] sm:$0xff] %v661_v25  ;;  %757 = vst [vmem:[%s1384_s3 + $0x1f0] sm:$0xff] %v693_v26  ;;  %v659_v31 = vmax.f32 %v489_v27, 0.0  ;;  %v691_v32 = vmax.f32 %v617_v28, 0.0  ;;  %v500_v33 = vadd.f32 %v891_v29, %v1123_v40  ;;  %v628_v34 = vadd.f32 %v923_v30, %v1123_v40 }
 0x120   :  { %v491_v35 = vpop.f32.mrf.mxu0  ;;  %v619_v36 = vpop.f32.mrf.mxu1 }
 0x121   :  { %723 = vst [vmem:[%s1384_s3 + $0xe0] sm:$0xff] %v659_v31  ;;  %755 = vst [vmem:[%s1384_s3 + $0x1e0] sm:$0xff] %v691_v32  ;;  %v662_v37 = vmax.f32 %v500_v33, 0.0  ;;  %v694_v38 = vmax.f32 %v628_v34, 0.0  ;;  %v492_v39 = vadd.f32 %v1123_v40, %v491_v35  ;;  %v620_v41 = vadd.f32 %v1123_v40, %v619_v36 }
 0x123   :  { %726 = vst [vmem:[%s1384_s3 + $0xf8] sm:$0xff] %v662_v37  ;;  %758 = vst [vmem:[%s1384_s3 + $0x1f8] sm:$0xff] %v694_v38  ;;  %v660_v42 = vmax.f32 %v492_v39, 0.0  ;;  %v692_v43 = vmax.f32 %v620_v41, 0.0 }
 0x125   :  { %724 = vst [vmem:[%s1384_s3 + $0xe8] sm:$0xff] %v660_v42  ;;  %756 = vst [vmem:[%s1384_s3 + $0x1e8] sm:$0xff] %v692_v43 }

// kernel: unet_forward.15
= control target key start
LH: loop header
LB: loop body
LE: loop exit
PB: predicated region body
PF: predicated region fallthrough
CT: control target
= control target key end

     0   :  { %s499_s1 = inlined_call_operand.vmem [shape: bf16[128,128], index: 1, kind: input, shape index: {}]   ;;  %s500_s0 = inlined_call_operand.vmem [shape: bf16[128,128], index: 0, kind: input, shape index: {}]   ;;  %s501_s2 = inlined_call_operand.vmem [shape: f32[1,128], index: 2, kind: input, shape index: {}]   ;;  %s502_s3 = inlined_call_operand.vmem [shape: f32[128,128], index: 3, kind: output, shape index: {}]  }
   0x1   :  { %v364_v0 = vld [vmem:[%s499_s1 + $0x38] sm:$0xff]   ;;  %v365_v1 = vld [vmem:[%s499_s1 + $0x30] sm:$0xff]   ;;  %v366_v2 = vld [vmem:[%s499_s1 + $0x28] sm:$0xff]  }
   0x2   :  { %316 = vmatprep.subr.bf16.mxu0 %v364_v0  ;;  %348 = vmatprep.subr.bf16.mxu1 %v364_v0  ;;  %v367_v3 = vld [vmem:[%s499_s1 + $0x20] sm:$0xff]   ;;  %v368_v6 = vld [vmem:[%s499_s1 + $0x18] sm:$0xff]   ;;  %v369_v7 = vld [vmem:[%s499_s1 + $0x10] sm:$0xff]  }
   0x3   :  { %317 = vmatpush3.bf16.msra.mxu0 %v364_v0  ;;  %356 = vmatpush3.bf16.msra.mxu1 %v364_v0  ;;  %v372_v4 = vld [vmem:[%s500_s0] sm:$0xff]   ;;  %v370_v8 = vld [vmem:[%s499_s1 + $0x8] sm:$0xff]   ;;  %v376_v12 = vld [vmem:[%s500_s0 + $0x10] sm:$0xff]  }
   0x4   :  { %318 = vmatprep.subr.bf16.mxu0 %v365_v1  ;;  %349 = vmatprep.subr.bf16.mxu1 %v365_v1  ;;  %v373_v5 = vld [vmem:[%s500_s0 + $0x20] sm:$0xff]   ;;  %v374_v10 = vld [vmem:[%s500_s0 + $0x8] sm:$0xff]   ;;  %v377_v13 = vld [vmem:[%s500_s0 + $0x30] sm:$0xff]  }
   0x5   :  { %332 = vmatprep.mubr.bf16.mxu0 %v372_v4  ;;  %340 = vmatprep.mubr.bf16.mxu1 %v373_v5  ;;  %v371_v9 = vld [vmem:[%s499_s1] sm:$0xff]   ;;  %v375_v11 = vld [vmem:[%s500_s0 + $0x28] sm:$0xff]   ;;  %v378_v14 = vld [vmem:[%s500_s0 + $0x18] sm:$0xff]  }
   0x6   :  { %v379_v15 = vld [vmem:[%s500_s0 + $0x38] sm:$0xff]   ;;  %v283_v16 = vld [vmem:[%s501_s2] ss:$0 sm:$0xff] }
   0x7   :  { %319 = vmatpush3.bf16.msra.mxu0 %v365_v1  ;;  %357 = vmatpush3.bf16.msra.mxu1 %v365_v1 }
   0x8   :  { %320 = vmatprep.subr.bf16.mxu0 %v366_v2  ;;  %350 = vmatprep.subr.bf16.mxu1 %v366_v2 }
   0xb   :  { %321 = vmatpush3.bf16.msra.mxu0 %v366_v2  ;;  %358 = vmatpush3.bf16.msra.mxu1 %v366_v2 }
   0xc   :  { %322 = vmatprep.subr.bf16.mxu0 %v367_v3  ;;  %351 = vmatprep.subr.bf16.mxu1 %v367_v3 }
   0xf   :  { %323 = vmatpush3.bf16.msra.mxu0 %v367_v3  ;;  %359 = vmatpush3.bf16.msra.mxu1 %v367_v3 }
  0x10   :  { %324 = vmatprep.subr.bf16.mxu0 %v368_v6  ;;  %352 = vmatprep.subr.bf16.mxu1 %v368_v6 }
  0x13   :  { %325 = vmatpush3.bf16.msra.mxu0 %v368_v6  ;;  %360 = vmatpush3.bf16.msra.mxu1 %v368_v6 }
  0x14   :  { %326 = vmatprep.subr.bf16.mxu0 %v369_v7  ;;  %353 = vmatprep.subr.bf16.mxu1 %v369_v7 }
  0x17   :  { %327 = vmatpush3.bf16.msra.mxu0 %v369_v7  ;;  %361 = vmatpush3.bf16.msra.mxu1 %v369_v7 }
  0x18   :  { %328 = vmatprep.subr.bf16.mxu0 %v370_v8  ;;  %354 = vmatprep.subr.bf16.mxu1 %v370_v8 }
  0x1b   :  { %329 = vmatpush3.bf16.msra.mxu0 %v370_v8  ;;  %362 = vmatpush3.bf16.msra.mxu1 %v370_v8 }
  0x1c   :  { %330 = vmatprep.subr.bf16.mxu0 %v371_v9  ;;  %355 = vmatprep.subr.bf16.mxu1 %v371_v9 }
  0x1f   :  { %331 = vmatpush3.bf16.msra.mxu0 %v371_v9  ;;  %363 = vmatpush3.bf16.msra.mxu1 %v371_v9 }
  0x22   :  { %333 = vmatmul.mubr.bf16.vlgmr.msra.gmra.mxu0 %v374_v10  ;;  %341 = vmatmul.mubr.bf16.vlgmr.msra.gmra.mxu1 %v375_v11 }
  0x23   :  { %336 = vmatprep.mubr.bf16.mxu0 %v376_v12  ;;  %344 = vmatprep.mubr.bf16.mxu1 %v377_v13 }
  0x2a   :  { %337 = vmatmul.mubr.bf16.gmra.mxu0 %v378_v14  ;;  %345 = vmatmul.mubr.bf16.gmra.mxu1 %v379_v15 }
  0xe2   :  { %v334_v17 = vpop.f32.mrf.mxu0  ;;  %v342_v18 = vpop.f32.mrf.mxu1 }
  0xe3   :  { %v193_v19 = vadd.f32 %v334_v17, %v283_v16  ;;  %v225_v20 = vadd.f32 %v342_v18, %v283_v16 }
  0xe4   :  { %v184_v21 = vpop.f32.mrf.mxu0  ;;  %v216_v22 = vpop.f32.mrf.mxu1 }
  0xe5   :  { %v249_v23 = vmax.f32 %v193_v19, 0.0  ;;  %v257_v24 = vmax.f32 %v225_v20, 0.0  ;;  %v185_v25 = vadd.f32 %v283_v16, %v184_v21  ;;  %v217_v26 = vadd.f32 %v283_v16, %v216_v22 }
  0xe6   :  { %v335_v27 = vpop.f32.mrf.mxu0  ;;  %v343_v28 = vpop.f32.mrf.mxu1 }
  0xe7   :  { %265 = vst [vmem:[%s502_s3 + $0x10] sm:$0xff] %v249_v23  ;;  %273 = vst [vmem:[%s502_s3 + $0x50] sm:$0xff] %v257_v24  ;;  %v247_v29 = vmax.f32 %v185_v25, 0.0  ;;  %v255_v30 = vmax.f32 %v217_v26, 0.0  ;;  %v196_v31 = vadd.f32 %v335_v27, %v283_v16  ;;  %v228_v32 = vadd.f32 %v343_v28, %v283_v16 }
  0xe8   :  { %v187_v33 = vpop.f32.mrf.mxu0  ;;  %v219_v34 = vpop.f32.mrf.mxu1 }
  0xe9   :  { %263 = vst [vmem:[%s502_s3] sm:$0xff] %v247_v29  ;;  %271 = vst [vmem:[%s502_s3 + $0x40] sm:$0xff] %v255_v30  ;;  %v250_v35 = vmax.f32 %v196_v31, 0.0  ;;  %v258_v36 = vmax.f32 %v228_v32, 0.0  ;;  %v188_v37 = vadd.f32 %v283_v16, %v187_v33  ;;  %v220_v38 = vadd.f32 %v283_v16, %v219_v34 }
  0xea   :  { %v338_v39 = vpop.f32.mrf.mxu0  ;;  %v346_v40 = vpop.f32.mrf.mxu1 }
  0xeb   :  { %266 = vst [vmem:[%s502_s3 + $0x18] sm:$0xff] %v250_v35  ;;  %274 = vst [vmem:[%s502_s3 + $0x58] sm:$0xff] %v258_v36  ;;  %v248_v41 = vmax.f32 %v188_v37, 0.0  ;;  %v256_v42 = vmax.f32 %v220_v38, 0.0  ;;  %v209_v43 = vadd.f32 %v338_v39, %v283_v16  ;;  %v241_v44 = vadd.f32 %v346_v40, %v283_v16 }
  0xec   :  { %v200_v45 = vpop.f32.mrf.mxu0  ;;  %v232_v46 = vpop.f32.mrf.mxu1 }
  0xed   :  { %264 = vst [vmem:[%s502_s3 + $0x8] sm:$0xff] %v248_v41  ;;  %272 = vst [vmem:[%s502_s3 + $0x48] sm:$0xff] %v256_v42  ;;  %v253_v47 = vmax.f32 %v209_v43, 0.0  ;;  %v261_v48 = vmax.f32 %v241_v44, 0.0  ;;  %v201_v49 = vadd.f32 %v283_v16, %v200_v45  ;;  %v233_v50 = vadd.f32 %v283_v16, %v232_v46 }
  0xee   :  { %v339_v51 = vpop.f32.mrf.mxu0  ;;  %v347_v52 = vpop.f32.mrf.mxu1 }
  0xef   :  { %269 = vst [vmem:[%s502_s3 + $0x30] sm:$0xff] %v253_v47  ;;  %277 = vst [vmem:[%s502_s3 + $0x70] sm:$0xff] %v261_v48  ;;  %v251_v53 = vmax.f32 %v201_v49, 0.0  ;;  %v259_v54 = vmax.f32 %v233_v50, 0.0  ;;  %v212_v55 = vadd.f32 %v339_v51, %v283_v16  ;;  %v244_v56 = vadd.f32 %v347_v52, %v283_v16 }
  0xf0   :  { %v203_v57 = vpop.f32.mrf.mxu0  ;;  %v235_v58 = vpop.f32.mrf.mxu1 }
  0xf1   :  { %267 = vst [vmem:[%s502_s3 + $0x20] sm:$0xff] %v251_v53  ;;  %275 = vst [vmem:[%s502_s3 + $0x60] sm:$0xff] %v259_v54  ;;  %v254_v59 = vmax.f32 %v212_v55, 0.0  ;;  %v262_v60 = vmax.f32 %v244_v56, 0.0  ;;  %v204_v61 = vadd.f32 %v283_v16, %v203_v57  ;;  %v236_v62 = vadd.f32 %v283_v16, %v235_v58 }
  0xf3   :  { %270 = vst [vmem:[%s502_s3 + $0x38] sm:$0xff] %v254_v59  ;;  %278 = vst [vmem:[%s502_s3 + $0x78] sm:$0xff] %v262_v60  ;;  %v252_v63 = vmax.f32 %v204_v61, 0.0  ;;  %v260_v0 = vmax.f32 %v236_v62, 0.0 }
  0xf5   :  { %268 = vst [vmem:[%s502_s3 + $0x28] sm:$0xff] %v252_v63  ;;  %276 = vst [vmem:[%s502_s3 + $0x68] sm:$0xff] %v260_v0 }

// kernel: unet_forward.16
= control target key start
LH: loop header
LB: loop body
LE: loop exit
PB: predicated region body
PF: predicated region fallthrough
CT: control target
= control target key end

     0   :  { %s717_s1 = inlined_call_operand.vmem [shape: bf16[256,128], index: 1, kind: input, shape index: {}]   ;;  %s718_s0 = inlined_call_operand.vmem [shape: bf16[128,256], index: 0, kind: input, shape index: {}]   ;;  %s719_s2 = inlined_call_operand.vmem [shape: f32[1,128], index: 2, kind: input, shape index: {}]   ;;  %s720_s3 = inlined_call_operand.vmem [shape: f32[128,128], index: 3, kind: output, shape index: {}]  }
   0x1   :  { %v492_v0 = vld [vmem:[%s717_s1 + $0x78] sm:$0xff]   ;;  %v494_v2 = vld [vmem:[%s717_s1 + $0x70] sm:$0xff]   ;;  %v496_v4 = vld [vmem:[%s717_s1 + $0x68] sm:$0xff]  }
   0x2   :  { %v493_v1 = vld [vmem:[%s717_s1 + $0x38] sm:$0xff]   ;;  %412 = vmatprep.subr.bf16.mxu0 %v492_v0  ;;  %476 = vmatprep.subr.bf16.mxu1 %v492_v0  ;;  %v495_v3 = vld [vmem:[%s717_s1 + $0x30] sm:$0xff]   ;;  %v497_v5 = vld [vmem:[%s717_s1 + $0x28] sm:$0xff]  }
   0x3   :  { %413 = vmatpush3.bf16.msra.mxu0 %v493_v1  ;;  %484 = vmatpush3.bf16.msra.mxu1 %v493_v1  ;;  %v498_v6 = vld [vmem:[%s717_s1 + $0x60] sm:$0xff]   ;;  %v500_v8 = vld [vmem:[%s717_s1 + $0x58] sm:$0xff]   ;;  %v502_v10 = vld [vmem:[%s717_s1 + $0x50] sm:$0xff]  }
   0x4   :  { %414 = vmatprep.subr.bf16.mxu0 %v494_v2  ;;  %477 = vmatprep.subr.bf16.mxu1 %v494_v2  ;;  %v499_v7 = vld [vmem:[%s717_s1 + $0x20] sm:$0xff]   ;;  %v501_v9 = vld [vmem:[%s717_s1 + $0x18] sm:$0xff]   ;;  %v503_v13 = vld [vmem:[%s717_s1 + $0x10] sm:$0xff]  }
   0x5   :  { %v510_v11 = vld [vmem:[%s718_s0 + $0x4] ss:$8 sps:$4 sm:$0xff]   ;;  %v508_v18 = vld [vmem:[%s718_s0] ss:$8 sps:$4 sm:$0xff]   ;;  %v514_v20 = vld [vmem:[%s718_s0 + $0x14] ss:$8 sps:$4 sm:$0xff]  }
   0x6   :  { %v513_v12 = vld [vmem:[%s718_s0 + $0x44] ss:$8 sps:$4 sm:$0xff]   ;;  %278 = vmatprep.mubr.bf16.mxu0 %v510_v11  ;;  %v511_v19 = vld [vmem:[%s718_s0 + $0x40] ss:$8 sps:$4 sm:$0xff]   ;;  %v516_v21 = vld [vmem:[%s718_s0 + $0x54] ss:$8 sps:$4 sm:$0xff]  }
   0x7   :  { %415 = vmatpush3.bf16.msra.mxu0 %v495_v3  ;;  %485 = vmatpush3.bf16.msra.mxu1 %v495_v3  ;;  %v504_v14 = vld [vmem:[%s717_s1 + $0x48] sm:$0xff]   ;;  %v506_v16 = vld [vmem:[%s717_s1 + $0x40] sm:$0xff]   ;;  %v518_v22 = vld [vmem:[%s718_s0 + $0x10] ss:$8 sps:$4 sm:$0xff]  }
   0x8   :  { %416 = vmatprep.subr.bf16.mxu0 %v496_v4  ;;  %478 = vmatprep.subr.bf16.mxu1 %v496_v4  ;;  %v505_v15 = vld [vmem:[%s717_s1 + $0x8] sm:$0xff]   ;;  %v507_v17 = vld [vmem:[%s717_s1] sm:$0xff]   ;;  %v519_v23 = vld [vmem:[%s718_s0 + $0x50] ss:$8 sps:$4 sm:$0xff]  }
   0x9   :  { %310 = vmatprep.mubr.bf16.mxu1 %v513_v12  ;;  %v520_v24 = vld [vmem:[%s718_s0 + $0x24] ss:$8 sps:$4 sm:$0xff]   ;;  %v524_v26 = vld [vmem:[%s718_s0 + $0x20] ss:$8 sps:$4 sm:$0xff]   ;;  %v526_v28 = vld [vmem:[%s718_s0 + $0x34] ss:$8 sps:$4 sm:$0xff]  }
   0xa   :  { %v522_v25 = vld [vmem:[%s718_s0 + $0x64] ss:$8 sps:$4 sm:$0xff]   ;;  %v525_v27 = vld [vmem:[%s718_s0 + $0x60] ss:$8 sps:$4 sm:$0xff]   ;;  %v528_v29 = vld [vmem:[%s718_s0 + $0x74] ss:$8 sps:$4 sm:$0xff]  }
   0xb   :  { %417 = vmatpush3.bf16.msra.mxu0 %v497_v5  ;;  %486 = vmatpush3.bf16.msra.mxu1 %v497_v5  ;;  %v530_v30 = vld [vmem:[%s718_s0 + $0x30] ss:$8 sps:$4 sm:$0xff]   ;;  %v651_v34 = vld [vmem:[%s719_s2] ss:$0 sm:$0xff] }
   0xc   :  { %418 = vmatprep.subr.bf16.mxu0 %v498_v6  ;;  %479 = vmatprep.subr.bf16.mxu1 %v498_v6  ;;  %v531_v31 = vld [vmem:[%s718_s0 + $0x70] ss:$8 sps:$4 sm:$0xff]  }
   0xf   :  { %419 = vmatpush3.bf16.msra.mxu0 %v499_v7  ;;  %487 = vmatpush3.bf16.msra.mxu1 %v499_v7 }
  0x10   :  { %420 = vmatprep.subr.bf16.mxu0 %v500_v8  ;;  %480 = vmatprep.subr.bf16.mxu1 %v500_v8 }
  0x13   :  { %421 = vmatpush3.bf16.msra.mxu0 %v501_v9  ;;  %488 = vmatpush3.bf16.msra.mxu1 %v501_v9 }
  0x14   :  { %422 = vmatprep.subr.bf16.mxu0 %v502_v10  ;;  %481 = vmatprep.subr.bf16.mxu1 %v502_v10 }
  0x17   :  { %423 = vmatpush3.bf16.msra.mxu0 %v503_v13  ;;  %489 = vmatpush3.bf16.msra.mxu1 %v503_v13 }
  0x18   :  { %424 = vmatprep.subr.bf16.mxu0 %v504_v14  ;;  %482 = vmatprep.subr.bf16.mxu1 %v504_v14 }
  0x1b   :  { %425 = vmatpush3.bf16.msra.mxu0 %v505_v15  ;;  %490 = vmatpush3.bf16.msra.mxu1 %v505_v15 }
  0x1c   :  { %426 = vmatprep.subr.bf16.mxu0 %v506_v16  ;;  %483 = vmatprep.subr.bf16.mxu1 %v506_v16 }
  0x1f   :  { %427 = vmatpush3.bf16.msra.mxu0 %v507_v17  ;;  %491 = vmatpush3.bf16.msra.mxu1 %v507_v17 }
  0x22   :  { %279 = vmatmul.mubr.bf16.vlgmr.msra.gmra.mxu0 %v508_v18  ;;  %311 = vmatmul.mubr.bf16.vlgmr.msra.gmra.mxu1 %v511_v19 }
  0x23   :  { %286 = vmatprep.mubr.bf16.mxu0 %v514_v20  ;;  %318 = vmatprep.mubr.bf16.mxu1 %v516_v21 }
  0x2a   :  { %287 = vmatmul.mubr.bf16.gmra.mxu0 %v518_v22  ;;  %319 = vmatmul.mubr.bf16.gmra.mxu1 %v519_v23 }
  0x2b   :  { %294 = vmatprep.mubr.bf16.mxu0 %v520_v24  ;;  %326 = vmatprep.mubr.bf16.mxu1 %v522_v25 }
  0x32   :  { %295 = vmatmul.mubr.bf16.gmra.mxu0 %v524_v26  ;;  %327 = vmatmul.mubr.bf16.gmra.mxu1 %v525_v27 }
  0x33   :  { %302 = vmatprep.mubr.bf16.mxu0 %v526_v28  ;;  %334 = vmatprep.mubr.bf16.mxu1 %v528_v29 }
  0x3a   :  { %303 = vmatmul.mubr.bf16.gmra.mxu0 %v530_v30  ;;  %335 = vmatmul.mubr.bf16.gmra.mxu1 %v531_v31 }
  0xe2   :  { %v428_v32 = vpop.f32.mrf.mxu0  ;;  %v452_v33 = vpop.f32.mrf.mxu1 }
  0xe4   :  { %v429_v35 = vpop.f32.mrf.mxu0  ;;  %v453_v36 = vpop.f32.mrf.mxu1 }
  0xe5   :  { %v430_v37 = vadd.f32 %v429_v35, %v428_v32  ;;  %v454_v38 = vadd.f32 %v453_v36, %v452_v33 }
  0xe6   :  { %v431_v39 = vpop.f32.mrf.mxu0  ;;  %v455_v40 = vpop.f32.mrf.mxu1 }
  0xe7   :  { %v281_v41 = vadd.f32 %v430_v37, %v651_v34  ;;  %v313_v42 = vadd.f32 %v454_v38, %v651_v34 }
  0xe8   :  { %v432_v43 = vpop.f32.mrf.mxu0  ;;  %v456_v44 = vpop.f32.mrf.mxu1 }
  0xe9   :  { %v343_v45 = vmax.f32 %v281_v41, 0.0  ;;  %v351_v46 = vmax.f32 %v313_v42, 0.0  ;;  %v433_v47 = vadd.f32 %v432_v43, %v431_v39  ;;  %v457_v48 = vadd.f32 %v456_v44, %v455_v40 }
  0xea   :  { %v434_v49 = vpop.f32.mrf.mxu0  ;;  %v458_v50 = vpop.f32.mrf.mxu1 }
  0xeb   :  { %359 = vst [vmem:[%s720_s3] sm:$0xff] %v343_v45  ;;  %367 = vst [vmem:[%s720_s3 + $0x40] sm:$0xff] %v351_v46  ;;  %v284_v51 = vadd.f32 %v433_v47, %v651_v34  ;;  %v316_v52 = vadd.f32 %v457_v48, %v651_v34 }
  0xec   :  { %v435_v53 = vpop.f32.mrf.mxu0  ;;  %v459_v54 = vpop.f32.mrf.mxu1 }
  0xed   :  { %v344_v55 = vmax.f32 %v284_v51, 0.0  ;;  %v352_v56 = vmax.f32 %v316_v52, 0.0  ;;  %v436_v57 = vadd.f32 %v435_v53, %v434_v49  ;;  %v460_v58 = vadd.f32 %v459_v54, %v458_v50 }
  0xee   :  { %v437_v59 = vpop.f32.mrf.mxu0  ;;  %v461_v60 = vpop.f32.mrf.mxu1 }
  0xef   :  { %360 = vst [vmem:[%s720_s3 + $0x8] sm:$0xff] %v344_v55  ;;  %368 = vst [vmem:[%s720_s3 + $0x48] sm:$0xff] %v352_v56  ;;  %v289_v61 = vadd.f32 %v436_v57, %v651_v34  ;;  %v321_v62 = vadd.f32 %v460_v58, %v651_v34 }
  0xf0   :  { %v438_v63 = vpop.f32.mrf.mxu0  ;;  %v462_v0 = vpop.f32.mrf.mxu1 }
  0xf1   :  { %v345_v1 = vmax.f32 %v289_v61, 0.0  ;;  %v353_v2 = vmax.f32 %v321_v62, 0.0  ;;  %v439_v3 = vadd.f32 %v438_v63, %v437_v59  ;;  %v463_v4 = vadd.f32 %v462_v0, %v461_v60 }
  0xf2   :  { %v440_v5 = vpop.f32.mrf.mxu0  ;;  %v464_v6 = vpop.f32.mrf.mxu1 }
  0xf3   :  { %361 = vst [vmem:[%s720_s3 + $0x10] sm:$0xff] %v345_v1  ;;  %369 = vst [vmem:[%s720_s3 + $0x50] sm:$0xff] %v353_v2  ;;  %v292_v7 = vadd.f32 %v439_v3, %v651_v34  ;;  %v324_v8 = vadd.f32 %v463_v4, %v651_v34 }
  0xf4   :  { %v441_v9 = vpop.f32.mrf.mxu0  ;;  %v465_v10 = vpop.f32.mrf.mxu1 }
  0xf5   :  { %v346_v11 = vmax.f32 %v292_v7, 0.0  ;;  %v354_v12 = vmax.f32 %v324_v8, 0.0  ;;  %v442_v13 = vadd.f32 %v441_v9, %v440_v5  ;;  %v466_v14 = vadd.f32 %v465_v10, %v464_v6 }
  0xf6   :  { %v443_v15 = vpop.f32.mrf.mxu0  ;;  %v467_v16 = vpop.f32.mrf.mxu1 }
  0xf7   :  { %362 = vst [vmem:[%s720_s3 + $0x18] sm:$0xff] %v346_v11  ;;  %370 = vst [vmem:[%s720_s3 + $0x58] sm:$0xff] %v354_v12  ;;  %v297_v17 = vadd.f32 %v442_v13, %v651_v34  ;;  %v329_v18 = vadd.f32 %v466_v14, %v651_v34 }
  0xf8   :  { %v444_v19 = vpop.f32.mrf.mxu0  ;;  %v468_v20 = vpop.f32.mrf.mxu1 }
  0xf9   :  { %v347_v21 = vmax.f32 %v297_v17, 0.0  ;;  %v355_v22 = vmax.f32 %v329_v18, 0.0  ;;  %v445_v23 = vadd.f32 %v444_v19, %v443_v15  ;;  %v469_v24 = vadd.f32 %v468_v20, %v467_v16 }
  0xfa   :  { %v446_v25 = vpop.f32.mrf.mxu0  ;;  %v470_v26 = vpop.f32.mrf.mxu1 }
  0xfb   :  { %363 = vst [vmem:[%s720_s3 + $0x20] sm:$0xff] %v347_v21  ;;  %371 = vst [vmem:[%s720_s3 + $0x60] sm:$0xff] %v355_v22  ;;  %v300_v27 = vadd.f32 %v445_v23, %v651_v34  ;;  %v332_v28 = vadd.f32 %v469_v24, %v651_v34 }
  0xfc   :  { %v447_v29 = vpop.f32.mrf.mxu0  ;;  %v471_v30 = vpop.f32.mrf.mxu1 }
  0xfd   :  { %v348_v31 = vmax.f32 %v300_v27, 0.0  ;;  %v356_v32 = vmax.f32 %v332_v28, 0.0  ;;  %v448_v33 = vadd.f32 %v447_v29, %v446_v25  ;;  %v472_v35 = vadd.f32 %v471_v30, %v470_v26 }
  0xfe   :  { %v449_v36 = vpop.f32.mrf.mxu0  ;;  %v473_v37 = vpop.f32.mrf.mxu1 }
  0xff   :  { %364 = vst [vmem:[%s720_s3 + $0x28] sm:$0xff] %v348_v31  ;;  %372 = vst [vmem:[%s720_s3 + $0x68] sm:$0xff] %v356_v32  ;;  %v305_v38 = vadd.f32 %v448_v33, %v651_v34  ;;  %v337_v39 = vadd.f32 %v472_v35, %v651_v34 }
 0x100   :  { %v450_v40 = vpop.f32.mrf.mxu0  ;;  %v474_v41 = vpop.f32.mrf.mxu1 }
 0x101   :  { %v349_v42 = vmax.f32 %v305_v38, 0.0  ;;  %v357_v43 = vmax.f32 %v337_v39, 0.0  ;;  %v451_v44 = vadd.f32 %v450_v40, %v449_v36  ;;  %v475_v45 = vadd.f32 %v474_v41, %v473_v37 }
 0x103   :  { %365 = vst [vmem:[%s720_s3 + $0x30] sm:$0xff] %v349_v42  ;;  %373 = vst [vmem:[%s720_s3 + $0x70] sm:$0xff] %v357_v43  ;;  %v308_v46 = vadd.f32 %v451_v44, %v651_v34  ;;  %v340_v47 = vadd.f32 %v475_v45, %v651_v34 }
 0x105   :  { %v350_v48 = vmax.f32 %v308_v46, 0.0  ;;  %v358_v49 = vmax.f32 %v340_v47, 0.0 }
 0x107   :  { %366 = vst [vmem:[%s720_s3 + $0x38] sm:$0xff] %v350_v48  ;;  %374 = vst [vmem:[%s720_s3 + $0x78] sm:$0xff] %v358_v49 }

// kernel: unet_forward.17
= control target key start
LH: loop header
LB: loop body
LE: loop exit
PB: predicated region body
PF: predicated region fallthrough
CT: control target
= control target key end

     0   :  { %s417_s1 = inlined_call_operand.vmem [shape: bf16[256,128], index: 1, kind: input, shape index: {}]   ;;  %s418_s0 = inlined_call_operand.vmem [shape: bf16[32,256], index: 0, kind: input, shape index: {}]   ;;  %s419_s2 = inlined_call_operand.vmem [shape: f32[1,128], index: 2, kind: input, shape index: {}]   ;;  %s420_s3 = inlined_call_operand.vmem [shape: f32[32,128], index: 3, kind: output, shape index: {}]  }
   0x1   :  { %v300_v0 = vld [vmem:[%s417_s1 + $0x78] sm:$0xff]   ;;  %v302_v2 = vld [vmem:[%s417_s1 + $0x70] sm:$0xff]   ;;  %v304_v4 = vld [vmem:[%s417_s1 + $0x68] sm:$0xff]  }
   0x2   :  { %v301_v1 = vld [vmem:[%s417_s1 + $0x38] sm:$0xff]   ;;  %256 = vmatprep.subr.bf16.mxu0 %v300_v0  ;;  %284 = vmatprep.subr.bf16.mxu1 %v300_v0  ;;  %v303_v3 = vld [vmem:[%s417_s1 + $0x30] sm:$0xff]   ;;  %v305_v5 = vld [vmem:[%s417_s1 + $0x28] sm:$0xff]  }
   0x3   :  { %257 = vmatpush3.bf16.msra.mxu0 %v301_v1  ;;  %292 = vmatpush3.bf16.msra.mxu1 %v301_v1  ;;  %v306_v6 = vld [vmem:[%s417_s1 + $0x60] sm:$0xff]   ;;  %v308_v8 = vld [vmem:[%s417_s1 + $0x58] sm:$0xff]   ;;  %v310_v10 = vld [vmem:[%s417_s1 + $0x50] sm:$0xff]  }
   0x4   :  { %258 = vmatprep.subr.bf16.mxu0 %v302_v2  ;;  %285 = vmatprep.subr.bf16.mxu1 %v302_v2  ;;  %v307_v7 = vld [vmem:[%s417_s1 + $0x20] sm:$0xff]   ;;  %v309_v9 = vld [vmem:[%s417_s1 + $0x18] sm:$0xff]   ;;  %v311_v13 = vld [vmem:[%s417_s1 + $0x10] sm:$0xff]  }
   0x5   :  { %v318_v11 = vld [vmem:[%s418_s0 + $0x4] ss:$8 sps:$4 sm:$0xff]   ;;  %v321_v12 = vld [vmem:[%s418_s0 + $0x14] ss:$8 sps:$4 sm:$0xff]   ;;  %v316_v18 = vld [vmem:[%s418_s0] ss:$8 sps:$4 sm:$0xff]  }
   0x6   :  { %v312_v14 = vld [vmem:[%s417_s1 + $0x48] sm:$0xff]   ;;  %206 = vmatprep.mubr.bf16.mxu0 %v318_v11  ;;  %214 = vmatprep.mubr.bf16.mxu1 %v321_v12  ;;  %v314_v16 = vld [vmem:[%s417_s1 + $0x40] sm:$0xff]   ;;  %v319_v19 = vld [vmem:[%s418_s0 + $0x10] ss:$8 sps:$4 sm:$0xff]  }
   0x7   :  { %259 = vmatpush3.bf16.msra.mxu0 %v303_v3  ;;  %293 = vmatpush3.bf16.msra.mxu1 %v303_v3  ;;  %v313_v15 = vld [vmem:[%s417_s1 + $0x8] sm:$0xff]   ;;  %v315_v17 = vld [vmem:[%s417_s1] sm:$0xff]  }
   0x8   :  { %260 = vmatprep.subr.bf16.mxu0 %v304_v4  ;;  %286 = vmatprep.subr.bf16.mxu1 %v304_v4  ;;  %v235_v22 = vld [vmem:[%s419_s2] ss:$0 sm:$0xff] }
   0xb   :  { %261 = vmatpush3.bf16.msra.mxu0 %v305_v5  ;;  %294 = vmatpush3.bf16.msra.mxu1 %v305_v5 }
   0xc   :  { %262 = vmatprep.subr.bf16.mxu0 %v306_v6  ;;  %287 = vmatprep.subr.bf16.mxu1 %v306_v6 }
   0xf   :  { %263 = vmatpush3.bf16.msra.mxu0 %v307_v7  ;;  %295 = vmatpush3.bf16.msra.mxu1 %v307_v7 }
  0x10   :  { %264 = vmatprep.subr.bf16.mxu0 %v308_v8  ;;  %288 = vmatprep.subr.bf16.mxu1 %v308_v8 }
  0x13   :  { %265 = vmatpush3.bf16.msra.mxu0 %v309_v9  ;;  %296 = vmatpush3.bf16.msra.mxu1 %v309_v9 }
  0x14   :  { %266 = vmatprep.subr.bf16.mxu0 %v310_v10  ;;  %289 = vmatprep.subr.bf16.mxu1 %v310_v10 }
  0x17   :  { %267 = vmatpush3.bf16.msra.mxu0 %v311_v13  ;;  %297 = vmatpush3.bf16.msra.mxu1 %v311_v13 }
  0x18   :  { %268 = vmatprep.subr.bf16.mxu0 %v312_v14  ;;  %290 = vmatprep.subr.bf16.mxu1 %v312_v14 }
  0x1b   :  { %269 = vmatpush3.bf16.msra.mxu0 %v313_v15  ;;  %298 = vmatpush3.bf16.msra.mxu1 %v313_v15 }
  0x1c   :  { %270 = vmatprep.subr.bf16.mxu0 %v314_v16  ;;  %291 = vmatprep.subr.bf16.mxu1 %v314_v16 }
  0x1f   :  { %271 = vmatpush3.bf16.msra.mxu0 %v315_v17  ;;  %299 = vmatpush3.bf16.msra.mxu1 %v315_v17 }
  0x22   :  { %207 = vmatmul.mubr.bf16.vlgmr.msra.gmra.mxu0 %v316_v18  ;;  %215 = vmatmul.mubr.bf16.vlgmr.msra.gmra.mxu1 %v319_v19 }
  0xe2   :  { %v272_v20 = vpop.f32.mrf.mxu0  ;;  %v278_v21 = vpop.f32.mrf.mxu1 }
  0xe4   :  { %v273_v23 = vpop.f32.mrf.mxu0  ;;  %v279_v24 = vpop.f32.mrf.mxu1 }
  0xe5   :  { %v274_v25 = vadd.f32 %v273_v23, %v272_v20  ;;  %v280_v26 = vadd.f32 %v279_v24, %v278_v21 }
  0xe6   :  { %v275_v27 = vpop.f32.mrf.mxu0  ;;  %v281_v28 = vpop.f32.mrf.mxu1 }
  0xe7   :  { %v209_v29 = vadd.f32 %v274_v25, %v235_v22  ;;  %v217_v30 = vadd.f32 %v280_v26, %v235_v22 }
  0xe8   :  { %v276_v31 = vpop.f32.mrf.mxu0  ;;  %v282_v32 = vpop.f32.mrf.mxu1 }
  0xe9   :  { %v223_v33 = vmax.f32 %v209_v29, 0.0  ;;  %v225_v34 = vmax.f32 %v217_v30, 0.0  ;;  %v277_v35 = vadd.f32 %v276_v31, %v275_v27  ;;  %v283_v36 = vadd.f32 %v282_v32, %v281_v28 }
  0xeb   :  { %227 = vst [vmem:[%s420_s3] sm:$0xff] %v223_v33  ;;  %229 = vst [vmem:[%s420_s3 + $0x10] sm:$0xff] %v225_v34  ;;  %v212_v37 = vadd.f32 %v277_v35, %v235_v22  ;;  %v220_v38 = vadd.f32 %v283_v36, %v235_v22 }
  0xed   :  { %v224_v39 = vmax.f32 %v212_v37, 0.0  ;;  %v226_v40 = vmax.f32 %v220_v38, 0.0 }
  0xef   :  { %228 = vst [vmem:[%s420_s3 + $0x8] sm:$0xff] %v224_v39  ;;  %230 = vst [vmem:[%s420_s3 + $0x18] sm:$0xff] %v226_v40 }

// kernel: unet_forward.18
= control target key start
LH: loop header
LB: loop body
LE: loop exit
PB: predicated region body
PF: predicated region fallthrough
CT: control target
= control target key end

     0   :  { %s610_s1 = inlined_call_operand.vmem [shape: bf16[384,128], index: 1, kind: input, shape index: {}]   ;;  %s611_s0 = inlined_call_operand.vmem [shape: bf16[32,384], index: 0, kind: input, shape index: {}]   ;;  %s612_s2 = inlined_call_operand.vmem [shape: f32[1,128], index: 2, kind: input, shape index: {}]   ;;  %s613_s3 = inlined_call_operand.vmem [shape: f32[32,128], index: 3, kind: output, shape index: {}]  }
   0x1   :  { %v453_v0 = vld [vmem:[%s610_s1 + $0x78] sm:$0xff]   ;;  %v455_v2 = vld [vmem:[%s610_s1 + $0x70] sm:$0xff]   ;;  %v458_v5 = vld [vmem:[%s610_s1 + $0x68] sm:$0xff]  }
   0x2   :  { %v454_v1 = vld [vmem:[%s610_s1 + $0x38] sm:$0xff]   ;;  %395 = vmatprep.subr.bf16.mxu0 %v453_v0  ;;  %v457_v4 = vld [vmem:[%s610_s1 + $0x30] sm:$0xff]   ;;  %v460_v7 = vld [vmem:[%s610_s1 + $0x28] sm:$0xff]  }
   0x3   :  { %396 = vmatpush3.bf16.msra.mxu0 %v454_v1  ;;  %v456_v3 = vld [vmem:[%s610_s1 + $0xb8] sm:$0xff]   ;;  %v459_v6 = vld [vmem:[%s610_s1 + $0xb0] sm:$0xff]   ;;  %v461_v8 = vld [vmem:[%s610_s1 + $0x60] sm:$0xff]  }
   0x4   :  { %397 = vmatprep.subr.bf16.mxu0 %v455_v2  ;;  %433 = vmatprep.subr.bf16.mxu1 %v456_v3  ;;  %v462_v9 = vld [vmem:[%s610_s1 + $0xa8] sm:$0xff]   ;;  %v463_v10 = vld [vmem:[%s610_s1 + $0x20] sm:$0xff]   ;;  %v464_v11 = vld [vmem:[%s610_s1 + $0x58] sm:$0xff]  }
   0x5   :  { %434 = vmatpush3.bf16.msra.mxu1 %v456_v3  ;;  %v465_v12 = vld [vmem:[%s610_s1 + $0xa0] sm:$0xff]   ;;  %v466_v13 = vld [vmem:[%s610_s1 + $0x18] sm:$0xff]   ;;  %v467_v15 = vld [vmem:[%s610_s1 + $0x50] sm:$0xff]  }
   0x6   :  { %435 = vmatprep.subr.bf16.mxu1 %v459_v6  ;;  %v468_v14 = vld [vmem:[%s610_s1 + $0x98] sm:$0xff]   ;;  %v469_v16 = vld [vmem:[%s610_s1 + $0x10] sm:$0xff]   ;;  %v470_v18 = vld [vmem:[%s610_s1 + $0x48] sm:$0xff]  }
   0x7   :  { %398 = vmatpush3.bf16.msra.mxu0 %v457_v4  ;;  %v471_v17 = vld [vmem:[%s610_s1 + $0x90] sm:$0xff]   ;;  %v472_v19 = vld [vmem:[%s610_s1 + $0x8] sm:$0xff]   ;;  %v473_v20 = vld [vmem:[%s610_s1 + $0x40] sm:$0xff]  }
   0x8   :  { %399 = vmatprep.subr.bf16.mxu0 %v458_v5  ;;  %v474_v21 = vld [vmem:[%s610_s1 + $0x88] sm:$0xff]   ;;  %v478_v22 = vld [vmem:[%s611_s0 + $0x4] ss:$12 sps:$4 sm:$0xff]   ;;  %v364_v32 = vld [vmem:[%s612_s2] ss:$0 sm:$0xff] }
   0x9   :  { %436 = vmatpush3.bf16.msra.mxu1 %v459_v6  ;;  %v475_v23 = vld [vmem:[%s610_s1] sm:$0xff]   ;;  %286 = vmatprep.mubr.bf16.mxu0 %v478_v22  ;;  %v480_v24 = vld [vmem:[%s611_s0 + $0x8] ss:$12 sps:$4 sm:$0xff]  }
   0xa   :  { %437 = vmatprep.subr.bf16.mxu1 %v462_v9  ;;  %v479_v25 = vld [vmem:[%s610_s1 + $0x80] sm:$0xff]   ;;  %449 = vmatprep.mubr.bf16.mxu1 %v480_v24  ;;  %v482_v27 = vld [vmem:[%s611_s0 + $0x1c] ss:$12 sps:$4 sm:$0xff]  }
   0xb   :  { %400 = vmatpush3.bf16.msra.mxu0 %v460_v7  ;;  %v476_v26 = vld [vmem:[%s611_s0] ss:$12 sps:$4 sm:$0xff]   ;;  %v484_v29 = vld [vmem:[%s611_s0 + $0x18] ss:$12 sps:$4 sm:$0xff]  }
   0xc   :  { %401 = vmatprep.subr.bf16.mxu0 %v461_v8  ;;  %v481_v28 = vld [vmem:[%s611_s0 + $0x20] ss:$12 sps:$4 sm:$0xff]  }
   0xd   :  { %438 = vmatpush3.bf16.msra.mxu1 %v462_v9 }
   0xe   :  { %439 = vmatprep.subr.bf16.mxu1 %v465_v12 }
   0xf   :  { %402 = vmatpush3.bf16.msra.mxu0 %v463_v10 }
  0x10   :  { %403 = vmatprep.subr.bf16.mxu0 %v464_v11 }
  0x11   :  { %440 = vmatpush3.bf16.msra.mxu1 %v465_v12 }
  0x12   :  { %441 = vmatprep.subr.bf16.mxu1 %v468_v14 }
  0x13   :  { %404 = vmatpush3.bf16.msra.mxu0 %v466_v13 }
  0x14   :  { %405 = vmatprep.subr.bf16.mxu0 %v467_v15 }
  0x15   :  { %442 = vmatpush3.bf16.msra.mxu1 %v468_v14 }
  0x16   :  { %443 = vmatprep.subr.bf16.mxu1 %v471_v17 }
  0x17   :  { %406 = vmatpush3.bf16.msra.mxu0 %v469_v16 }
  0x18   :  { %407 = vmatprep.subr.bf16.mxu0 %v470_v18 }
  0x19   :  { %444 = vmatpush3.bf16.msra.mxu1 %v471_v17 }
  0x1a   :  { %445 = vmatprep.subr.bf16.mxu1 %v474_v21 }
  0x1b   :  { %408 = vmatpush3.bf16.msra.mxu0 %v472_v19 }
  0x1c   :  { %409 = vmatprep.subr.bf16.mxu0 %v473_v20 }
  0x1d   :  { %446 = vmatpush3.bf16.msra.mxu1 %v474_v21 }
  0x1e   :  { %447 = vmatprep.subr.bf16.mxu1 %v479_v25 }
  0x1f   :  { %410 = vmatpush3.bf16.msra.mxu0 %v475_v23 }
  0x21   :  { %448 = vmatpush3.bf16.msra.mxu1 %v479_v25 }
  0x22   :  { %287 = vmatmul.mubr.bf16.vlgmr.msra.gmra.mxu0 %v476_v26 }
  0x23   :  { %294 = vmatprep.mubr.bf16.mxu0 %v482_v27 }
  0x24   :  { %450 = vmatmul.mubr.bf16.vlgmr.msra.gmra.mxu1 %v481_v28 }
  0x2a   :  { %295 = vmatmul.mubr.bf16.gmra.mxu0 %v484_v29 }
  0xe2   :  { %v411_v30 = vpop.f32.mrf.mxu0 }
  0xe4   :  { %v412_v31 = vpop.f32.mrf.mxu0  ;;  %v451_v34 = vpop.f32.mrf.mxu1 }
  0xe5   :  { %v413_v33 = vadd.f32 %v412_v31, %v411_v30 }
  0xe6   :  { %v414_v35 = vpop.f32.mrf.mxu0  ;;  %v337_v37 = vpop.f32.mrf.mxu1 }
  0xe7   :  { %v289_v36 = vadd.f32 %v413_v33, %v364_v32 }
  0xe8   :  { %v415_v38 = vpop.f32.mrf.mxu0  ;;  %v452_v41 = vpop.f32.mrf.mxu1 }
  0xe9   :  { %v416_v39 = vadd.f32 %v415_v38, %v414_v35  ;;  %v338_v40 = vadd.f32 %v337_v37, %v289_v36 }
  0xea   :  { %v417_v42 = vpop.f32.mrf.mxu0  ;;  %v340_v45 = vpop.f32.mrf.mxu1 }
  0xeb   :  { %v352_v43 = vmax.f32 %v338_v40, 0.0  ;;  %v292_v44 = vadd.f32 %v416_v39, %v364_v32 }
  0xec   :  { %v418_v46 = vpop.f32.mrf.mxu0 }
  0xed   :  { %356 = vst [vmem:[%s613_s3] sm:$0xff] %v352_v43  ;;  %v419_v47 = vadd.f32 %v418_v46, %v417_v42  ;;  %v341_v48 = vadd.f32 %v340_v45, %v292_v44 }
  0xee   :  { %v420_v49 = vpop.f32.mrf.mxu0 }
  0xef   :  { %v297_v50 = vadd.f32 %v419_v47, %v364_v32  ;;  %v353_v51 = vmax.f32 %v341_v48, 0.0 }
  0xf0   :  { %v421_v52 = vpop.f32.mrf.mxu0 }
  0xf1   :  { %v346_v53 = vadd.f32 %v451_v34, %v297_v50  ;;  %357 = vst [vmem:[%s613_s3 + $0x8] sm:$0xff] %v353_v51  ;;  %v422_v54 = vadd.f32 %v421_v52, %v420_v49 }
  0xf3   :  { %v354_v55 = vmax.f32 %v346_v53, 0.0  ;;  %v300_v56 = vadd.f32 %v422_v54, %v364_v32 }
  0xf5   :  { %358 = vst [vmem:[%s613_s3 + $0x10] sm:$0xff] %v354_v55  ;;  %v349_v57 = vadd.f32 %v452_v41, %v300_v56 }
  0xf7   :  { %v355_v58 = vmax.f32 %v349_v57, 0.0 }
  0xf9   :  { %359 = vst [vmem:[%s613_s3 + $0x18] sm:$0xff] %v355_v58 }

// kernel: unet_forward.19
= control target key start
LH: loop header
LB: loop body
LE: loop exit
PB: predicated region body
PF: predicated region fallthrough
CT: control target
= control target key end

     0   :  { %s275_s1 = inlined_call_operand.vmem [shape: bf16[128,128], index: 1, kind: input, shape index: {}]   ;;  %s276_s0 = inlined_call_operand.vmem [shape: bf16[32,128], index: 0, kind: input, shape index: {}]   ;;  %s277_s2 = inlined_call_operand.vmem [shape: f32[1,128], index: 2, kind: input, shape index: {}]   ;;  %s278_s3 = inlined_call_operand.vmem [shape: f32[32,128], index: 3, kind: output, shape index: {}]  }
   0x1   :  { %v200_v0 = vld [vmem:[%s275_s1 + $0x38] sm:$0xff]   ;;  %v201_v1 = vld [vmem:[%s275_s1 + $0x30] sm:$0xff]   ;;  %v202_v2 = vld [vmem:[%s275_s1 + $0x28] sm:$0xff]  }
   0x2   :  { %180 = vmatprep.subr.bf16.mxu0 %v200_v0  ;;  %v203_v3 = vld [vmem:[%s275_s1 + $0x20] sm:$0xff]   ;;  %v204_v5 = vld [vmem:[%s275_s1 + $0x18] sm:$0xff]   ;;  %v205_v6 = vld [vmem:[%s275_s1 + $0x10] sm:$0xff]  }
   0x3   :  { %181 = vmatpush3.bf16.msra.mxu0 %v200_v0  ;;  %v208_v4 = vld [vmem:[%s276_s0] sm:$0xff]   ;;  %v206_v7 = vld [vmem:[%s275_s1 + $0x8] sm:$0xff]  }
   0x4   :  { %182 = vmatprep.subr.bf16.mxu0 %v201_v1  ;;  %196 = vmatprep.mubr.bf16.mxu0 %v208_v4  ;;  %v207_v8 = vld [vmem:[%s275_s1] sm:$0xff]   ;;  %v209_v9 = vld [vmem:[%s276_s0 + $0x8] sm:$0xff]  }
   0x5   :  { %v159_v10 = vld [vmem:[%s277_s2] ss:$0 sm:$0xff] }
   0x7   :  { %183 = vmatpush3.bf16.msra.mxu0 %v201_v1 }
   0x8   :  { %184 = vmatprep.subr.bf16.mxu0 %v202_v2 }
   0xb   :  { %185 = vmatpush3.bf16.msra.mxu0 %v202_v2 }
   0xc   :  { %186 = vmatprep.subr.bf16.mxu0 %v203_v3 }
   0xf   :  { %187 = vmatpush3.bf16.msra.mxu0 %v203_v3 }
  0x10   :  { %188 = vmatprep.subr.bf16.mxu0 %v204_v5 }
  0x13   :  { %189 = vmatpush3.bf16.msra.mxu0 %v204_v5 }
  0x14   :  { %190 = vmatprep.subr.bf16.mxu0 %v205_v6 }
  0x17   :  { %191 = vmatpush3.bf16.msra.mxu0 %v205_v6 }
  0x18   :  { %192 = vmatprep.subr.bf16.mxu0 %v206_v7 }
  0x1b   :  { %193 = vmatpush3.bf16.msra.mxu0 %v206_v7 }
  0x1c   :  { %194 = vmatprep.subr.bf16.mxu0 %v207_v8 }
  0x1f   :  { %195 = vmatpush3.bf16.msra.mxu0 %v207_v8 }
  0x22   :  { %197 = vmatmul.mubr.bf16.vlgmr.msra.gmra.mxu0 %v209_v9 }
  0xe2   :  { %v198_v11 = vpop.f32.mrf.mxu0 }
  0xe3   :  { %v145_v12 = vadd.f32 %v198_v11, %v159_v10 }
  0xe4   :  { %v136_v13 = vpop.f32.mrf.mxu0 }
  0xe5   :  { %153 = vst [vmem:[%s278_s3 + $0x10] sm:$0xff] %v145_v12  ;;  %v137_v14 = vadd.f32 %v159_v10, %v136_v13 }
  0xe6   :  { %v199_v15 = vpop.f32.mrf.mxu0 }
  0xe7   :  { %151 = vst [vmem:[%s278_s3] sm:$0xff] %v137_v14  ;;  %v148_v16 = vadd.f32 %v199_v15, %v159_v10 }
  0xe8   :  { %v139_v17 = vpop.f32.mrf.mxu0 }
  0xe9   :  { %154 = vst [vmem:[%s278_s3 + $0x18] sm:$0xff] %v148_v16  ;;  %v140_v18 = vadd.f32 %v159_v10, %v139_v17 }
  0xeb   :  { %152 = vst [vmem:[%s278_s3 + $0x8] sm:$0xff] %v140_v18 }

// kernel: unet_forward.22
= control target key start
LH: loop header
LB: loop body
LE: loop exit
PB: predicated region body
PF: predicated region fallthrough
CT: control target
= control target key end

     0   :  { %s483_s1 = inlined_call_operand.vmem [shape: bf16[128,128], index: 1, kind: input, shape index: {}]   ;;  %s484_s0 = inlined_call_operand.vmem [shape: bf16[128,128], index: 0, kind: input, shape index: {}]   ;;  %s485_s2 = inlined_call_operand.vmem [shape: f32[1,128], index: 2, kind: input, shape index: {}]   ;;  %s486_s3 = inlined_call_operand.vmem [shape: f32[128,128], index: 3, kind: output, shape index: {}]  }
   0x1   :  { %v348_v0 = vld [vmem:[%s483_s1 + $0x38] sm:$0xff]   ;;  %v349_v1 = vld [vmem:[%s483_s1 + $0x30] sm:$0xff]   ;;  %v350_v2 = vld [vmem:[%s483_s1 + $0x28] sm:$0xff]  }
   0x2   :  { %300 = vmatprep.subr.bf16.mxu0 %v348_v0  ;;  %332 = vmatprep.subr.bf16.mxu1 %v348_v0  ;;  %v351_v3 = vld [vmem:[%s483_s1 + $0x20] sm:$0xff]   ;;  %v352_v6 = vld [vmem:[%s483_s1 + $0x18] sm:$0xff]   ;;  %v353_v7 = vld [vmem:[%s483_s1 + $0x10] sm:$0xff]  }
   0x3   :  { %301 = vmatpush3.bf16.msra.mxu0 %v348_v0  ;;  %340 = vmatpush3.bf16.msra.mxu1 %v348_v0  ;;  %v356_v4 = vld [vmem:[%s484_s0] sm:$0xff]   ;;  %v354_v8 = vld [vmem:[%s483_s1 + $0x8] sm:$0xff]   ;;  %v360_v12 = vld [vmem:[%s484_s0 + $0x10] sm:$0xff]  }
   0x4   :  { %302 = vmatprep.subr.bf16.mxu0 %v349_v1  ;;  %333 = vmatprep.subr.bf16.mxu1 %v349_v1  ;;  %v357_v5 = vld [vmem:[%s484_s0 + $0x20] sm:$0xff]   ;;  %v358_v10 = vld [vmem:[%s484_s0 + $0x8] sm:$0xff]   ;;  %v361_v13 = vld [vmem:[%s484_s0 + $0x30] sm:$0xff]  }
   0x5   :  { %316 = vmatprep.mubr.bf16.mxu0 %v356_v4  ;;  %324 = vmatprep.mubr.bf16.mxu1 %v357_v5  ;;  %v355_v9 = vld [vmem:[%s483_s1] sm:$0xff]   ;;  %v359_v11 = vld [vmem:[%s484_s0 + $0x28] sm:$0xff]   ;;  %v362_v14 = vld [vmem:[%s484_s0 + $0x18] sm:$0xff]  }
   0x6   :  { %v363_v15 = vld [vmem:[%s484_s0 + $0x38] sm:$0xff]   ;;  %v267_v16 = vld [vmem:[%s485_s2] ss:$0 sm:$0xff] }
   0x7   :  { %303 = vmatpush3.bf16.msra.mxu0 %v349_v1  ;;  %341 = vmatpush3.bf16.msra.mxu1 %v349_v1 }
   0x8   :  { %304 = vmatprep.subr.bf16.mxu0 %v350_v2  ;;  %334 = vmatprep.subr.bf16.mxu1 %v350_v2 }
   0xb   :  { %305 = vmatpush3.bf16.msra.mxu0 %v350_v2  ;;  %342 = vmatpush3.bf16.msra.mxu1 %v350_v2 }
   0xc   :  { %306 = vmatprep.subr.bf16.mxu0 %v351_v3  ;;  %335 = vmatprep.subr.bf16.mxu1 %v351_v3 }
   0xf   :  { %307 = vmatpush3.bf16.msra.mxu0 %v351_v3  ;;  %343 = vmatpush3.bf16.msra.mxu1 %v351_v3 }
  0x10   :  { %308 = vmatprep.subr.bf16.mxu0 %v352_v6  ;;  %336 = vmatprep.subr.bf16.mxu1 %v352_v6 }
  0x13   :  { %309 = vmatpush3.bf16.msra.mxu0 %v352_v6  ;;  %344 = vmatpush3.bf16.msra.mxu1 %v352_v6 }
  0x14   :  { %310 = vmatprep.subr.bf16.mxu0 %v353_v7  ;;  %337 = vmatprep.subr.bf16.mxu1 %v353_v7 }
  0x17   :  { %311 = vmatpush3.bf16.msra.mxu0 %v353_v7  ;;  %345 = vmatpush3.bf16.msra.mxu1 %v353_v7 }
  0x18   :  { %312 = vmatprep.subr.bf16.mxu0 %v354_v8  ;;  %338 = vmatprep.subr.bf16.mxu1 %v354_v8 }
  0x1b   :  { %313 = vmatpush3.bf16.msra.mxu0 %v354_v8  ;;  %346 = vmatpush3.bf16.msra.mxu1 %v354_v8 }
  0x1c   :  { %314 = vmatprep.subr.bf16.mxu0 %v355_v9  ;;  %339 = vmatprep.subr.bf16.mxu1 %v355_v9 }
  0x1f   :  { %315 = vmatpush3.bf16.msra.mxu0 %v355_v9  ;;  %347 = vmatpush3.bf16.msra.mxu1 %v355_v9 }
  0x22   :  { %317 = vmatmul.mubr.bf16.vlgmr.msra.gmra.mxu0 %v358_v10  ;;  %325 = vmatmul.mubr.bf16.vlgmr.msra.gmra.mxu1 %v359_v11 }
  0x23   :  { %320 = vmatprep.mubr.bf16.mxu0 %v360_v12  ;;  %328 = vmatprep.mubr.bf16.mxu1 %v361_v13 }
  0x2a   :  { %321 = vmatmul.mubr.bf16.gmra.mxu0 %v362_v14  ;;  %329 = vmatmul.mubr.bf16.gmra.mxu1 %v363_v15 }
  0xe2   :  { %v318_v17 = vpop.f32.mrf.mxu0  ;;  %v326_v18 = vpop.f32.mrf.mxu1 }
  0xe3   :  { %v193_v19 = vadd.f32 %v318_v17, %v267_v16  ;;  %v225_v20 = vadd.f32 %v326_v18, %v267_v16 }
  0xe4   :  { %v184_v21 = vpop.f32.mrf.mxu0  ;;  %v216_v22 = vpop.f32.mrf.mxu1 }
  0xe5   :  { %249 = vst [vmem:[%s486_s3 + $0x10] sm:$0xff] %v193_v19  ;;  %257 = vst [vmem:[%s486_s3 + $0x50] sm:$0xff] %v225_v20  ;;  %v185_v23 = vadd.f32 %v267_v16, %v184_v21  ;;  %v217_v24 = vadd.f32 %v267_v16, %v216_v22 }
  0xe6   :  { %v319_v25 = vpop.f32.mrf.mxu0  ;;  %v327_v26 = vpop.f32.mrf.mxu1 }
  0xe7   :  { %247 = vst [vmem:[%s486_s3] sm:$0xff] %v185_v23  ;;  %255 = vst [vmem:[%s486_s3 + $0x40] sm:$0xff] %v217_v24  ;;  %v196_v27 = vadd.f32 %v319_v25, %v267_v16  ;;  %v228_v28 = vadd.f32 %v327_v26, %v267_v16 }
  0xe8   :  { %v187_v29 = vpop.f32.mrf.mxu0  ;;  %v219_v30 = vpop.f32.mrf.mxu1 }
  0xe9   :  { %250 = vst [vmem:[%s486_s3 + $0x18] sm:$0xff] %v196_v27  ;;  %258 = vst [vmem:[%s486_s3 + $0x58] sm:$0xff] %v228_v28  ;;  %v188_v31 = vadd.f32 %v267_v16, %v187_v29  ;;  %v220_v32 = vadd.f32 %v267_v16, %v219_v30 }
  0xea   :  { %v322_v33 = vpop.f32.mrf.mxu0  ;;  %v330_v34 = vpop.f32.mrf.mxu1 }
  0xeb   :  { %248 = vst [vmem:[%s486_s3 + $0x8] sm:$0xff] %v188_v31  ;;  %256 = vst [vmem:[%s486_s3 + $0x48] sm:$0xff] %v220_v32  ;;  %v209_v35 = vadd.f32 %v322_v33, %v267_v16  ;;  %v241_v36 = vadd.f32 %v330_v34, %v267_v16 }
  0xec   :  { %v200_v37 = vpop.f32.mrf.mxu0  ;;  %v232_v38 = vpop.f32.mrf.mxu1 }
  0xed   :  { %253 = vst [vmem:[%s486_s3 + $0x30] sm:$0xff] %v209_v35  ;;  %261 = vst [vmem:[%s486_s3 + $0x70] sm:$0xff] %v241_v36  ;;  %v201_v39 = vadd.f32 %v267_v16, %v200_v37  ;;  %v233_v40 = vadd.f32 %v267_v16, %v232_v38 }
  0xee   :  { %v323_v41 = vpop.f32.mrf.mxu0  ;;  %v331_v42 = vpop.f32.mrf.mxu1 }
  0xef   :  { %251 = vst [vmem:[%s486_s3 + $0x20] sm:$0xff] %v201_v39  ;;  %259 = vst [vmem:[%s486_s3 + $0x60] sm:$0xff] %v233_v40  ;;  %v212_v43 = vadd.f32 %v323_v41, %v267_v16  ;;  %v244_v44 = vadd.f32 %v331_v42, %v267_v16 }
  0xf0   :  { %v203_v45 = vpop.f32.mrf.mxu0  ;;  %v235_v46 = vpop.f32.mrf.mxu1 }
  0xf1   :  { %254 = vst [vmem:[%s486_s3 + $0x38] sm:$0xff] %v212_v43  ;;  %262 = vst [vmem:[%s486_s3 + $0x78] sm:$0xff] %v244_v44  ;;  %v204_v47 = vadd.f32 %v267_v16, %v203_v45  ;;  %v236_v48 = vadd.f32 %v267_v16, %v235_v46 }
  0xf3   :  { %252 = vst [vmem:[%s486_s3 + $0x28] sm:$0xff] %v204_v47  ;;  %260 = vst [vmem:[%s486_s3 + $0x68] sm:$0xff] %v236_v48 }

// kernel: unet_forward.20
= control target key start
LH: loop header
LB: loop body
LE: loop exit
PB: predicated region body
PF: predicated region fallthrough
CT: control target
= control target key end

     0   :  { %s1054_s1 = inlined_call_operand.vmem [shape: bf16[384,128], index: 1, kind: input, shape index: {}]   ;;  %s1055_s0 = inlined_call_operand.vmem [shape: bf16[128,384], index: 0, kind: input, shape index: {}]   ;;  %s1056_s2 = inlined_call_operand.vmem [shape: f32[1,128], index: 2, kind: input, shape index: {}]   ;;  %s1057_s3 = inlined_call_operand.vmem [shape: f32[128,128], index: 3, kind: output, shape index: {}]  }
   0x1   :  { %v765_v0 = vld [vmem:[%s1054_s1 + $0x78] sm:$0xff]   ;;  %v767_v2 = vld [vmem:[%s1054_s1 + $0x70] sm:$0xff]   ;;  %v770_v5 = vld [vmem:[%s1054_s1 + $0x68] sm:$0xff]  }
   0x2   :  { %v766_v1 = vld [vmem:[%s1054_s1 + $0x38] sm:$0xff]   ;;  %653 = vmatprep.subr.bf16.mxu0 %v765_v0  ;;  %v769_v4 = vld [vmem:[%s1054_s1 + $0x30] sm:$0xff]   ;;  %v772_v7 = vld [vmem:[%s1054_s1 + $0x28] sm:$0xff]  }
   0x3   :  { %654 = vmatpush3.bf16.msra.mxu0 %v766_v1  ;;  %v768_v3 = vld [vmem:[%s1054_s1 + $0xb8] sm:$0xff]   ;;  %v771_v6 = vld [vmem:[%s1054_s1 + $0xb0] sm:$0xff]   ;;  %v773_v8 = vld [vmem:[%s1054_s1 + $0x60] sm:$0xff]  }
   0x4   :  { %655 = vmatprep.subr.bf16.mxu0 %v767_v2  ;;  %733 = vmatprep.subr.bf16.mxu1 %v768_v3  ;;  %v774_v9 = vld [vmem:[%s1054_s1 + $0xa8] sm:$0xff]   ;;  %v775_v10 = vld [vmem:[%s1054_s1 + $0x20] sm:$0xff]   ;;  %v776_v11 = vld [vmem:[%s1054_s1 + $0x58] sm:$0xff]  }
   0x5   :  { %734 = vmatpush3.bf16.msra.mxu1 %v768_v3  ;;  %v777_v12 = vld [vmem:[%s1054_s1 + $0xa0] sm:$0xff]   ;;  %v778_v13 = vld [vmem:[%s1054_s1 + $0x18] sm:$0xff]   ;;  %v779_v15 = vld [vmem:[%s1054_s1 + $0x50] sm:$0xff]  }
   0x6   :  { %735 = vmatprep.subr.bf16.mxu1 %v771_v6  ;;  %v780_v14 = vld [vmem:[%s1054_s1 + $0x98] sm:$0xff]   ;;  %v781_v16 = vld [vmem:[%s1054_s1 + $0x10] sm:$0xff]   ;;  %v782_v18 = vld [vmem:[%s1054_s1 + $0x48] sm:$0xff]  }
   0x7   :  { %656 = vmatpush3.bf16.msra.mxu0 %v769_v4  ;;  %v783_v17 = vld [vmem:[%s1054_s1 + $0x90] sm:$0xff]   ;;  %v784_v19 = vld [vmem:[%s1054_s1 + $0x8] sm:$0xff]   ;;  %v785_v20 = vld [vmem:[%s1054_s1 + $0x40] sm:$0xff]  }
   0x8   :  { %657 = vmatprep.subr.bf16.mxu0 %v770_v5  ;;  %v786_v21 = vld [vmem:[%s1054_s1 + $0x88] sm:$0xff]   ;;  %v790_v22 = vld [vmem:[%s1055_s0 + $0x4] ss:$12 sps:$4 sm:$0xff]   ;;  %v797_v31 = vld [vmem:[%s1055_s0 + $0x34] ss:$12 sps:$4 sm:$0xff]  }
   0x9   :  { %736 = vmatpush3.bf16.msra.mxu1 %v771_v6  ;;  %v787_v23 = vld [vmem:[%s1054_s1] sm:$0xff]   ;;  %406 = vmatprep.mubr.bf16.mxu0 %v790_v22  ;;  %v792_v24 = vld [vmem:[%s1055_s0 + $0x8] ss:$12 sps:$4 sm:$0xff]   ;;  %v801_v32 = vld [vmem:[%s1055_s0 + $0x50] ss:$12 sps:$4 sm:$0xff]  }
   0xa   :  { %737 = vmatprep.subr.bf16.mxu1 %v774_v9  ;;  %v791_v25 = vld [vmem:[%s1054_s1 + $0x80] sm:$0xff]   ;;  %749 = vmatprep.mubr.bf16.mxu1 %v792_v24  ;;  %v794_v27 = vld [vmem:[%s1055_s0 + $0x1c] ss:$12 sps:$4 sm:$0xff]   ;;  %v802_v35 = vld [vmem:[%s1055_s0 + $0x4c] ss:$12 sps:$4 sm:$0xff]  }
   0xb   :  { %658 = vmatpush3.bf16.msra.mxu0 %v772_v7  ;;  %v788_v26 = vld [vmem:[%s1055_s0] ss:$12 sps:$4 sm:$0xff]   ;;  %v800_v29 = vld [vmem:[%s1055_s0 + $0x38] ss:$12 sps:$4 sm:$0xff]   ;;  %v808_v33 = vld [vmem:[%s1055_s0 + $0x68] ss:$12 sps:$4 sm:$0xff]  }
   0xc   :  { %659 = vmatprep.subr.bf16.mxu0 %v773_v8  ;;  %v793_v28 = vld [vmem:[%s1055_s0 + $0x20] ss:$12 sps:$4 sm:$0xff]   ;;  %v796_v30 = vld [vmem:[%s1055_s0 + $0x18] ss:$12 sps:$4 sm:$0xff]   ;;  %v799_v34 = vld [vmem:[%s1055_s0 + $0x30] ss:$12 sps:$4 sm:$0xff]  }
   0xd   :  { %738 = vmatpush3.bf16.msra.mxu1 %v774_v9  ;;  %v809_v36 = vld [vmem:[%s1055_s0 + $0x80] ss:$12 sps:$4 sm:$0xff]   ;;  %v816_v37 = vld [vmem:[%s1055_s0 + $0x98] ss:$12 sps:$4 sm:$0xff]   ;;  %v804_v38 = vld [vmem:[%s1055_s0 + $0x48] ss:$12 sps:$4 sm:$0xff]  }
   0xe   :  { %739 = vmatprep.subr.bf16.mxu1 %v777_v12  ;;  %v805_v39 = vld [vmem:[%s1055_s0 + $0x64] ss:$12 sps:$4 sm:$0xff]   ;;  %v807_v41 = vld [vmem:[%s1055_s0 + $0x60] ss:$12 sps:$4 sm:$0xff]   ;;  %v810_v42 = vld [vmem:[%s1055_s0 + $0x7c] ss:$12 sps:$4 sm:$0xff]  }
   0xf   :  { %660 = vmatpush3.bf16.msra.mxu0 %v775_v10  ;;  %v817_v40 = vld [vmem:[%s1055_s0 + $0xb0] ss:$12 sps:$4 sm:$0xff]   ;;  %v812_v43 = vld [vmem:[%s1055_s0 + $0x78] ss:$12 sps:$4 sm:$0xff]   ;;  %v813_v44 = vld [vmem:[%s1055_s0 + $0x94] ss:$12 sps:$4 sm:$0xff]  }
  0x10   :  { %661 = vmatprep.subr.bf16.mxu0 %v776_v11  ;;  %v815_v45 = vld [vmem:[%s1055_s0 + $0x90] ss:$12 sps:$4 sm:$0xff]   ;;  %v818_v46 = vld [vmem:[%s1055_s0 + $0xac] ss:$12 sps:$4 sm:$0xff]   ;;  %v820_v47 = vld [vmem:[%s1055_s0 + $0xa8] ss:$12 sps:$4 sm:$0xff]  }
  0x11   :  { %740 = vmatpush3.bf16.msra.mxu1 %v777_v12  ;;  %v988_v50 = vld [vmem:[%s1056_s2] ss:$0 sm:$0xff] }
  0x12   :  { %741 = vmatprep.subr.bf16.mxu1 %v780_v14 }
  0x13   :  { %662 = vmatpush3.bf16.msra.mxu0 %v778_v13 }
  0x14   :  { %663 = vmatprep.subr.bf16.mxu0 %v779_v15 }
  0x15   :  { %742 = vmatpush3.bf16.msra.mxu1 %v780_v14 }
  0x16   :  { %743 = vmatprep.subr.bf16.mxu1 %v783_v17 }
  0x17   :  { %664 = vmatpush3.bf16.msra.mxu0 %v781_v16 }
  0x18   :  { %665 = vmatprep.subr.bf16.mxu0 %v782_v18 }
  0x19   :  { %744 = vmatpush3.bf16.msra.mxu1 %v783_v17 }
  0x1a   :  { %745 = vmatprep.subr.bf16.mxu1 %v786_v21 }
  0x1b   :  { %666 = vmatpush3.bf16.msra.mxu0 %v784_v19 }
  0x1c   :  { %667 = vmatprep.subr.bf16.mxu0 %v785_v20 }
  0x1d   :  { %746 = vmatpush3.bf16.msra.mxu1 %v786_v21 }
  0x1e   :  { %747 = vmatprep.subr.bf16.mxu1 %v791_v25 }
  0x1f   :  { %668 = vmatpush3.bf16.msra.mxu0 %v787_v23 }
  0x21   :  { %748 = vmatpush3.bf16.msra.mxu1 %v791_v25 }
  0x22   :  { %407 = vmatmul.mubr.bf16.vlgmr.msra.gmra.mxu0 %v788_v26 }
  0x23   :  { %414 = vmatprep.mubr.bf16.mxu0 %v794_v27 }
  0x24   :  { %750 = vmatmul.mubr.bf16.vlgmr.msra.gmra.mxu1 %v793_v28 }
  0x25   :  { %753 = vmatprep.mubr.bf16.mxu1 %v800_v29 }
  0x2a   :  { %415 = vmatmul.mubr.bf16.gmra.mxu0 %v796_v30 }
  0x2b   :  { %422 = vmatprep.mubr.bf16.mxu0 %v797_v31 }
  0x2c   :  { %754 = vmatmul.mubr.bf16.gmra.mxu1 %v801_v32 }
  0x2d   :  { %757 = vmatprep.mubr.bf16.mxu1 %v808_v33 }
  0x32   :  { %423 = vmatmul.mubr.bf16.gmra.mxu0 %v799_v34 }
  0x33   :  { %430 = vmatprep.mubr.bf16.mxu0 %v802_v35 }
  0x34   :  { %758 = vmatmul.mubr.bf16.gmra.mxu1 %v809_v36 }
  0x35   :  { %761 = vmatprep.mubr.bf16.mxu1 %v816_v37 }
  0x3a   :  { %431 = vmatmul.mubr.bf16.gmra.mxu0 %v804_v38 }
  0x3b   :  { %438 = vmatprep.mubr.bf16.mxu0 %v805_v39 }
  0x3c   :  { %762 = vmatmul.mubr.bf16.gmra.mxu1 %v817_v40 }
  0x42   :  { %439 = vmatmul.mubr.bf16.gmra.mxu0 %v807_v41 }
  0x43   :  { %446 = vmatprep.mubr.bf16.mxu0 %v810_v42 }
  0x4a   :  { %447 = vmatmul.mubr.bf16.gmra.mxu0 %v812_v43 }
  0x4b   :  { %454 = vmatprep.mubr.bf16.mxu0 %v813_v44 }
  0x52   :  { %455 = vmatmul.mubr.bf16.gmra.mxu0 %v815_v45 }
  0x53   :  { %462 = vmatprep.mubr.bf16.mxu0 %v818_v46 }
  0x5a   :  { %463 = vmatmul.mubr.bf16.gmra.mxu0 %v820_v47 }
  0xe2   :  { %v669_v48 = vpop.f32.mrf.mxu0 }
  0xe4   :  { %v670_v49 = vpop.f32.mrf.mxu0  ;;  %v751_v52 = vpop.f32.mrf.mxu1 }
  0xe5   :  { %v671_v51 = vadd.f32 %v670_v49, %v669_v48 }
  0xe6   :  { %v672_v53 = vpop.f32.mrf.mxu0  ;;  %v505_v55 = vpop.f32.mrf.mxu1 }
  0xe7   :  { %v409_v54 = vadd.f32 %v671_v51, %v988_v50 }
  0xe8   :  { %v673_v56 = vpop.f32.mrf.mxu0  ;;  %v752_v59 = vpop.f32.mrf.mxu1 }
  0xe9   :  { %v674_v57 = vadd.f32 %v673_v56, %v672_v53  ;;  %v506_v58 = vadd.f32 %v505_v55, %v409_v54 }
  0xea   :  { %v675_v60 = vpop.f32.mrf.mxu0  ;;  %v508_v63 = vpop.f32.mrf.mxu1 }
  0xeb   :  { %v568_v61 = vmax.f32 %v506_v58, 0.0  ;;  %v412_v62 = vadd.f32 %v674_v57, %v988_v50 }
  0xec   :  { %v676_v0 = vpop.f32.mrf.mxu0  ;;  %v755_v4 = vpop.f32.mrf.mxu1 }
  0xed   :  { %584 = vst [vmem:[%s1057_s3] sm:$0xff] %v568_v61  ;;  %v677_v1 = vadd.f32 %v676_v0, %v675_v60  ;;  %v509_v2 = vadd.f32 %v508_v63, %v412_v62 }
  0xee   :  { %v678_v3 = vpop.f32.mrf.mxu0  ;;  %v521_v11 = vpop.f32.mrf.mxu1 }
  0xef   :  { %v417_v5 = vadd.f32 %v677_v1, %v988_v50  ;;  %v569_v6 = vmax.f32 %v509_v2, 0.0 }
  0xf0   :  { %v679_v7 = vpop.f32.mrf.mxu0  ;;  %v756_v18 = vpop.f32.mrf.mxu1 }
  0xf1   :  { %v514_v8 = vadd.f32 %v751_v52, %v417_v5  ;;  %585 = vst [vmem:[%s1057_s3 + $0x8] sm:$0xff] %v569_v6  ;;  %v680_v9 = vadd.f32 %v679_v7, %v678_v3 }
  0xf2   :  { %v681_v10 = vpop.f32.mrf.mxu0  ;;  %v524_v25 = vpop.f32.mrf.mxu1 }
  0xf3   :  { %v570_v12 = vmax.f32 %v514_v8, 0.0  ;;  %v420_v13 = vadd.f32 %v680_v9, %v988_v50 }
  0xf4   :  { %v682_v14 = vpop.f32.mrf.mxu0  ;;  %v759_v32 = vpop.f32.mrf.mxu1 }
  0xf5   :  { %586 = vst [vmem:[%s1057_s3 + $0x10] sm:$0xff] %v570_v12  ;;  %v517_v15 = vadd.f32 %v752_v59, %v420_v13  ;;  %v683_v16 = vadd.f32 %v682_v14, %v681_v10 }
  0xf6   :  { %v684_v17 = vpop.f32.mrf.mxu0  ;;  %v537_v39 = vpop.f32.mrf.mxu1 }
  0xf7   :  { %v571_v19 = vmax.f32 %v517_v15, 0.0  ;;  %v425_v20 = vadd.f32 %v683_v16, %v988_v50 }
  0xf8   :  { %v685_v21 = vpop.f32.mrf.mxu0  ;;  %v760_v46 = vpop.f32.mrf.mxu1 }
  0xf9   :  { %587 = vst [vmem:[%s1057_s3 + $0x18] sm:$0xff] %v571_v19  ;;  %v686_v22 = vadd.f32 %v685_v21, %v684_v17  ;;  %v522_v23 = vadd.f32 %v521_v11, %v425_v20 }
  0xfa   :  { %v687_v24 = vpop.f32.mrf.mxu0  ;;  %v540_v54 = vpop.f32.mrf.mxu1 }
  0xfb   :  { %v572_v26 = vmax.f32 %v522_v23, 0.0  ;;  %v428_v27 = vadd.f32 %v686_v22, %v988_v50 }
  0xfc   :  { %v688_v28 = vpop.f32.mrf.mxu0  ;;  %v763_v61 = vpop.f32.mrf.mxu1 }
  0xfd   :  { %588 = vst [vmem:[%s1057_s3 + $0x20] sm:$0xff] %v572_v26  ;;  %v689_v29 = vadd.f32 %v688_v28, %v687_v24  ;;  %v525_v30 = vadd.f32 %v524_v25, %v428_v27 }
  0xfe   :  { %v690_v31 = vpop.f32.mrf.mxu0 }
  0xff   :  { %v433_v33 = vadd.f32 %v689_v29, %v988_v50  ;;  %v573_v34 = vmax.f32 %v525_v30, 0.0 }
 0x100   :  { %v691_v35 = vpop.f32.mrf.mxu0 }
 0x101   :  { %v530_v36 = vadd.f32 %v755_v4, %v433_v33  ;;  %589 = vst [vmem:[%s1057_s3 + $0x28] sm:$0xff] %v573_v34  ;;  %v692_v37 = vadd.f32 %v691_v35, %v690_v31  ;;  %v553_v4 = vpop.f32.mrf.mxu1 }
 0x102   :  { %v693_v38 = vpop.f32.mrf.mxu0 }
 0x103   :  { %v574_v40 = vmax.f32 %v530_v36, 0.0  ;;  %v436_v41 = vadd.f32 %v692_v37, %v988_v50  ;;  %v764_v11 = vpop.f32.mrf.mxu1 }
 0x104   :  { %v694_v42 = vpop.f32.mrf.mxu0 }
 0x105   :  { %590 = vst [vmem:[%s1057_s3 + $0x30] sm:$0xff] %v574_v40  ;;  %v533_v43 = vadd.f32 %v756_v18, %v436_v41  ;;  %v695_v44 = vadd.f32 %v694_v42, %v693_v38  ;;  %v556_v18 = vpop.f32.mrf.mxu1 }
 0x106   :  { %v696_v45 = vpop.f32.mrf.mxu0 }
 0x107   :  { %v575_v47 = vmax.f32 %v533_v43, 0.0  ;;  %v441_v48 = vadd.f32 %v695_v44, %v988_v50 }
 0x108   :  { %v697_v49 = vpop.f32.mrf.mxu0 }
 0x109   :  { %591 = vst [vmem:[%s1057_s3 + $0x38] sm:$0xff] %v575_v47  ;;  %v698_v51 = vadd.f32 %v697_v49, %v696_v45  ;;  %v538_v52 = vadd.f32 %v537_v39, %v441_v48 }
 0x10a   :  { %v699_v53 = vpop.f32.mrf.mxu0 }
 0x10b   :  { %v576_v55 = vmax.f32 %v538_v52, 0.0  ;;  %v444_v56 = vadd.f32 %v698_v51, %v988_v50 }
 0x10c   :  { %v700_v57 = vpop.f32.mrf.mxu0 }
 0x10d   :  { %592 = vst [vmem:[%s1057_s3 + $0x40] sm:$0xff] %v576_v55  ;;  %v701_v58 = vadd.f32 %v700_v57, %v699_v53  ;;  %v541_v59 = vadd.f32 %v540_v54, %v444_v56 }
 0x10e   :  { %v702_v60 = vpop.f32.mrf.mxu0 }
 0x10f   :  { %v449_v62 = vadd.f32 %v701_v58, %v988_v50  ;;  %v577_v63 = vmax.f32 %v541_v59, 0.0 }
 0x110   :  { %v703_v0 = vpop.f32.mrf.mxu0 }
 0x111   :  { %v546_v1 = vadd.f32 %v759_v32, %v449_v62  ;;  %593 = vst [vmem:[%s1057_s3 + $0x48] sm:$0xff] %v577_v63  ;;  %v704_v2 = vadd.f32 %v703_v0, %v702_v60 }
 0x112   :  { %v705_v3 = vpop.f32.mrf.mxu0 }
 0x113   :  { %v578_v5 = vmax.f32 %v546_v1, 0.0  ;;  %v452_v6 = vadd.f32 %v704_v2, %v988_v50 }
 0x114   :  { %v706_v7 = vpop.f32.mrf.mxu0 }
 0x115   :  { %594 = vst [vmem:[%s1057_s3 + $0x50] sm:$0xff] %v578_v5  ;;  %v549_v8 = vadd.f32 %v760_v46, %v452_v6  ;;  %v707_v9 = vadd.f32 %v706_v7, %v705_v3 }
 0x116   :  { %v708_v10 = vpop.f32.mrf.mxu0 }
 0x117   :  { %v579_v12 = vmax.f32 %v549_v8, 0.0  ;;  %v457_v13 = vadd.f32 %v707_v9, %v988_v50 }
 0x118   :  { %v709_v14 = vpop.f32.mrf.mxu0 }
 0x119   :  { %595 = vst [vmem:[%s1057_s3 + $0x58] sm:$0xff] %v579_v12  ;;  %v710_v15 = vadd.f32 %v709_v14, %v708_v10  ;;  %v554_v16 = vadd.f32 %v553_v4, %v457_v13 }
 0x11a   :  { %v711_v17 = vpop.f32.mrf.mxu0 }
 0x11b   :  { %v580_v19 = vmax.f32 %v554_v16, 0.0  ;;  %v460_v20 = vadd.f32 %v710_v15, %v988_v50 }
 0x11c   :  { %v712_v21 = vpop.f32.mrf.mxu0 }
 0x11d   :  { %596 = vst [vmem:[%s1057_s3 + $0x60] sm:$0xff] %v580_v19  ;;  %v713_v22 = vadd.f32 %v712_v21, %v711_v17  ;;  %v557_v23 = vadd.f32 %v556_v18, %v460_v20 }
 0x11e   :  { %v714_v24 = vpop.f32.mrf.mxu0 }
 0x11f   :  { %v465_v25 = vadd.f32 %v713_v22, %v988_v50  ;;  %v581_v26 = vmax.f32 %v557_v23, 0.0 }
 0x120   :  { %v715_v27 = vpop.f32.mrf.mxu0 }
 0x121   :  { %v562_v28 = vadd.f32 %v763_v61, %v465_v25  ;;  %597 = vst [vmem:[%s1057_s3 + $0x68] sm:$0xff] %v581_v26  ;;  %v716_v29 = vadd.f32 %v715_v27, %v714_v24 }
 0x123   :  { %v582_v30 = vmax.f32 %v562_v28, 0.0  ;;  %v468_v31 = vadd.f32 %v716_v29, %v988_v50 }
 0x125   :  { %598 = vst [vmem:[%s1057_s3 + $0x70] sm:$0xff] %v582_v30  ;;  %v565_v32 = vadd.f32 %v764_v11, %v468_v31 }
 0x127   :  { %v583_v33 = vmax.f32 %v565_v32, 0.0 }
 0x129   :  { %599 = vst [vmem:[%s1057_s3 + $0x78] sm:$0xff] %v583_v33 }

// kernel: unet_forward.25
= control target key start
LH: loop header
LB: loop body
LE: loop exit
PB: predicated region body
PF: predicated region fallthrough
CT: control target
= control target key end

     0   :  { %s1317_s1 = inlined_call_operand.vmem [shape: bf16[128,128], index: 1, kind: input, shape index: {}]   ;;  %s1318_s0 = inlined_call_operand.vmem [shape: bf16[512,128], index: 0, kind: input, shape index: {}]   ;;  %s1319_s2 = inlined_call_operand.vmem [shape: f32[1,128], index: 2, kind: input, shape index: {}]   ;;  %s1320_s3 = inlined_call_operand.vmem [shape: f32[512,128], index: 3, kind: output, shape index: {}]  }
   0x1   :  { %v876_v0 = vld [vmem:[%s1317_s1 + $0x38] sm:$0xff]   ;;  %v877_v1 = vld [vmem:[%s1317_s1 + $0x30] sm:$0xff]   ;;  %v878_v2 = vld [vmem:[%s1317_s1 + $0x28] sm:$0xff]  }
   0x2   :  { %780 = vmatprep.subr.bf16.mxu0 %v876_v0  ;;  %860 = vmatprep.subr.bf16.mxu1 %v876_v0  ;;  %v879_v3 = vld [vmem:[%s1317_s1 + $0x20] sm:$0xff]   ;;  %v880_v6 = vld [vmem:[%s1317_s1 + $0x18] sm:$0xff]   ;;  %v881_v7 = vld [vmem:[%s1317_s1 + $0x10] sm:$0xff]  }
   0x3   :  { %781 = vmatpush3.bf16.msra.mxu0 %v876_v0  ;;  %868 = vmatpush3.bf16.msra.mxu1 %v876_v0  ;;  %v884_v4 = vld [vmem:[%s1318_s0] sm:$0xff]   ;;  %v882_v8 = vld [vmem:[%s1317_s1 + $0x8] sm:$0xff]   ;;  %v888_v12 = vld [vmem:[%s1318_s0 + $0x10] sm:$0xff]  }
   0x4   :  { %782 = vmatprep.subr.bf16.mxu0 %v877_v1  ;;  %861 = vmatprep.subr.bf16.mxu1 %v877_v1  ;;  %v885_v5 = vld [vmem:[%s1318_s0 + $0x80] sm:$0xff]   ;;  %v886_v10 = vld [vmem:[%s1318_s0 + $0x8] sm:$0xff]   ;;  %v889_v13 = vld [vmem:[%s1318_s0 + $0x90] sm:$0xff]  }
   0x5   :  { %796 = vmatprep.mubr.bf16.mxu0 %v884_v4  ;;  %828 = vmatprep.mubr.bf16.mxu1 %v885_v5  ;;  %v883_v9 = vld [vmem:[%s1317_s1] sm:$0xff]   ;;  %v887_v11 = vld [vmem:[%s1318_s0 + $0x88] sm:$0xff]   ;;  %v890_v14 = vld [vmem:[%s1318_s0 + $0x18] sm:$0xff]  }
   0x6   :  { %v891_v15 = vld [vmem:[%s1318_s0 + $0x98] sm:$0xff]   ;;  %v892_v16 = vld [vmem:[%s1318_s0 + $0x20] sm:$0xff]   ;;  %v894_v18 = vld [vmem:[%s1318_s0 + $0x28] sm:$0xff]  }
   0x7   :  { %783 = vmatpush3.bf16.msra.mxu0 %v877_v1  ;;  %869 = vmatpush3.bf16.msra.mxu1 %v877_v1  ;;  %v893_v17 = vld [vmem:[%s1318_s0 + $0xa0] sm:$0xff]   ;;  %v895_v19 = vld [vmem:[%s1318_s0 + $0xa8] sm:$0xff]   ;;  %v896_v20 = vld [vmem:[%s1318_s0 + $0x30] sm:$0xff]  }
   0x8   :  { %784 = vmatprep.subr.bf16.mxu0 %v878_v2  ;;  %862 = vmatprep.subr.bf16.mxu1 %v878_v2  ;;  %v897_v21 = vld [vmem:[%s1318_s0 + $0xb0] sm:$0xff]   ;;  %v898_v22 = vld [vmem:[%s1318_s0 + $0x38] sm:$0xff]   ;;  %v900_v24 = vld [vmem:[%s1318_s0 + $0x40] sm:$0xff]  }
   0x9   :  { %v899_v23 = vld [vmem:[%s1318_s0 + $0xb8] sm:$0xff]   ;;  %v901_v25 = vld [vmem:[%s1318_s0 + $0xc0] sm:$0xff]   ;;  %v902_v26 = vld [vmem:[%s1318_s0 + $0x48] sm:$0xff]  }
   0xa   :  { %v903_v27 = vld [vmem:[%s1318_s0 + $0xc8] sm:$0xff]   ;;  %v904_v28 = vld [vmem:[%s1318_s0 + $0x50] sm:$0xff]   ;;  %v906_v30 = vld [vmem:[%s1318_s0 + $0x58] sm:$0xff]  }
   0xb   :  { %785 = vmatpush3.bf16.msra.mxu0 %v878_v2  ;;  %870 = vmatpush3.bf16.msra.mxu1 %v878_v2  ;;  %v905_v29 = vld [vmem:[%s1318_s0 + $0xd0] sm:$0xff]   ;;  %v907_v31 = vld [vmem:[%s1318_s0 + $0xd8] sm:$0xff]   ;;  %v908_v32 = vld [vmem:[%s1318_s0 + $0x60] sm:$0xff]  }
   0xc   :  { %786 = vmatprep.subr.bf16.mxu0 %v879_v3  ;;  %863 = vmatprep.subr.bf16.mxu1 %v879_v3  ;;  %v909_v33 = vld [vmem:[%s1318_s0 + $0xe0] sm:$0xff]   ;;  %v910_v34 = vld [vmem:[%s1318_s0 + $0x68] sm:$0xff]   ;;  %v912_v36 = vld [vmem:[%s1318_s0 + $0x70] sm:$0xff]  }
   0xd   :  { %v911_v35 = vld [vmem:[%s1318_s0 + $0xe8] sm:$0xff]   ;;  %v913_v37 = vld [vmem:[%s1318_s0 + $0xf0] sm:$0xff]   ;;  %v914_v38 = vld [vmem:[%s1318_s0 + $0x78] sm:$0xff]  }
   0xe   :  { %v915_v39 = vld [vmem:[%s1318_s0 + $0xf8] sm:$0xff]   ;;  %v1059_v40 = vld [vmem:[%s1319_s2] ss:$0 sm:$0xff] }
   0xf   :  { %787 = vmatpush3.bf16.msra.mxu0 %v879_v3  ;;  %871 = vmatpush3.bf16.msra.mxu1 %v879_v3 }
  0x10   :  { %788 = vmatprep.subr.bf16.mxu0 %v880_v6  ;;  %864 = vmatprep.subr.bf16.mxu1 %v880_v6 }
  0x13   :  { %789 = vmatpush3.bf16.msra.mxu0 %v880_v6  ;;  %872 = vmatpush3.bf16.msra.mxu1 %v880_v6 }
  0x14   :  { %790 = vmatprep.subr.bf16.mxu0 %v881_v7  ;;  %865 = vmatprep.subr.bf16.mxu1 %v881_v7 }
  0x17   :  { %791 = vmatpush3.bf16.msra.mxu0 %v881_v7  ;;  %873 = vmatpush3.bf16.msra.mxu1 %v881_v7 }
  0x18   :  { %792 = vmatprep.subr.bf16.mxu0 %v882_v8  ;;  %866 = vmatprep.subr.bf16.mxu1 %v882_v8 }
  0x1b   :  { %793 = vmatpush3.bf16.msra.mxu0 %v882_v8  ;;  %874 = vmatpush3.bf16.msra.mxu1 %v882_v8 }
  0x1c   :  { %794 = vmatprep.subr.bf16.mxu0 %v883_v9  ;;  %867 = vmatprep.subr.bf16.mxu1 %v883_v9 }
  0x1f   :  { %795 = vmatpush3.bf16.msra.mxu0 %v883_v9  ;;  %875 = vmatpush3.bf16.msra.mxu1 %v883_v9 }
  0x22   :  { %797 = vmatmul.mubr.bf16.vlgmr.msra.gmra.mxu0 %v886_v10  ;;  %829 = vmatmul.mubr.bf16.vlgmr.msra.gmra.mxu1 %v887_v11 }
  0x23   :  { %800 = vmatprep.mubr.bf16.mxu0 %v888_v12  ;;  %832 = vmatprep.mubr.bf16.mxu1 %v889_v13 }
  0x2a   :  { %801 = vmatmul.mubr.bf16.gmra.mxu0 %v890_v14  ;;  %833 = vmatmul.mubr.bf16.gmra.mxu1 %v891_v15 }
  0x2b   :  { %804 = vmatprep.mubr.bf16.mxu0 %v892_v16  ;;  %836 = vmatprep.mubr.bf16.mxu1 %v893_v17 }
  0x32   :  { %805 = vmatmul.mubr.bf16.gmra.mxu0 %v894_v18  ;;  %837 = vmatmul.mubr.bf16.gmra.mxu1 %v895_v19 }
  0x33   :  { %808 = vmatprep.mubr.bf16.mxu0 %v896_v20  ;;  %840 = vmatprep.mubr.bf16.mxu1 %v897_v21 }
  0x3a   :  { %809 = vmatmul.mubr.bf16.gmra.mxu0 %v898_v22  ;;  %841 = vmatmul.mubr.bf16.gmra.mxu1 %v899_v23 }
  0x3b   :  { %812 = vmatprep.mubr.bf16.mxu0 %v900_v24  ;;  %844 = vmatprep.mubr.bf16.mxu1 %v901_v25 }
  0x42   :  { %813 = vmatmul.mubr.bf16.gmra.mxu0 %v902_v26  ;;  %845 = vmatmul.mubr.bf16.gmra.mxu1 %v903_v27 }
  0x43   :  { %816 = vmatprep.mubr.bf16.mxu0 %v904_v28  ;;  %848 = vmatprep.mubr.bf16.mxu1 %v905_v29 }
  0x4a   :  { %817 = vmatmul.mubr.bf16.gmra.mxu0 %v906_v30  ;;  %849 = vmatmul.mubr.bf16.gmra.mxu1 %v907_v31 }
  0x4b   :  { %820 = vmatprep.mubr.bf16.mxu0 %v908_v32  ;;  %852 = vmatprep.mubr.bf16.mxu1 %v909_v33 }
  0x52   :  { %821 = vmatmul.mubr.bf16.gmra.mxu0 %v910_v34  ;;  %853 = vmatmul.mubr.bf16.gmra.mxu1 %v911_v35 }
  0x53   :  { %824 = vmatprep.mubr.bf16.mxu0 %v912_v36  ;;  %856 = vmatprep.mubr.bf16.mxu1 %v913_v37 }
  0x5a   :  { %825 = vmatmul.mubr.bf16.gmra.mxu0 %v914_v38  ;;  %857 = vmatmul.mubr.bf16.gmra.mxu1 %v915_v39 }
  0xe2   :  { %v798_v41 = vpop.f32.mrf.mxu0  ;;  %v830_v42 = vpop.f32.mrf.mxu1 }
  0xe3   :  { %v385_v43 = vadd.f32 %v798_v41, %v1059_v40  ;;  %v513_v44 = vadd.f32 %v830_v42, %v1059_v40 }
  0xe4   :  { %v376_v45 = vpop.f32.mrf.mxu0  ;;  %v504_v46 = vpop.f32.mrf.mxu1 }
  0xe5   :  { %633 = vst [vmem:[%s1320_s3 + $0x10] sm:$0xff] %v385_v43  ;;  %665 = vst [vmem:[%s1320_s3 + $0x110] sm:$0xff] %v513_v44  ;;  %v377_v47 = vadd.f32 %v1059_v40, %v376_v45  ;;  %v505_v48 = vadd.f32 %v1059_v40, %v504_v46 }
  0xe6   :  { %v799_v49 = vpop.f32.mrf.mxu0  ;;  %v831_v50 = vpop.f32.mrf.mxu1 }
  0xe7   :  { %631 = vst [vmem:[%s1320_s3] sm:$0xff] %v377_v47  ;;  %663 = vst [vmem:[%s1320_s3 + $0x100] sm:$0xff] %v505_v48  ;;  %v388_v51 = vadd.f32 %v799_v49, %v1059_v40  ;;  %v516_v52 = vadd.f32 %v831_v50, %v1059_v40 }
  0xe8   :  { %v379_v53 = vpop.f32.mrf.mxu0  ;;  %v507_v54 = vpop.f32.mrf.mxu1 }
  0xe9   :  { %634 = vst [vmem:[%s1320_s3 + $0x18] sm:$0xff] %v388_v51  ;;  %666 = vst [vmem:[%s1320_s3 + $0x118] sm:$0xff] %v516_v52  ;;  %v380_v55 = vadd.f32 %v1059_v40, %v379_v53  ;;  %v508_v56 = vadd.f32 %v1059_v40, %v507_v54 }
  0xea   :  { %v802_v57 = vpop.f32.mrf.mxu0  ;;  %v834_v58 = vpop.f32.mrf.mxu1 }
  0xeb   :  { %632 = vst [vmem:[%s1320_s3 + $0x8] sm:$0xff] %v380_v55  ;;  %664 = vst [vmem:[%s1320_s3 + $0x108] sm:$0xff] %v508_v56  ;;  %v401_v59 = vadd.f32 %v802_v57, %v1059_v40  ;;  %v529_v60 = vadd.f32 %v834_v58, %v1059_v40 }
  0xec   :  { %v392_v61 = vpop.f32.mrf.mxu0  ;;  %v520_v62 = vpop.f32.mrf.mxu1 }
  0xed   :  { %637 = vst [vmem:[%s1320_s3 + $0x30] sm:$0xff] %v401_v59  ;;  %669 = vst [vmem:[%s1320_s3 + $0x130] sm:$0xff] %v529_v60  ;;  %v393_v63 = vadd.f32 %v1059_v40, %v392_v61  ;;  %v521_v0 = vadd.f32 %v1059_v40, %v520_v62 }
  0xee   :  { %v803_v1 = vpop.f32.mrf.mxu0  ;;  %v835_v2 = vpop.f32.mrf.mxu1 }
  0xef   :  { %635 = vst [vmem:[%s1320_s3 + $0x20] sm:$0xff] %v393_v63  ;;  %667 = vst [vmem:[%s1320_s3 + $0x120] sm:$0xff] %v521_v0  ;;  %v404_v3 = vadd.f32 %v803_v1, %v1059_v40  ;;  %v532_v4 = vadd.f32 %v835_v2, %v1059_v40 }
  0xf0   :  { %v395_v5 = vpop.f32.mrf.mxu0  ;;  %v523_v6 = vpop.f32.mrf.mxu1 }
  0xf1   :  { %638 = vst [vmem:[%s1320_s3 + $0x38] sm:$0xff] %v404_v3  ;;  %670 = vst [vmem:[%s1320_s3 + $0x138] sm:$0xff] %v532_v4  ;;  %v396_v7 = vadd.f32 %v1059_v40, %v395_v5  ;;  %v524_v8 = vadd.f32 %v1059_v40, %v523_v6 }
  0xf2   :  { %v806_v9 = vpop.f32.mrf.mxu0  ;;  %v838_v10 = vpop.f32.mrf.mxu1 }
  0xf3   :  { %636 = vst [vmem:[%s1320_s3 + $0x28] sm:$0xff] %v396_v7  ;;  %668 = vst [vmem:[%s1320_s3 + $0x128] sm:$0xff] %v524_v8  ;;  %v417_v11 = vadd.f32 %v806_v9, %v1059_v40  ;;  %v545_v12 = vadd.f32 %v838_v10, %v1059_v40 }
  0xf4   :  { %v408_v13 = vpop.f32.mrf.mxu0  ;;  %v536_v14 = vpop.f32.mrf.mxu1 }
  0xf5   :  { %641 = vst [vmem:[%s1320_s3 + $0x50] sm:$0xff] %v417_v11  ;;  %673 = vst [vmem:[%s1320_s3 + $0x150] sm:$0xff] %v545_v12  ;;  %v409_v15 = vadd.f32 %v1059_v40, %v408_v13  ;;  %v537_v16 = vadd.f32 %v1059_v40, %v536_v14 }
  0xf6   :  { %v807_v17 = vpop.f32.mrf.mxu0  ;;  %v839_v18 = vpop.f32.mrf.mxu1 }
  0xf7   :  { %639 = vst [vmem:[%s1320_s3 + $0x40] sm:$0xff] %v409_v15  ;;  %671 = vst [vmem:[%s1320_s3 + $0x140] sm:$0xff] %v537_v16  ;;  %v420_v19 = vadd.f32 %v807_v17, %v1059_v40  ;;  %v548_v20 = vadd.f32 %v839_v18, %v1059_v40 }
  0xf8   :  { %v411_v21 = vpop.f32.mrf.mxu0  ;;  %v539_v22 = vpop.f32.mrf.mxu1 }
  0xf9   :  { %642 = vst [vmem:[%s1320_s3 + $0x58] sm:$0xff] %v420_v19  ;;  %674 = vst [vmem:[%s1320_s3 + $0x158] sm:$0xff] %v548_v20  ;;  %v412_v23 = vadd.f32 %v1059_v40, %v411_v21  ;;  %v540_v24 = vadd.f32 %v1059_v40, %v539_v22 }
  0xfa   :  { %v810_v25 = vpop.f32.mrf.mxu0  ;;  %v842_v26 = vpop.f32.mrf.mxu1 }
  0xfb   :  { %640 = vst [vmem:[%s1320_s3 + $0x48] sm:$0xff] %v412_v23  ;;  %672 = vst [vmem:[%s1320_s3 + $0x148] sm:$0xff] %v540_v24  ;;  %v433_v27 = vadd.f32 %v810_v25, %v1059_v40  ;;  %v561_v28 = vadd.f32 %v842_v26, %v1059_v40 }
  0xfc   :  { %v424_v29 = vpop.f32.mrf.mxu0  ;;  %v552_v30 = vpop.f32.mrf.mxu1 }
  0xfd   :  { %645 = vst [vmem:[%s1320_s3 + $0x70] sm:$0xff] %v433_v27  ;;  %677 = vst [vmem:[%s1320_s3 + $0x170] sm:$0xff] %v561_v28  ;;  %v425_v31 = vadd.f32 %v1059_v40, %v424_v29  ;;  %v553_v32 = vadd.f32 %v1059_v40, %v552_v30 }
  0xfe   :  { %v811_v33 = vpop.f32.mrf.mxu0  ;;  %v843_v34 = vpop.f32.mrf.mxu1 }
  0xff   :  { %643 = vst [vmem:[%s1320_s3 + $0x60] sm:$0xff] %v425_v31  ;;  %675 = vst [vmem:[%s1320_s3 + $0x160] sm:$0xff] %v553_v32  ;;  %v436_v35 = vadd.f32 %v811_v33, %v1059_v40  ;;  %v564_v36 = vadd.f32 %v843_v34, %v1059_v40 }
 0x100   :  { %v427_v37 = vpop.f32.mrf.mxu0  ;;  %v555_v38 = vpop.f32.mrf.mxu1 }
 0x101   :  { %646 = vst [vmem:[%s1320_s3 + $0x78] sm:$0xff] %v436_v35  ;;  %678 = vst [vmem:[%s1320_s3 + $0x178] sm:$0xff] %v564_v36  ;;  %v428_v39 = vadd.f32 %v1059_v40, %v427_v37  ;;  %v556_v41 = vadd.f32 %v1059_v40, %v555_v38 }
 0x102   :  { %v814_v42 = vpop.f32.mrf.mxu0  ;;  %v846_v43 = vpop.f32.mrf.mxu1 }
 0x103   :  { %644 = vst [vmem:[%s1320_s3 + $0x68] sm:$0xff] %v428_v39  ;;  %676 = vst [vmem:[%s1320_s3 + $0x168] sm:$0xff] %v556_v41  ;;  %v449_v44 = vadd.f32 %v814_v42, %v1059_v40  ;;  %v577_v45 = vadd.f32 %v846_v43, %v1059_v40 }
 0x104   :  { %v440_v46 = vpop.f32.mrf.mxu0  ;;  %v568_v47 = vpop.f32.mrf.mxu1 }
 0x105   :  { %649 = vst [vmem:[%s1320_s3 + $0x90] sm:$0xff] %v449_v44  ;;  %681 = vst [vmem:[%s1320_s3 + $0x190] sm:$0xff] %v577_v45  ;;  %v441_v48 = vadd.f32 %v1059_v40, %v440_v46  ;;  %v569_v49 = vadd.f32 %v1059_v40, %v568_v47 }
 0x106   :  { %v815_v50 = vpop.f32.mrf.mxu0  ;;  %v847_v51 = vpop.f32.mrf.mxu1 }
 0x107   :  { %647 = vst [vmem:[%s1320_s3 + $0x80] sm:$0xff] %v441_v48  ;;  %679 = vst [vmem:[%s1320_s3 + $0x180] sm:$0xff] %v569_v49  ;;  %v452_v52 = vadd.f32 %v815_v50, %v1059_v40  ;;  %v580_v53 = vadd.f32 %v847_v51, %v1059_v40 }
 0x108   :  { %v443_v54 = vpop.f32.mrf.mxu0  ;;  %v571_v55 = vpop.f32.mrf.mxu1 }
 0x109   :  { %650 = vst [vmem:[%s1320_s3 + $0x98] sm:$0xff] %v452_v52  ;;  %682 = vst [vmem:[%s1320_s3 + $0x198] sm:$0xff] %v580_v53  ;;  %v444_v56 = vadd.f32 %v1059_v40, %v443_v54  ;;  %v572_v57 = vadd.f32 %v1059_v40, %v571_v55 }
 0x10a   :  { %v818_v58 = vpop.f32.mrf.mxu0  ;;  %v850_v59 = vpop.f32.mrf.mxu1 }
 0x10b   :  { %648 = vst [vmem:[%s1320_s3 + $0x88] sm:$0xff] %v444_v56  ;;  %680 = vst [vmem:[%s1320_s3 + $0x188] sm:$0xff] %v572_v57  ;;  %v465_v60 = vadd.f32 %v818_v58, %v1059_v40  ;;  %v593_v61 = vadd.f32 %v850_v59, %v1059_v40 }
 0x10c   :  { %v456_v62 = vpop.f32.mrf.mxu0  ;;  %v584_v63 = vpop.f32.mrf.mxu1 }
 0x10d   :  { %653 = vst [vmem:[%s1320_s3 + $0xb0] sm:$0xff] %v465_v60  ;;  %685 = vst [vmem:[%s1320_s3 + $0x1b0] sm:$0xff] %v593_v61  ;;  %v457_v0 = vadd.f32 %v1059_v40, %v456_v62  ;;  %v585_v1 = vadd.f32 %v1059_v40, %v584_v63 }
 0x10e   :  { %v819_v2 = vpop.f32.mrf.mxu0  ;;  %v851_v3 = vpop.f32.mrf.mxu1 }
 0x10f   :  { %651 = vst [vmem:[%s1320_s3 + $0xa0] sm:$0xff] %v457_v0  ;;  %683 = vst [vmem:[%s1320_s3 + $0x1a0] sm:$0xff] %v585_v1  ;;  %v468_v4 = vadd.f32 %v819_v2, %v1059_v40  ;;  %v596_v5 = vadd.f32 %v851_v3, %v1059_v40 }
 0x110   :  { %v459_v6 = vpop.f32.mrf.mxu0  ;;  %v587_v7 = vpop.f32.mrf.mxu1 }
 0x111   :  { %654 = vst [vmem:[%s1320_s3 + $0xb8] sm:$0xff] %v468_v4  ;;  %686 = vst [vmem:[%s1320_s3 + $0x1b8] sm:$0xff] %v596_v5  ;;  %v460_v8 = vadd.f32 %v1059_v40, %v459_v6  ;;  %v588_v9 = vadd.f32 %v1059_v40, %v587_v7 }
 0x112   :  { %v822_v10 = vpop.f32.mrf.mxu0  ;;  %v854_v11 = vpop.f32.mrf.mxu1 }
 0x113   :  { %652 = vst [vmem:[%s1320_s3 + $0xa8] sm:$0xff] %v460_v8  ;;  %684 = vst [vmem:[%s1320_s3 + $0x1a8] sm:$0xff] %v588_v9  ;;  %v481_v12 = vadd.f32 %v822_v10, %v1059_v40  ;;  %v609_v13 = vadd.f32 %v854_v11, %v1059_v40 }
 0x114   :  { %v472_v14 = vpop.f32.mrf.mxu0  ;;  %v600_v15 = vpop.f32.mrf.mxu1 }
 0x115   :  { %657 = vst [vmem:[%s1320_s3 + $0xd0] sm:$0xff] %v481_v12  ;;  %689 = vst [vmem:[%s1320_s3 + $0x1d0] sm:$0xff] %v609_v13  ;;  %v473_v16 = vadd.f32 %v1059_v40, %v472_v14  ;;  %v601_v17 = vadd.f32 %v1059_v40, %v600_v15 }
 0x116   :  { %v823_v18 = vpop.f32.mrf.mxu0  ;;  %v855_v19 = vpop.f32.mrf.mxu1 }
 0x117   :  { %655 = vst [vmem:[%s1320_s3 + $0xc0] sm:$0xff] %v473_v16  ;;  %687 = vst [vmem:[%s1320_s3 + $0x1c0] sm:$0xff] %v601_v17  ;;  %v484_v20 = vadd.f32 %v823_v18, %v1059_v40  ;;  %v612_v21 = vadd.f32 %v855_v19, %v1059_v40 }
 0x118   :  { %v475_v22 = vpop.f32.mrf.mxu0  ;;  %v603_v23 = vpop.f32.mrf.mxu1 }
 0x119   :  { %658 = vst [vmem:[%s1320_s3 + $0xd8] sm:$0xff] %v484_v20  ;;  %690 = vst [vmem:[%s1320_s3 + $0x1d8] sm:$0xff] %v612_v21  ;;  %v476_v24 = vadd.f32 %v1059_v40, %v475_v22  ;;  %v604_v25 = vadd.f32 %v1059_v40, %v603_v23 }
 0x11a   :  { %v826_v26 = vpop.f32.mrf.mxu0  ;;  %v858_v27 = vpop.f32.mrf.mxu1 }
 0x11b   :  { %656 = vst [vmem:[%s1320_s3 + $0xc8] sm:$0xff] %v476_v24  ;;  %688 = vst [vmem:[%s1320_s3 + $0x1c8] sm:$0xff] %v604_v25  ;;  %v497_v28 = vadd.f32 %v826_v26, %v1059_v40  ;;  %v625_v29 = vadd.f32 %v858_v27, %v1059_v40 }
 0x11c   :  { %v488_v30 = vpop.f32.mrf.mxu0  ;;  %v616_v31 = vpop.f32.mrf.mxu1 }
 0x11d   :  { %661 = vst [vmem:[%s1320_s3 + $0xf0] sm:$0xff] %v497_v28  ;;  %693 = vst [vmem:[%s1320_s3 + $0x1f0] sm:$0xff] %v625_v29  ;;  %v489_v32 = vadd.f32 %v1059_v40, %v488_v30  ;;  %v617_v33 = vadd.f32 %v1059_v40, %v616_v31 }
 0x11e   :  { %v827_v34 = vpop.f32.mrf.mxu0  ;;  %v859_v35 = vpop.f32.mrf.mxu1 }
 0x11f   :  { %659 = vst [vmem:[%s1320_s3 + $0xe0] sm:$0xff] %v489_v32  ;;  %691 = vst [vmem:[%s1320_s3 + $0x1e0] sm:$0xff] %v617_v33  ;;  %v500_v36 = vadd.f32 %v827_v34, %v1059_v40  ;;  %v628_v37 = vadd.f32 %v859_v35, %v1059_v40 }
 0x120   :  { %v491_v38 = vpop.f32.mrf.mxu0  ;;  %v619_v39 = vpop.f32.mrf.mxu1 }
 0x121   :  { %662 = vst [vmem:[%s1320_s3 + $0xf8] sm:$0xff] %v500_v36  ;;  %694 = vst [vmem:[%s1320_s3 + $0x1f8] sm:$0xff] %v628_v37  ;;  %v492_v41 = vadd.f32 %v1059_v40, %v491_v38  ;;  %v620_v42 = vadd.f32 %v1059_v40, %v619_v39 }
 0x123   :  { %660 = vst [vmem:[%s1320_s3 + $0xe8] sm:$0xff] %v492_v41  ;;  %692 = vst [vmem:[%s1320_s3 + $0x1e8] sm:$0xff] %v620_v42 }

// kernel: unet_forward.23
= control target key start
LH: loop header
LB: loop body
LE: loop exit
PB: predicated region body
PF: predicated region fallthrough
CT: control target
= control target key end

     0   :  { %v1181_v0 = vmov 0   ;;  %s1735_s1 = inlined_call_operand.vmem [shape: bf16[256,128], index: 1, kind: input, shape index: {}]   ;;  %s1736_s0 = inlined_call_operand.vmem [shape: bf16[512,256], index: 0, kind: input, shape index: {}]   ;;  %s1737_s2 = inlined_call_operand.vmem [shape: f32[1,128], index: 2, kind: input, shape index: {}]   ;;  %s1738_s3 = inlined_call_operand.vmem [shape: f32[512,128], index: 3, kind: output, shape index: {}]  }
   0x1   :  { %534 = vmatprep.subr.bf16.mxu0 %v1181_v0  ;;  %1036 = vmatprep.subr.bf16.mxu1 %v1181_v0  ;;  %v1069_v1 = vld [vmem:[%s1735_s1 + $0x38] sm:$0xff]   ;;  %v1070_v2 = vld [vmem:[%s1735_s1 + $0x30] sm:$0xff]   ;;  %v1071_v3 = vld [vmem:[%s1735_s1 + $0x28] sm:$0xff]  }
   0x2   :  { %535 = vmatpush1.bf16.msra.mxu0 %v1069_v1  ;;  %1052 = vmatpush1.bf16.msra.mxu1 %v1069_v1  ;;  %v1072_v4 = vld [vmem:[%s1735_s1 + $0x20] sm:$0xff]   ;;  %v1073_v5 = vld [vmem:[%s1735_s1 + $0x18] sm:$0xff]   ;;  %v1074_v7 = vld [vmem:[%s1735_s1 + $0x10] sm:$0xff]  }
   0x3   :  { %536 = vmatprep.subr.bf16.mxu0 %v1181_v0  ;;  %1037 = vmatprep.subr.bf16.mxu1 %v1181_v0  ;;  %v1087_v6 = vld [vmem:[%s1736_s0 + $0x4] ss:$8 sps:$4 sm:$0xff]   ;;  %v1077_v11 = vld [vmem:[%s1735_s1 + $0x78] sm:$0xff]   ;;  %v1078_v12 = vld [vmem:[%s1735_s1 + $0x70] sm:$0xff]  }
   0x4   :  { %v1090_v8 = vld [vmem:[%s1736_s0 + $0x104] ss:$8 sps:$4 sm:$0xff]   ;;  %566 = vmatprep.mubr.bf16.mxu0 %v1087_v6  ;;  %v1081_v15 = vld [vmem:[%s1735_s1 + $0x58] sm:$0xff]   ;;  %v1082_v16 = vld [vmem:[%s1735_s1 + $0x50] sm:$0xff]  }
   0x5   :  { %694 = vmatprep.mubr.bf16.mxu1 %v1090_v8  ;;  %v1075_v9 = vld [vmem:[%s1735_s1 + $0x8] sm:$0xff]   ;;  %v1076_v10 = vld [vmem:[%s1735_s1] sm:$0xff]   ;;  %v1091_v21 = vld [vmem:[%s1736_s0 + $0x14] ss:$8 sps:$4 sm:$0xff]  }
   0x6   :  { %537 = vmatpush1.bf16.msra.mxu0 %v1070_v2  ;;  %1053 = vmatpush1.bf16.msra.mxu1 %v1070_v2  ;;  %v1079_v13 = vld [vmem:[%s1735_s1 + $0x68] sm:$0xff]   ;;  %v1080_v14 = vld [vmem:[%s1735_s1 + $0x60] sm:$0xff]   ;;  %v1093_v22 = vld [vmem:[%s1736_s0 + $0x114] ss:$8 sps:$4 sm:$0xff]  }
   0x7   :  { %538 = vmatprep.subr.bf16.mxu0 %v1181_v0  ;;  %1038 = vmatprep.subr.bf16.mxu1 %v1181_v0  ;;  %v1083_v17 = vld [vmem:[%s1735_s1 + $0x48] sm:$0xff]   ;;  %v1084_v18 = vld [vmem:[%s1735_s1 + $0x40] sm:$0xff]   ;;  %v1095_v23 = vld [vmem:[%s1736_s0 + $0x10] ss:$8 sps:$4 sm:$0xff]  }
   0x8   :  { %v1085_v19 = vld [vmem:[%s1736_s0] ss:$8 sps:$4 sm:$0xff]   ;;  %v1096_v24 = vld [vmem:[%s1736_s0 + $0x110] ss:$8 sps:$4 sm:$0xff]   ;;  %v1097_v25 = vld [vmem:[%s1736_s0 + $0x24] ss:$8 sps:$4 sm:$0xff]  }
   0x9   :  { %v1088_v20 = vld [vmem:[%s1736_s0 + $0x100] ss:$8 sps:$4 sm:$0xff]   ;;  %v1099_v26 = vld [vmem:[%s1736_s0 + $0x124] ss:$8 sps:$4 sm:$0xff]   ;;  %v1103_v29 = vld [vmem:[%s1736_s0 + $0x34] ss:$8 sps:$4 sm:$0xff]  }
   0xa   :  { %539 = vmatpush1.bf16.msra.mxu0 %v1071_v3  ;;  %1054 = vmatpush1.bf16.msra.mxu1 %v1071_v3  ;;  %v1101_v27 = vld [vmem:[%s1736_s0 + $0x20] ss:$8 sps:$4 sm:$0xff]   ;;  %v1105_v30 = vld [vmem:[%s1736_s0 + $0x134] ss:$8 sps:$4 sm:$0xff]   ;;  %v1107_v31 = vld [vmem:[%s1736_s0 + $0x30] ss:$8 sps:$4 sm:$0xff]  }
   0xb   :  { %540 = vmatprep.subr.bf16.mxu0 %v1181_v0  ;;  %1039 = vmatprep.subr.bf16.mxu1 %v1181_v0  ;;  %v1102_v28 = vld [vmem:[%s1736_s0 + $0x120] ss:$8 sps:$4 sm:$0xff]   ;;  %v1108_v32 = vld [vmem:[%s1736_s0 + $0x130] ss:$8 sps:$4 sm:$0xff]   ;;  %v1109_v33 = vld [vmem:[%s1736_s0 + $0x44] ss:$8 sps:$4 sm:$0xff]  }
   0xc   :  { %v1111_v34 = vld [vmem:[%s1736_s0 + $0x144] ss:$8 sps:$4 sm:$0xff]   ;;  %v1113_v35 = vld [vmem:[%s1736_s0 + $0x40] ss:$8 sps:$4 sm:$0xff]   ;;  %v1115_v37 = vld [vmem:[%s1736_s0 + $0x54] ss:$8 sps:$4 sm:$0xff]  }
   0xd   :  { %v1114_v36 = vld [vmem:[%s1736_s0 + $0x140] ss:$8 sps:$4 sm:$0xff]   ;;  %v1117_v38 = vld [vmem:[%s1736_s0 + $0x154] ss:$8 sps:$4 sm:$0xff]   ;;  %v1119_v39 = vld [vmem:[%s1736_s0 + $0x50] ss:$8 sps:$4 sm:$0xff]  }
   0xe   :  { %541 = vmatpush1.bf16.msra.mxu0 %v1072_v4  ;;  %1055 = vmatpush1.bf16.msra.mxu1 %v1072_v4  ;;  %v1120_v40 = vld [vmem:[%s1736_s0 + $0x150] ss:$8 sps:$4 sm:$0xff]   ;;  %v1121_v41 = vld [vmem:[%s1736_s0 + $0x64] ss:$8 sps:$4 sm:$0xff]   ;;  %v1125_v43 = vld [vmem:[%s1736_s0 + $0x60] ss:$8 sps:$4 sm:$0xff]  }
   0xf   :  { %542 = vmatprep.subr.bf16.mxu0 %v1181_v0  ;;  %1040 = vmatprep.subr.bf16.mxu1 %v1181_v0  ;;  %v1123_v42 = vld [vmem:[%s1736_s0 + $0x164] ss:$8 sps:$4 sm:$0xff]   ;;  %v1126_v44 = vld [vmem:[%s1736_s0 + $0x160] ss:$8 sps:$4 sm:$0xff]   ;;  %v1127_v45 = vld [vmem:[%s1736_s0 + $0x74] ss:$8 sps:$4 sm:$0xff]  }
  0x10   :  { %v1129_v46 = vld [vmem:[%s1736_s0 + $0x174] ss:$8 sps:$4 sm:$0xff]   ;;  %v1131_v47 = vld [vmem:[%s1736_s0 + $0x70] ss:$8 sps:$4 sm:$0xff]   ;;  %v1133_v49 = vld [vmem:[%s1736_s0 + $0x84] ss:$8 sps:$4 sm:$0xff]  }
  0x11   :  { %v1132_v48 = vld [vmem:[%s1736_s0 + $0x170] ss:$8 sps:$4 sm:$0xff]   ;;  %v1135_v50 = vld [vmem:[%s1736_s0 + $0x184] ss:$8 sps:$4 sm:$0xff]   ;;  %v1137_v51 = vld [vmem:[%s1736_s0 + $0x80] ss:$8 sps:$4 sm:$0xff]  }
  0x12   :  { %543 = vmatpush1.bf16.msra.mxu0 %v1073_v5  ;;  %1056 = vmatpush1.bf16.msra.mxu1 %v1073_v5  ;;  %v1138_v52 = vld [vmem:[%s1736_s0 + $0x180] ss:$8 sps:$4 sm:$0xff]   ;;  %v1139_v53 = vld [vmem:[%s1736_s0 + $0x94] ss:$8 sps:$4 sm:$0xff]   ;;  %v1143_v55 = vld [vmem:[%s1736_s0 + $0x90] ss:$8 sps:$4 sm:$0xff]  }
  0x13   :  { %544 = vmatprep.subr.bf16.mxu0 %v1181_v0  ;;  %1041 = vmatprep.subr.bf16.mxu1 %v1181_v0  ;;  %v1141_v54 = vld [vmem:[%s1736_s0 + $0x194] ss:$8 sps:$4 sm:$0xff]   ;;  %v1144_v56 = vld [vmem:[%s1736_s0 + $0x190] ss:$8 sps:$4 sm:$0xff]   ;;  %v1145_v57 = vld [vmem:[%s1736_s0 + $0xa4] ss:$8 sps:$4 sm:$0xff]  }
  0x14   :  { %v1147_v58 = vld [vmem:[%s1736_s0 + $0x1a4] ss:$8 sps:$4 sm:$0xff]   ;;  %v1149_v59 = vld [vmem:[%s1736_s0 + $0xa0] ss:$8 sps:$4 sm:$0xff]   ;;  %v1151_v61 = vld [vmem:[%s1736_s0 + $0xb4] ss:$8 sps:$4 sm:$0xff]  }
  0x15   :  { %v1150_v60 = vld [vmem:[%s1736_s0 + $0x1a0] ss:$8 sps:$4 sm:$0xff]   ;;  %v1153_v62 = vld [vmem:[%s1736_s0 + $0x1b4] ss:$8 sps:$4 sm:$0xff]   ;;  %v1155_v63 = vld [vmem:[%s1736_s0 + $0xb0] ss:$8 sps:$4 sm:$0xff]  }
  0x16   :  { %545 = vmatpush1.bf16.msra.mxu0 %v1074_v7  ;;  %1057 = vmatpush1.bf16.msra.mxu1 %v1074_v7  ;;  %v1157_v1 = vld [vmem:[%s1736_s0 + $0xc4] ss:$8 sps:$4 sm:$0xff]   ;;  %v1161_v3 = vld [vmem:[%s1736_s0 + $0xc0] ss:$8 sps:$4 sm:$0xff]   ;;  %v1163_v5 = vld [vmem:[%s1736_s0 + $0xd4] ss:$8 sps:$4 sm:$0xff]  }
  0x17   :  { %546 = vmatprep.subr.bf16.mxu0 %v1181_v0  ;;  %1042 = vmatprep.subr.bf16.mxu1 %v1181_v0  ;;  %v1159_v2 = vld [vmem:[%s1736_s0 + $0x1c4] ss:$8 sps:$4 sm:$0xff]   ;;  %v1162_v4 = vld [vmem:[%s1736_s0 + $0x1c0] ss:$8 sps:$4 sm:$0xff]   ;;  %v1165_v6 = vld [vmem:[%s1736_s0 + $0x1d4] ss:$8 sps:$4 sm:$0xff]  }
  0x18   :  { %v1167_v7 = vld [vmem:[%s1736_s0 + $0xd0] ss:$8 sps:$4 sm:$0xff]  }
  0x19   :  { %v1168_v8 = vld [vmem:[%s1736_s0 + $0x1d0] ss:$8 sps:$4 sm:$0xff]  }
  0x1a   :  { %547 = vmatpush1.bf16.msra.mxu0 %v1075_v9  ;;  %1058 = vmatpush1.bf16.msra.mxu1 %v1075_v9  ;;  %v1169_v9 = vld [vmem:[%s1736_s0 + $0xe4] ss:$8 sps:$4 sm:$0xff]  }
  0x1b   :  { %548 = vmatprep.subr.bf16.mxu0 %v1181_v0  ;;  %1043 = vmatprep.subr.bf16.mxu1 %v1181_v0 }
  0x1e   :  { %549 = vmatpush1.bf16.msra.mxu0 %v1076_v10  ;;  %1059 = vmatpush1.bf16.msra.mxu1 %v1076_v10  ;;  %v1171_v10 = vld [vmem:[%s1736_s0 + $0x1e4] ss:$8 sps:$4 sm:$0xff]  }
  0x1f   :  { %550 = vmatprep.subr.bf16.mxu0 %v1181_v0  ;;  %1044 = vmatprep.subr.bf16.mxu1 %v1181_v0 }
  0x22   :  { %551 = vmatpush2.bf16.msra.mxu0 %v1077_v11  ;;  %1060 = vmatpush2.bf16.msra.mxu1 %v1077_v11  ;;  %v1173_v11 = vld [vmem:[%s1736_s0 + $0xe0] ss:$8 sps:$4 sm:$0xff]  }
  0x23   :  { %552 = vmatprep.subr.bf16.mxu0 %v1181_v0  ;;  %1045 = vmatprep.subr.bf16.mxu1 %v1181_v0 }
  0x26   :  { %553 = vmatpush2.bf16.msra.mxu0 %v1078_v12  ;;  %1061 = vmatpush2.bf16.msra.mxu1 %v1078_v12  ;;  %v1174_v12 = vld [vmem:[%s1736_s0 + $0x1e0] ss:$8 sps:$4 sm:$0xff]  }
  0x27   :  { %554 = vmatprep.subr.bf16.mxu0 %v1181_v0  ;;  %1046 = vmatprep.subr.bf16.mxu1 %v1181_v0 }
  0x2a   :  { %555 = vmatpush2.bf16.msra.mxu0 %v1079_v13  ;;  %1062 = vmatpush2.bf16.msra.mxu1 %v1079_v13  ;;  %v1175_v13 = vld [vmem:[%s1736_s0 + $0xf4] ss:$8 sps:$4 sm:$0xff]  }
  0x2b   :  { %556 = vmatprep.subr.bf16.mxu0 %v1181_v0  ;;  %1047 = vmatprep.subr.bf16.mxu1 %v1181_v0 }
  0x2e   :  { %557 = vmatpush2.bf16.msra.mxu0 %v1080_v14  ;;  %1063 = vmatpush2.bf16.msra.mxu1 %v1080_v14  ;;  %v1177_v14 = vld [vmem:[%s1736_s0 + $0x1f4] ss:$8 sps:$4 sm:$0xff]  }
  0x2f   :  { %558 = vmatprep.subr.bf16.mxu0 %v1181_v0  ;;  %1048 = vmatprep.subr.bf16.mxu1 %v1181_v0 }
  0x32   :  { %559 = vmatpush2.bf16.msra.mxu0 %v1081_v15  ;;  %1064 = vmatpush2.bf16.msra.mxu1 %v1081_v15  ;;  %v1179_v15 = vld [vmem:[%s1736_s0 + $0xf0] ss:$8 sps:$4 sm:$0xff]  }
  0x33   :  { %560 = vmatprep.subr.bf16.mxu0 %v1181_v0  ;;  %1049 = vmatprep.subr.bf16.mxu1 %v1181_v0 }
  0x36   :  { %561 = vmatpush2.bf16.msra.mxu0 %v1082_v16  ;;  %1065 = vmatpush2.bf16.msra.mxu1 %v1082_v16  ;;  %v1180_v16 = vld [vmem:[%s1736_s0 + $0x1f0] ss:$8 sps:$4 sm:$0xff]  }
  0x37   :  { %562 = vmatprep.subr.bf16.mxu0 %v1181_v0  ;;  %1050 = vmatprep.subr.bf16.mxu1 %v1181_v0 }
  0x3a   :  { %563 = vmatpush2.bf16.msra.mxu0 %v1083_v17  ;;  %1066 = vmatpush2.bf16.msra.mxu1 %v1083_v17  ;;  %v1477_v17 = vld [vmem:[%s1737_s2] ss:$0 sm:$0xff] }
  0x3b   :  { %564 = vmatprep.subr.bf16.mxu0 %v1181_v0  ;;  %1051 = vmatprep.subr.bf16.mxu1 %v1181_v0  ;;  %v1156_v0 = vld [vmem:[%s1736_s0 + $0x1b0] ss:$8 sps:$4 sm:$0xff]  }
  0x3e   :  { %565 = vmatpush2.bf16.msra.mxu0 %v1084_v18  ;;  %1067 = vmatpush2.bf16.msra.mxu1 %v1084_v18 }
  0x41   :  { %567 = vmatmul.mubr.bf16.vlgmr.msra.gmra.mxu0 %v1085_v19  ;;  %695 = vmatmul.mubr.bf16.vlgmr.msra.gmra.mxu1 %v1088_v20 }
  0x42   :  { %574 = vmatprep.mubr.bf16.mxu0 %v1091_v21  ;;  %702 = vmatprep.mubr.bf16.mxu1 %v1093_v22 }
  0x49   :  { %575 = vmatmul.mubr.bf16.gmra.mxu0 %v1095_v23  ;;  %703 = vmatmul.mubr.bf16.gmra.mxu1 %v1096_v24 }
  0x4a   :  { %582 = vmatprep.mubr.bf16.mxu0 %v1097_v25  ;;  %710 = vmatprep.mubr.bf16.mxu1 %v1099_v26 }
  0x51   :  { %583 = vmatmul.mubr.bf16.gmra.mxu0 %v1101_v27  ;;  %711 = vmatmul.mubr.bf16.gmra.mxu1 %v1102_v28 }
  0x52   :  { %590 = vmatprep.mubr.bf16.mxu0 %v1103_v29  ;;  %718 = vmatprep.mubr.bf16.mxu1 %v1105_v30 }
  0x59   :  { %591 = vmatmul.mubr.bf16.gmra.mxu0 %v1107_v31  ;;  %719 = vmatmul.mubr.bf16.gmra.mxu1 %v1108_v32 }
  0x5a   :  { %598 = vmatprep.mubr.bf16.mxu0 %v1109_v33  ;;  %726 = vmatprep.mubr.bf16.mxu1 %v1111_v34 }
  0x61   :  { %599 = vmatmul.mubr.bf16.gmra.mxu0 %v1113_v35  ;;  %727 = vmatmul.mubr.bf16.gmra.mxu1 %v1114_v36 }
  0x62   :  { %606 = vmatprep.mubr.bf16.mxu0 %v1115_v37  ;;  %734 = vmatprep.mubr.bf16.mxu1 %v1117_v38 }
  0x69   :  { %607 = vmatmul.mubr.bf16.gmra.mxu0 %v1119_v39  ;;  %735 = vmatmul.mubr.bf16.gmra.mxu1 %v1120_v40 }
  0x6a   :  { %614 = vmatprep.mubr.bf16.mxu0 %v1121_v41  ;;  %742 = vmatprep.mubr.bf16.mxu1 %v1123_v42 }
  0x71   :  { %615 = vmatmul.mubr.bf16.gmra.mxu0 %v1125_v43  ;;  %743 = vmatmul.mubr.bf16.gmra.mxu1 %v1126_v44 }
  0x72   :  { %622 = vmatprep.mubr.bf16.mxu0 %v1127_v45  ;;  %750 = vmatprep.mubr.bf16.mxu1 %v1129_v46 }
  0x79   :  { %623 = vmatmul.mubr.bf16.gmra.mxu0 %v1131_v47  ;;  %751 = vmatmul.mubr.bf16.gmra.mxu1 %v1132_v48 }
  0x7a   :  { %630 = vmatprep.mubr.bf16.mxu0 %v1133_v49  ;;  %758 = vmatprep.mubr.bf16.mxu1 %v1135_v50 }
  0x81   :  { %631 = vmatmul.mubr.bf16.gmra.mxu0 %v1137_v51  ;;  %759 = vmatmul.mubr.bf16.gmra.mxu1 %v1138_v52 }
  0x82   :  { %638 = vmatprep.mubr.bf16.mxu0 %v1139_v53  ;;  %766 = vmatprep.mubr.bf16.mxu1 %v1141_v54 }
  0x89   :  { %639 = vmatmul.mubr.bf16.gmra.mxu0 %v1143_v55  ;;  %767 = vmatmul.mubr.bf16.gmra.mxu1 %v1144_v56 }
  0x8a   :  { %646 = vmatprep.mubr.bf16.mxu0 %v1145_v57  ;;  %774 = vmatprep.mubr.bf16.mxu1 %v1147_v58 }
  0x91   :  { %647 = vmatmul.mubr.bf16.gmra.mxu0 %v1149_v59  ;;  %775 = vmatmul.mubr.bf16.gmra.mxu1 %v1150_v60 }
  0x92   :  { %654 = vmatprep.mubr.bf16.mxu0 %v1151_v61  ;;  %782 = vmatprep.mubr.bf16.mxu1 %v1153_v62 }
  0x99   :  { %655 = vmatmul.mubr.bf16.gmra.mxu0 %v1155_v63  ;;  %783 = vmatmul.mubr.bf16.gmra.mxu1 %v1156_v0 }
  0x9a   :  { %662 = vmatprep.mubr.bf16.mxu0 %v1157_v1  ;;  %790 = vmatprep.mubr.bf16.mxu1 %v1159_v2 }
  0xa1   :  { %663 = vmatmul.mubr.bf16.gmra.mxu0 %v1161_v3  ;;  %791 = vmatmul.mubr.bf16.gmra.mxu1 %v1162_v4 }
  0xa2   :  { %670 = vmatprep.mubr.bf16.mxu0 %v1163_v5  ;;  %798 = vmatprep.mubr.bf16.mxu1 %v1165_v6 }
  0xa9   :  { %671 = vmatmul.mubr.bf16.gmra.mxu0 %v1167_v7  ;;  %799 = vmatmul.mubr.bf16.gmra.mxu1 %v1168_v8 }
  0xaa   :  { %678 = vmatprep.mubr.bf16.mxu0 %v1169_v9  ;;  %806 = vmatprep.mubr.bf16.mxu1 %v1171_v10 }
  0xb1   :  { %679 = vmatmul.mubr.bf16.gmra.mxu0 %v1173_v11  ;;  %807 = vmatmul.mubr.bf16.gmra.mxu1 %v1174_v12 }
  0xb2   :  { %686 = vmatprep.mubr.bf16.mxu0 %v1175_v13  ;;  %814 = vmatprep.mubr.bf16.mxu1 %v1177_v14 }
  0xb9   :  { %687 = vmatmul.mubr.bf16.gmra.mxu0 %v1179_v15  ;;  %815 = vmatmul.mubr.bf16.gmra.mxu1 %v1180_v16 }
 0x101   :  { %v568_v18 = vpop.f32.mrf.mxu0  ;;  %v696_v19 = vpop.f32.mrf.mxu1 }
 0x102   :  { %v569_v20 = vadd.f32 %v1477_v17, %v568_v18  ;;  %v697_v21 = vadd.f32 %v1477_v17, %v696_v19 }
 0x103   :  { %v570_v22 = vpop.f32.mrf.mxu0  ;;  %v698_v23 = vpop.f32.mrf.mxu1 }
 0x104   :  { %v823_v24 = vmax.f32 %v569_v20, 0.0  ;;  %v855_v25 = vmax.f32 %v697_v21, 0.0 }
 0x105   :  { %v571_v26 = vpop.f32.mrf.mxu0  ;;  %v699_v27 = vpop.f32.mrf.mxu1 }
 0x106   :  { %887 = vst [vmem:[%s1738_s3] sm:$0xff] %v823_v24  ;;  %919 = vst [vmem:[%s1738_s3 + $0x100] sm:$0xff] %v855_v25  ;;  %v572_v28 = vadd.f32 %v1477_v17, %v571_v26  ;;  %v700_v29 = vadd.f32 %v1477_v17, %v699_v27 }
 0x107   :  { %v573_v30 = vpop.f32.mrf.mxu0  ;;  %v701_v31 = vpop.f32.mrf.mxu1 }
 0x108   :  { %v824_v32 = vmax.f32 %v572_v28, 0.0  ;;  %v856_v33 = vmax.f32 %v700_v29, 0.0 }
 0x109   :  { %v576_v34 = vpop.f32.mrf.mxu0  ;;  %v704_v35 = vpop.f32.mrf.mxu1 }
 0x10a   :  { %888 = vst [vmem:[%s1738_s3 + $0x8] sm:$0xff] %v824_v32  ;;  %920 = vst [vmem:[%s1738_s3 + $0x108] sm:$0xff] %v856_v33  ;;  %v577_v36 = vadd.f32 %v1477_v17, %v576_v34  ;;  %v705_v37 = vadd.f32 %v1477_v17, %v704_v35 }
 0x10b   :  { %v578_v38 = vpop.f32.mrf.mxu0  ;;  %v706_v39 = vpop.f32.mrf.mxu1 }
 0x10c   :  { %v825_v40 = vmax.f32 %v577_v36, 0.0  ;;  %v857_v41 = vmax.f32 %v705_v37, 0.0 }
 0x10d   :  { %v579_v42 = vpop.f32.mrf.mxu0  ;;  %v707_v43 = vpop.f32.mrf.mxu1 }
 0x10e   :  { %889 = vst [vmem:[%s1738_s3 + $0x10] sm:$0xff] %v825_v40  ;;  %921 = vst [vmem:[%s1738_s3 + $0x110] sm:$0xff] %v857_v41  ;;  %v580_v44 = vadd.f32 %v1477_v17, %v579_v42  ;;  %v708_v45 = vadd.f32 %v1477_v17, %v707_v43 }
 0x10f   :  { %v581_v46 = vpop.f32.mrf.mxu0  ;;  %v709_v47 = vpop.f32.mrf.mxu1 }
 0x110   :  { %v826_v48 = vmax.f32 %v580_v44, 0.0  ;;  %v858_v49 = vmax.f32 %v708_v45, 0.0 }
 0x111   :  { %v584_v50 = vpop.f32.mrf.mxu0  ;;  %v712_v51 = vpop.f32.mrf.mxu1 }
 0x112   :  { %890 = vst [vmem:[%s1738_s3 + $0x18] sm:$0xff] %v826_v48  ;;  %922 = vst [vmem:[%s1738_s3 + $0x118] sm:$0xff] %v858_v49  ;;  %v585_v52 = vadd.f32 %v1477_v17, %v584_v50  ;;  %v713_v53 = vadd.f32 %v1477_v17, %v712_v51 }
 0x113   :  { %v586_v54 = vpop.f32.mrf.mxu0  ;;  %v714_v55 = vpop.f32.mrf.mxu1 }
 0x114   :  { %v827_v56 = vmax.f32 %v585_v52, 0.0  ;;  %v859_v57 = vmax.f32 %v713_v53, 0.0 }
 0x115   :  { %v587_v58 = vpop.f32.mrf.mxu0  ;;  %v715_v59 = vpop.f32.mrf.mxu1 }
 0x116   :  { %891 = vst [vmem:[%s1738_s3 + $0x20] sm:$0xff] %v827_v56  ;;  %923 = vst [vmem:[%s1738_s3 + $0x120] sm:$0xff] %v859_v57  ;;  %v588_v60 = vadd.f32 %v1477_v17, %v587_v58  ;;  %v716_v61 = vadd.f32 %v1477_v17, %v715_v59 }
 0x117   :  { %v589_v62 = vpop.f32.mrf.mxu0  ;;  %v717_v63 = vpop.f32.mrf.mxu1 }
 0x118   :  { %v828_v0 = vmax.f32 %v588_v60, 0.0  ;;  %v860_v1 = vmax.f32 %v716_v61, 0.0 }
 0x119   :  { %v592_v2 = vpop.f32.mrf.mxu0  ;;  %v720_v3 = vpop.f32.mrf.mxu1 }
 0x11a   :  { %892 = vst [vmem:[%s1738_s3 + $0x28] sm:$0xff] %v828_v0  ;;  %924 = vst [vmem:[%s1738_s3 + $0x128] sm:$0xff] %v860_v1  ;;  %v593_v4 = vadd.f32 %v1477_v17, %v592_v2  ;;  %v721_v5 = vadd.f32 %v1477_v17, %v720_v3 }
 0x11b   :  { %v594_v6 = vpop.f32.mrf.mxu0  ;;  %v722_v7 = vpop.f32.mrf.mxu1 }
 0x11c   :  { %v829_v8 = vmax.f32 %v593_v4, 0.0  ;;  %v861_v9 = vmax.f32 %v721_v5, 0.0 }
 0x11d   :  { %v595_v10 = vpop.f32.mrf.mxu0  ;;  %v723_v11 = vpop.f32.mrf.mxu1 }
 0x11e   :  { %893 = vst [vmem:[%s1738_s3 + $0x30] sm:$0xff] %v829_v8  ;;  %925 = vst [vmem:[%s1738_s3 + $0x130] sm:$0xff] %v861_v9  ;;  %v596_v12 = vadd.f32 %v1477_v17, %v595_v10  ;;  %v724_v13 = vadd.f32 %v1477_v17, %v723_v11 }
 0x11f   :  { %v597_v14 = vpop.f32.mrf.mxu0  ;;  %v725_v15 = vpop.f32.mrf.mxu1 }
 0x120   :  { %v830_v16 = vmax.f32 %v596_v12, 0.0  ;;  %v862_v18 = vmax.f32 %v724_v13, 0.0 }
 0x121   :  { %v600_v19 = vpop.f32.mrf.mxu0  ;;  %v728_v20 = vpop.f32.mrf.mxu1 }
 0x122   :  { %894 = vst [vmem:[%s1738_s3 + $0x38] sm:$0xff] %v830_v16  ;;  %926 = vst [vmem:[%s1738_s3 + $0x138] sm:$0xff] %v862_v18  ;;  %v601_v21 = vadd.f32 %v1477_v17, %v600_v19  ;;  %v729_v22 = vadd.f32 %v1477_v17, %v728_v20 }
 0x123   :  { %v602_v23 = vpop.f32.mrf.mxu0  ;;  %v730_v24 = vpop.f32.mrf.mxu1 }
 0x124   :  { %v831_v25 = vmax.f32 %v601_v21, 0.0  ;;  %v863_v26 = vmax.f32 %v729_v22, 0.0 }
 0x125   :  { %v603_v27 = vpop.f32.mrf.mxu0  ;;  %v731_v28 = vpop.f32.mrf.mxu1 }
 0x126   :  { %895 = vst [vmem:[%s1738_s3 + $0x40] sm:$0xff] %v831_v25  ;;  %927 = vst [vmem:[%s1738_s3 + $0x140] sm:$0xff] %v863_v26  ;;  %v604_v29 = vadd.f32 %v1477_v17, %v603_v27  ;;  %v732_v30 = vadd.f32 %v1477_v17, %v731_v28 }
 0x127   :  { %v605_v31 = vpop.f32.mrf.mxu0  ;;  %v733_v32 = vpop.f32.mrf.mxu1 }
 0x128   :  { %v832_v33 = vmax.f32 %v604_v29, 0.0  ;;  %v864_v34 = vmax.f32 %v732_v30, 0.0 }
 0x129   :  { %v608_v35 = vpop.f32.mrf.mxu0  ;;  %v736_v36 = vpop.f32.mrf.mxu1 }
 0x12a   :  { %896 = vst [vmem:[%s1738_s3 + $0x48] sm:$0xff] %v832_v33  ;;  %928 = vst [vmem:[%s1738_s3 + $0x148] sm:$0xff] %v864_v34  ;;  %v609_v37 = vadd.f32 %v1477_v17, %v608_v35  ;;  %v737_v38 = vadd.f32 %v1477_v17, %v736_v36 }
 0x12b   :  { %v610_v39 = vpop.f32.mrf.mxu0  ;;  %v738_v40 = vpop.f32.mrf.mxu1 }
 0x12c   :  { %v833_v41 = vmax.f32 %v609_v37, 0.0  ;;  %v865_v42 = vmax.f32 %v737_v38, 0.0 }
 0x12d   :  { %v611_v43 = vpop.f32.mrf.mxu0  ;;  %v739_v44 = vpop.f32.mrf.mxu1 }
 0x12e   :  { %897 = vst [vmem:[%s1738_s3 + $0x50] sm:$0xff] %v833_v41  ;;  %929 = vst [vmem:[%s1738_s3 + $0x150] sm:$0xff] %v865_v42  ;;  %v612_v45 = vadd.f32 %v1477_v17, %v611_v43  ;;  %v740_v46 = vadd.f32 %v1477_v17, %v739_v44 }
 0x12f   :  { %v613_v47 = vpop.f32.mrf.mxu0  ;;  %v741_v48 = vpop.f32.mrf.mxu1 }
 0x130   :  { %v834_v49 = vmax.f32 %v612_v45, 0.0  ;;  %v866_v50 = vmax.f32 %v740_v46, 0.0 }
 0x131   :  { %v616_v51 = vpop.f32.mrf.mxu0  ;;  %v744_v52 = vpop.f32.mrf.mxu1 }
 0x132   :  { %898 = vst [vmem:[%s1738_s3 + $0x58] sm:$0xff] %v834_v49  ;;  %930 = vst [vmem:[%s1738_s3 + $0x158] sm:$0xff] %v866_v50  ;;  %v617_v53 = vadd.f32 %v1477_v17, %v616_v51  ;;  %v745_v54 = vadd.f32 %v1477_v17, %v744_v52 }
 0x133   :  { %v618_v55 = vpop.f32.mrf.mxu0  ;;  %v746_v56 = vpop.f32.mrf.mxu1 }
 0x134   :  { %v835_v57 = vmax.f32 %v617_v53, 0.0  ;;  %v867_v58 = vmax.f32 %v745_v54, 0.0 }
 0x135   :  { %v619_v59 = vpop.f32.mrf.mxu0  ;;  %v747_v60 = vpop.f32.mrf.mxu1 }
 0x136   :  { %899 = vst [vmem:[%s1738_s3 + $0x60] sm:$0xff] %v835_v57  ;;  %931 = vst [vmem:[%s1738_s3 + $0x160] sm:$0xff] %v867_v58  ;;  %v620_v61 = vadd.f32 %v1477_v17, %v619_v59  ;;  %v748_v62 = vadd.f32 %v1477_v17, %v747_v60 }
 0x137   :  { %v621_v63 = vpop.f32.mrf.mxu0  ;;  %v749_v0 = vpop.f32.mrf.mxu1 }
 0x138   :  { %v836_v1 = vmax.f32 %v620_v61, 0.0  ;;  %v868_v2 = vmax.f32 %v748_v62, 0.0 }
 0x139   :  { %v624_v3 = vpop.f32.mrf.mxu0  ;;  %v752_v4 = vpop.f32.mrf.mxu1 }
 0x13a   :  { %900 = vst [vmem:[%s1738_s3 + $0x68] sm:$0xff] %v836_v1  ;;  %932 = vst [vmem:[%s1738_s3 + $0x168] sm:$0xff] %v868_v2  ;;  %v625_v5 = vadd.f32 %v1477_v17, %v624_v3  ;;  %v753_v6 = vadd.f32 %v1477_v17, %v752_v4 }
 0x13b   :  { %v626_v7 = vpop.f32.mrf.mxu0  ;;  %v754_v8 = vpop.f32.mrf.mxu1 }
 0x13c   :  { %v837_v9 = vmax.f32 %v625_v5, 0.0  ;;  %v869_v10 = vmax.f32 %v753_v6, 0.0 }
 0x13d   :  { %v627_v11 = vpop.f32.mrf.mxu0  ;;  %v755_v12 = vpop.f32.mrf.mxu1 }
 0x13e   :  { %901 = vst [vmem:[%s1738_s3 + $0x70] sm:$0xff] %v837_v9  ;;  %933 = vst [vmem:[%s1738_s3 + $0x170] sm:$0xff] %v869_v10  ;;  %v628_v13 = vadd.f32 %v1477_v17, %v627_v11  ;;  %v756_v14 = vadd.f32 %v1477_v17, %v755_v12 }
 0x13f   :  { %v629_v15 = vpop.f32.mrf.mxu0  ;;  %v757_v16 = vpop.f32.mrf.mxu1 }
 0x140   :  { %v838_v18 = vmax.f32 %v628_v13, 0.0  ;;  %v870_v19 = vmax.f32 %v756_v14, 0.0 }
 0x141   :  { %v632_v20 = vpop.f32.mrf.mxu0  ;;  %v760_v21 = vpop.f32.mrf.mxu1 }
 0x142   :  { %902 = vst [vmem:[%s1738_s3 + $0x78] sm:$0xff] %v838_v18  ;;  %934 = vst [vmem:[%s1738_s3 + $0x178] sm:$0xff] %v870_v19  ;;  %v633_v22 = vadd.f32 %v1477_v17, %v632_v20  ;;  %v761_v23 = vadd.f32 %v1477_v17, %v760_v21 }
 0x143   :  { %v634_v24 = vpop.f32.mrf.mxu0  ;;  %v762_v25 = vpop.f32.mrf.mxu1 }
 0x144   :  { %v839_v26 = vmax.f32 %v633_v22, 0.0  ;;  %v871_v27 = vmax.f32 %v761_v23, 0.0 }
 0x145   :  { %v635_v28 = vpop.f32.mrf.mxu0  ;;  %v763_v29 = vpop.f32.mrf.mxu1 }
 0x146   :  { %903 = vst [vmem:[%s1738_s3 + $0x80] sm:$0xff] %v839_v26  ;;  %935 = vst [vmem:[%s1738_s3 + $0x180] sm:$0xff] %v871_v27  ;;  %v636_v30 = vadd.f32 %v1477_v17, %v635_v28  ;;  %v764_v31 = vadd.f32 %v1477_v17, %v763_v29 }
 0x147   :  { %v637_v32 = vpop.f32.mrf.mxu0  ;;  %v765_v33 = vpop.f32.mrf.mxu1 }
 0x148   :  { %v840_v34 = vmax.f32 %v636_v30, 0.0  ;;  %v872_v35 = vmax.f32 %v764_v31, 0.0 }
 0x149   :  { %v640_v36 = vpop.f32.mrf.mxu0  ;;  %v768_v37 = vpop.f32.mrf.mxu1 }
 0x14a   :  { %904 = vst [vmem:[%s1738_s3 + $0x88] sm:$0xff] %v840_v34  ;;  %936 = vst [vmem:[%s1738_s3 + $0x188] sm:$0xff] %v872_v35  ;;  %v641_v38 = vadd.f32 %v1477_v17, %v640_v36  ;;  %v769_v39 = vadd.f32 %v1477_v17, %v768_v37 }
 0x14b   :  { %v642_v40 = vpop.f32.mrf.mxu0  ;;  %v770_v41 = vpop.f32.mrf.mxu1 }
 0x14c   :  { %v841_v42 = vmax.f32 %v641_v38, 0.0  ;;  %v873_v43 = vmax.f32 %v769_v39, 0.0 }
 0x14d   :  { %v643_v44 = vpop.f32.mrf.mxu0  ;;  %v771_v45 = vpop.f32.mrf.mxu1 }
 0x14e   :  { %905 = vst [vmem:[%s1738_s3 + $0x90] sm:$0xff] %v841_v42  ;;  %937 = vst [vmem:[%s1738_s3 + $0x190] sm:$0xff] %v873_v43  ;;  %v644_v46 = vadd.f32 %v1477_v17, %v643_v44  ;;  %v772_v47 = vadd.f32 %v1477_v17, %v771_v45 }
 0x14f   :  { %v645_v48 = vpop.f32.mrf.mxu0  ;;  %v773_v49 = vpop.f32.mrf.mxu1 }
 0x150   :  { %v842_v50 = vmax.f32 %v644_v46, 0.0  ;;  %v874_v51 = vmax.f32 %v772_v47, 0.0 }
 0x151   :  { %v648_v52 = vpop.f32.mrf.mxu0  ;;  %v776_v53 = vpop.f32.mrf.mxu1 }
 0x152   :  { %906 = vst [vmem:[%s1738_s3 + $0x98] sm:$0xff] %v842_v50  ;;  %938 = vst [vmem:[%s1738_s3 + $0x198] sm:$0xff] %v874_v51  ;;  %v649_v54 = vadd.f32 %v1477_v17, %v648_v52  ;;  %v777_v55 = vadd.f32 %v1477_v17, %v776_v53 }
 0x153   :  { %v650_v56 = vpop.f32.mrf.mxu0  ;;  %v778_v57 = vpop.f32.mrf.mxu1 }
 0x154   :  { %v843_v58 = vmax.f32 %v649_v54, 0.0  ;;  %v875_v59 = vmax.f32 %v777_v55, 0.0 }
 0x155   :  { %v651_v60 = vpop.f32.mrf.mxu0  ;;  %v779_v61 = vpop.f32.mrf.mxu1 }
 0x156   :  { %907 = vst [vmem:[%s1738_s3 + $0xa0] sm:$0xff] %v843_v58  ;;  %939 = vst [vmem:[%s1738_s3 + $0x1a0] sm:$0xff] %v875_v59  ;;  %v652_v62 = vadd.f32 %v1477_v17, %v651_v60  ;;  %v780_v63 = vadd.f32 %v1477_v17, %v779_v61 }
 0x157   :  { %v653_v0 = vpop.f32.mrf.mxu0  ;;  %v781_v1 = vpop.f32.mrf.mxu1 }
 0x158   :  { %v844_v2 = vmax.f32 %v652_v62, 0.0  ;;  %v876_v3 = vmax.f32 %v780_v63, 0.0 }
 0x159   :  { %v656_v4 = vpop.f32.mrf.mxu0  ;;  %v784_v5 = vpop.f32.mrf.mxu1 }
 0x15a   :  { %908 = vst [vmem:[%s1738_s3 + $0xa8] sm:$0xff] %v844_v2  ;;  %940 = vst [vmem:[%s1738_s3 + $0x1a8] sm:$0xff] %v876_v3  ;;  %v657_v6 = vadd.f32 %v1477_v17, %v656_v4  ;;  %v785_v7 = vadd.f32 %v1477_v17, %v784_v5 }
 0x15b   :  { %v658_v8 = vpop.f32.mrf.mxu0  ;;  %v786_v9 = vpop.f32.mrf.mxu1 }
 0x15c   :  { %v845_v10 = vmax.f32 %v657_v6, 0.0  ;;  %v877_v11 = vmax.f32 %v785_v7, 0.0 }
 0x15d   :  { %v659_v12 = vpop.f32.mrf.mxu0  ;;  %v787_v13 = vpop.f32.mrf.mxu1 }
 0x15e   :  { %909 = vst [vmem:[%s1738_s3 + $0xb0] sm:$0xff] %v845_v10  ;;  %941 = vst [vmem:[%s1738_s3 + $0x1b0] sm:$0xff] %v877_v11  ;;  %v660_v14 = vadd.f32 %v1477_v17, %v659_v12  ;;  %v788_v15 = vadd.f32 %v1477_v17, %v787_v13 }
 0x15f   :  { %v661_v16 = vpop.f32.mrf.mxu0  ;;  %v789_v18 = vpop.f32.mrf.mxu1 }
 0x160   :  { %v846_v19 = vmax.f32 %v660_v14, 0.0  ;;  %v878_v20 = vmax.f32 %v788_v15, 0.0 }
 0x161   :  { %v664_v21 = vpop.f32.mrf.mxu0  ;;  %v792_v22 = vpop.f32.mrf.mxu1 }
 0x162   :  { %910 = vst [vmem:[%s1738_s3 + $0xb8] sm:$0xff] %v846_v19  ;;  %942 = vst [vmem:[%s1738_s3 + $0x1b8] sm:$0xff] %v878_v20  ;;  %v665_v23 = vadd.f32 %v1477_v17, %v664_v21  ;;  %v793_v24 = vadd.f32 %v1477_v17, %v792_v22 }
 0x163   :  { %v666_v25 = vpop.f32.mrf.mxu0  ;;  %v794_v26 = vpop.f32.mrf.mxu1 }
 0x164   :  { %v847_v27 = vmax.f32 %v665_v23, 0.0  ;;  %v879_v28 = vmax.f32 %v793_v24, 0.0 }
 0x165   :  { %v667_v29 = vpop.f32.mrf.mxu0  ;;  %v795_v30 = vpop.f32.mrf.mxu1 }
 0x166   :  { %911 = vst [vmem:[%s1738_s3 + $0xc0] sm:$0xff] %v847_v27  ;;  %943 = vst [vmem:[%s1738_s3 + $0x1c0] sm:$0xff] %v879_v28  ;;  %v668_v31 = vadd.f32 %v1477_v17, %v667_v29  ;;  %v796_v32 = vadd.f32 %v1477_v17, %v795_v30 }
 0x167   :  { %v669_v33 = vpop.f32.mrf.mxu0  ;;  %v797_v34 = vpop.f32.mrf.mxu1 }
 0x168   :  { %v848_v35 = vmax.f32 %v668_v31, 0.0  ;;  %v880_v36 = vmax.f32 %v796_v32, 0.0 }
 0x169   :  { %v672_v37 = vpop.f32.mrf.mxu0  ;;  %v800_v38 = vpop.f32.mrf.mxu1 }
 0x16a   :  { %912 = vst [vmem:[%s1738_s3 + $0xc8] sm:$0xff] %v848_v35  ;;  %944 = vst [vmem:[%s1738_s3 + $0x1c8] sm:$0xff] %v880_v36  ;;  %v673_v39 = vadd.f32 %v1477_v17, %v672_v37  ;;  %v801_v40 = vadd.f32 %v1477_v17, %v800_v38 }
 0x16b   :  { %v674_v41 = vpop.f32.mrf.mxu0  ;;  %v802_v42 = vpop.f32.mrf.mxu1 }
 0x16c   :  { %v849_v43 = vmax.f32 %v673_v39, 0.0  ;;  %v881_v44 = vmax.f32 %v801_v40, 0.0 }
 0x16d   :  { %v675_v45 = vpop.f32.mrf.mxu0  ;;  %v803_v46 = vpop.f32.mrf.mxu1 }
 0x16e   :  { %913 = vst [vmem:[%s1738_s3 + $0xd0] sm:$0xff] %v849_v43  ;;  %945 = vst [vmem:[%s1738_s3 + $0x1d0] sm:$0xff] %v881_v44  ;;  %v676_v47 = vadd.f32 %v1477_v17, %v675_v45  ;;  %v804_v48 = vadd.f32 %v1477_v17, %v803_v46 }
 0x16f   :  { %v677_v49 = vpop.f32.mrf.mxu0  ;;  %v805_v50 = vpop.f32.mrf.mxu1 }
 0x170   :  { %v850_v51 = vmax.f32 %v676_v47, 0.0  ;;  %v882_v52 = vmax.f32 %v804_v48, 0.0 }
 0x171   :  { %v680_v53 = vpop.f32.mrf.mxu0  ;;  %v808_v54 = vpop.f32.mrf.mxu1 }
 0x172   :  { %914 = vst [vmem:[%s1738_s3 + $0xd8] sm:$0xff] %v850_v51  ;;  %946 = vst [vmem:[%s1738_s3 + $0x1d8] sm:$0xff] %v882_v52  ;;  %v681_v55 = vadd.f32 %v1477_v17, %v680_v53  ;;  %v809_v56 = vadd.f32 %v1477_v17, %v808_v54 }
 0x173   :  { %v682_v57 = vpop.f32.mrf.mxu0  ;;  %v810_v58 = vpop.f32.mrf.mxu1 }
 0x174   :  { %v851_v59 = vmax.f32 %v681_v55, 0.0  ;;  %v883_v60 = vmax.f32 %v809_v56, 0.0 }
 0x175   :  { %v683_v61 = vpop.f32.mrf.mxu0  ;;  %v811_v62 = vpop.f32.mrf.mxu1 }
 0x176   :  { %915 = vst [vmem:[%s1738_s3 + $0xe0] sm:$0xff] %v851_v59  ;;  %947 = vst [vmem:[%s1738_s3 + $0x1e0] sm:$0xff] %v883_v60  ;;  %v684_v63 = vadd.f32 %v1477_v17, %v683_v61  ;;  %v812_v0 = vadd.f32 %v1477_v17, %v811_v62 }
 0x177   :  { %v685_v1 = vpop.f32.mrf.mxu0  ;;  %v813_v2 = vpop.f32.mrf.mxu1 }
 0x178   :  { %v852_v3 = vmax.f32 %v684_v63, 0.0  ;;  %v884_v4 = vmax.f32 %v812_v0, 0.0 }
 0x179   :  { %v688_v5 = vpop.f32.mrf.mxu0  ;;  %v816_v6 = vpop.f32.mrf.mxu1 }
 0x17a   :  { %916 = vst [vmem:[%s1738_s3 + $0xe8] sm:$0xff] %v852_v3  ;;  %948 = vst [vmem:[%s1738_s3 + $0x1e8] sm:$0xff] %v884_v4  ;;  %v689_v7 = vadd.f32 %v1477_v17, %v688_v5  ;;  %v817_v8 = vadd.f32 %v1477_v17, %v816_v6 }
 0x17b   :  { %v690_v9 = vpop.f32.mrf.mxu0  ;;  %v818_v10 = vpop.f32.mrf.mxu1 }
 0x17c   :  { %v853_v11 = vmax.f32 %v689_v7, 0.0  ;;  %v885_v12 = vmax.f32 %v817_v8, 0.0 }
 0x17d   :  { %v691_v13 = vpop.f32.mrf.mxu0  ;;  %v819_v14 = vpop.f32.mrf.mxu1 }
 0x17e   :  { %917 = vst [vmem:[%s1738_s3 + $0xf0] sm:$0xff] %v853_v11  ;;  %949 = vst [vmem:[%s1738_s3 + $0x1f0] sm:$0xff] %v885_v12  ;;  %v692_v15 = vadd.f32 %v1477_v17, %v691_v13  ;;  %v820_v16 = vadd.f32 %v1477_v17, %v819_v14 }
 0x17f   :  { %v693_v18 = vpop.f32.mrf.mxu0  ;;  %v821_v19 = vpop.f32.mrf.mxu1 }
 0x180   :  { %v854_v20 = vmax.f32 %v692_v15, 0.0  ;;  %v886_v21 = vmax.f32 %v820_v16, 0.0 }
 0x182   :  { %918 = vst [vmem:[%s1738_s3 + $0xf8] sm:$0xff] %v854_v20  ;;  %950 = vst [vmem:[%s1738_s3 + $0x1f8] sm:$0xff] %v886_v21 }

</bundles_post_ra>
